<compile_context>
chip_gen: v5e
topology: v5e:2x2
jax: 0.10.0
libtpu: 0.0.40
codegen_flags: <defaults>
</compile_context>

<pallas_src>
import jax
import jax.numpy as jnp
from jax import lax
from jax.experimental import pallas as pl
from jax.experimental.pallas import tpu as pltpu


# --------------------------- host-side weight prep -------------------------- #
def _banded_conv_mats(w_oihw, w_in):
    """Per kernel-row matrices M[kh] : [W_in*Cin, OW*Cout] with
    M[kh][(ow+kw)*Cin+ci, ow*Cout+co] = w[co, ci, kh, kw] (0 elsewhere)."""
    cout, cin, kh_sz, kw_sz = w_oihw.shape
    ow = w_in - kw_sz + 1
    wt = jnp.transpose(w_oihw, (2, 3, 1, 0)).astype(jnp.float32)       # [KH,KW,Cin,Cout]
    band = (jnp.arange(w_in)[None, :, None] ==
            jnp.arange(ow)[None, None, :] + jnp.arange(kw_sz)[:, None, None]
            ).astype(jnp.float32)                                       # [KW,W_in,OW]
    m = jnp.einsum("kwo,hkcd->hwcod", band, wt)                         # [KH,W_in,Cin,OW,Cout]
    return m.reshape(kh_sz, w_in * cin, ow * cout)


def _pool_row_selectors(h):
    """0/1 matrices picking even/odd rows: Pe, Po : [h//2, h]."""
    i = jnp.arange(h // 2)[:, None]
    j = jnp.arange(h)[None, :]
    return (j == 2 * i).astype(jnp.float32), (j == 2 * i + 1).astype(jnp.float32)


def _pool_col_selectors(w, c):
    """0/1 matrices picking even/odd W-blocks of a (w,c)-interleaved lane dim:
    Se, So : [w*c, (w//2)*c]."""
    r = jnp.arange(w * c)
    q = jnp.arange((w // 2) * c)
    rw, rc = r[:, None] // c, r[:, None] % c
    qj, qc = q[None, :] // c, q[None, :] % c
    se = ((rw == 2 * qj) & (rc == qc)).astype(jnp.float32)
    so = ((rw == 2 * qj + 1) & (rc == qc)).astype(jnp.float32)
    return se, so


# ------------------------------ fused kernel -------------------------------- #
def _fused_kernel(x_ref, m1_ref, b1_ref, p1e_ref, p1o_ref, s1e_ref, s1o_ref,
                  m2_ref, b2_ref, p2e_ref, p2o_ref, s2e_ref, s2o_ref,
                  wf1_ref, bf1_ref, wf2_ref, bf2_ref, o_ref):
    B, H1, _ = x_ref.shape
    KH1 = m1_ref.shape[0]
    OH1 = H1 - KH1 + 1                  # 28
    KH2 = m2_ref.shape[0]
    H2 = p1e_ref.shape[0]               # 14 (pooled height after pool1)
    OH2 = H2 - KH2 + 1                  # 10
    NH = wf1_ref.shape[0]               # 5 rows entering fc1

    def dot(a, b):
        return jnp.dot(a, b, preferred_element_type=jnp.float32)

    # hoist the small operands once
    b1 = b1_ref[...]
    b2 = b2_ref[...]
    p1e, p1o = p1e_ref[...], p1o_ref[...]
    s1e, s1o = s1e_ref[...], s1o_ref[...]
    p2e, p2o = p2e_ref[...], p2o_ref[...]
    s2e, s2o = s2e_ref[...], s2o_ref[...]
    bf1 = bf1_ref[...]
    bf2 = bf2_ref[...]
    wf2 = wf2_ref[...]

    for b in range(B):                                   # unrolled; B is tiny
        xb = x_ref[b]                                    # [32, 96]  (h, w*cin)

        # ---- conv1 + bias + tanh: 5 banded matmuls -> [28, 168] ----
        acc = dot(xb[0:OH1, :], m1_ref[0])
        for kh in range(1, KH1):
            acc += dot(xb[kh:kh + OH1, :], m1_ref[kh])
        h = jnp.tanh(acc + b1)

        # ---- pool1 (2x2 max) fused: row-select then lane-block-select ----
        h = jnp.maximum(dot(p1e, h), dot(p1o, h))        # [14, 168]
        h = jnp.maximum(dot(h, s1e), dot(h, s1o))        # [14, 84]

        # ---- conv2 + bias + tanh -> [10, 160] ----
        acc = dot(h[0:OH2, :], m2_ref[0])
        for kh in range(1, KH2):
            acc += dot(h[kh:kh + OH2, :], m2_ref[kh])
        h = jnp.tanh(acc + b2)

        # ---- pool2 -> [5, 80] ----
        h = jnp.maximum(dot(p2e, h), dot(p2o, h))        # [5, 160]
        h = jnp.maximum(dot(h, s2e), dot(h, s2o))        # [5, 80]

        # ---- fc1 + tanh (torch CHW flatten folded into wf1 layout) ----
        z = dot(h[0:1, :], wf1_ref[0])
        for r in range(1, NH):
            z += dot(h[r:r + 1, :], wf1_ref[r])
        z = jnp.tanh(z + bf1)                            # [1, 128]

        # ---- fc2 ----
        o_ref[pl.ds(b, 1), :] = dot(z, wf2) + bf2        # [1, 10]


# ------------------------------- full forward ------------------------------- #
def net_cifar10_forward(params, x_nchw):
    B, cin, H, W = x_nchw.shape                          # (B, 3, 32, 32)
    # host-side layout prep: one NHWC transform of the input + tiny weight-only
    # transforms (all fused by XLA; no activation round-trips through HBM).
    x3 = jnp.transpose(x_nchw, (0, 2, 3, 1)).reshape(B, H, W * cin)    # [B,32,96]

    m1 = _banded_conv_mats(params["conv1_w"], W)                       # [5,96,168]
    b1 = jnp.tile(params["conv1_b"], W - 4)[None, :]                   # [1,168]
    p1e, p1o = _pool_row_selectors(H - 4)                              # [14,28]
    s1e, s1o = _pool_col_selectors(W - 4, 6)                           # [168,84]

    w2 = (W - 4) // 2                                                  # 14
    m2 = _banded_conv_mats(params["conv2_w"], w2)                      # [5,84,160]
    b2 = jnp.tile(params["conv2_b"], w2 - 4)[None, :]                  # [1,160]
    p2e, p2o = _pool_row_selectors((H - 4) // 2 - 4)                   # [5,10]
    s2e, s2o = _pool_col_selectors(w2 - 4, 16)                         # [160,80]

    # fc1 weight reordered so the (C,H,W) torch flatten becomes a sum over the
    # pooled spatial rows of the wide (w*c) activation: wf1[h][w*16+c, out].
    wf1 = params["fc1_w"].reshape(128, 16, 5, 5).transpose(2, 3, 1, 0).reshape(5, 80, 128)
    bf1 = params["fc1_b"][None, :]
    wf2 = params["fc2_w"].T                                            # [128,10]
    bf2 = params["fc2_b"][None, :]

    args = (x3, m1, b1, p1e, p1o, s1e, s1o, m2, b2, p2e, p2o, s2e, s2o,
            wf1, bf1, wf2, bf2)
    return pl.pallas_call(
        _fused_kernel,
        out_shape=jax.ShapeDtypeStruct((B, 10), jnp.float32),
        in_specs=[pl.BlockSpec(memory_space=pltpu.MemorySpace.VMEM) for _ in args],
        out_specs=pl.BlockSpec(memory_space=pltpu.MemorySpace.VMEM),
    )(*args)


# --------------------------- pure-JAX reference ------------------------------ #
def net_cifar10_reference(params, x):
    dn = ("NCHW", "OIHW", "NCHW")
    y = lax.conv_general_dilated(x, params["conv1_w"], (1, 1), "VALID",
                                 dimension_numbers=dn)
    y = jnp.tanh(y + params["conv1_b"][None, :, None, None])
    y = lax.reduce_window(y, -jnp.inf, lax.max, (1, 1, 2, 2), (1, 1, 2, 2), "VALID")
    y = lax.conv_general_dilated(y, params["conv2_w"], (1, 1), "VALID",
                                 dimension_numbers=dn)
    y = jnp.tanh(y + params["conv2_b"][None, :, None, None])
    y = lax.reduce_window(y, -jnp.inf, lax.max, (1, 1, 2, 2), (1, 1, 2, 2), "VALID")
    y = y.reshape(y.shape[0], -1)                         # torch (C,H,W) flatten
    y = jnp.tanh(y @ params["fc1_w"].T + params["fc1_b"])
    return y @ params["fc2_w"].T + params["fc2_b"]


# --------------------------- deterministic params ---------------------------- #
def init_params(key):
    ks = jax.random.split(key, 8)

    def u(k, shape, fan_in):
        bound = 1.0 / (fan_in ** 0.5)      # mimic PyTorch default init range
        return jax.random.uniform(k, shape, jnp.float32, -bound, bound)

    return {
        "conv1_w": u(ks[0], (6, 3, 5, 5), 3 * 5 * 5),
        "conv1_b": u(ks[1], (6,), 3 * 5 * 5),
        "conv2_w": u(ks[2], (16, 6, 5, 5), 6 * 5 * 5),
        "conv2_b": u(ks[3], (16,), 6 * 5 * 5),
        "fc1_w": u(ks[4], (128, 16 * 5 * 5), 16 * 5 * 5),
        "fc1_b": u(ks[5], (128,), 16 * 5 * 5),
        "fc2_w": u(ks[6], (10, 128), 128),
        "fc2_b": u(ks[7], (10,), 128),
    }


if __name__ == "__main__":
    key = jax.random.PRNGKey(0)
    pkey, xkey = jax.random.split(key)
    params = init_params(pkey)
    # CIFAR-10 spatial size (32x32) is required by the 16*5*5 flatten; batch=2.
    x = jax.random.normal(xkey, (2, 3, 32, 32), jnp.float32)

    out = jax.jit(net_cifar10_forward)(params, x)
    out = jax.block_until_ready(out)
    assert out.shape == (2, 10) and out.dtype == jnp.float32

    ref = net_cifar10_reference(params, x)
    assert jnp.allclose(out, ref, rtol=1e-4, atol=1e-4), \
        float(jnp.max(jnp.abs(out - ref)))
    print("KERNEL_OK")
</pallas_src>

<mosaic_0001>
module attributes {stable_mosaic.version = 11 : i64} {
  func.func @_fused_kernel(%arg0: memref<2x32x96xf32, #tpu.memory_space<vmem>>, %arg1: memref<5x96x168xf32, #tpu.memory_space<vmem>>, %arg2: memref<1x168xf32, #tpu.memory_space<vmem>>, %arg3: memref<14x28xf32, #tpu.memory_space<vmem>>, %arg4: memref<14x28xf32, #tpu.memory_space<vmem>>, %arg5: memref<168x84xf32, #tpu.memory_space<vmem>>, %arg6: memref<168x84xf32, #tpu.memory_space<vmem>>, %arg7: memref<5x84x160xf32, #tpu.memory_space<vmem>>, %arg8: memref<1x160xf32, #tpu.memory_space<vmem>>, %arg9: memref<5x10xf32, #tpu.memory_space<vmem>>, %arg10: memref<5x10xf32, #tpu.memory_space<vmem>>, %arg11: memref<160x80xf32, #tpu.memory_space<vmem>>, %arg12: memref<160x80xf32, #tpu.memory_space<vmem>>, %arg13: memref<5x80x128xf32, #tpu.memory_space<vmem>>, %arg14: memref<1x128xf32, #tpu.memory_space<vmem>>, %arg15: memref<128x10xf32, #tpu.memory_space<vmem>>, %arg16: memref<1x10xf32, #tpu.memory_space<vmem>>, %arg17: memref<2x10xf32, #tpu.memory_space<vmem>>) attributes {dimension_semantics = [], scalar_prefetch = 0 : i64, scratch_operands = 0 : i64, tpu.core_type = #tpu.core_type<tc>} {
    %c0 = arith.constant 0 : index
    %c0_0 = arith.constant 0 : index
    %0 = vector.load %arg2[%c0, %c0_0] : memref<1x168xf32, #tpu.memory_space<vmem>>, vector<1x168xf32>
    %c0_1 = arith.constant 0 : index
    %c0_2 = arith.constant 0 : index
    %1 = vector.load %arg8[%c0_1, %c0_2] : memref<1x160xf32, #tpu.memory_space<vmem>>, vector<1x160xf32>
    %c0_3 = arith.constant 0 : index
    %c0_4 = arith.constant 0 : index
    %2 = vector.load %arg3[%c0_3, %c0_4] : memref<14x28xf32, #tpu.memory_space<vmem>>, vector<14x28xf32>
    %c0_5 = arith.constant 0 : index
    %c0_6 = arith.constant 0 : index
    %3 = vector.load %arg4[%c0_5, %c0_6] : memref<14x28xf32, #tpu.memory_space<vmem>>, vector<14x28xf32>
    %c0_7 = arith.constant 0 : index
    %c0_8 = arith.constant 0 : index
    %4 = vector.load %arg5[%c0_7, %c0_8] : memref<168x84xf32, #tpu.memory_space<vmem>>, vector<168x84xf32>
    %c0_9 = arith.constant 0 : index
    %c0_10 = arith.constant 0 : index
    %5 = vector.load %arg6[%c0_9, %c0_10] : memref<168x84xf32, #tpu.memory_space<vmem>>, vector<168x84xf32>
    %c0_11 = arith.constant 0 : index
    %c0_12 = arith.constant 0 : index
    %6 = vector.load %arg9[%c0_11, %c0_12] : memref<5x10xf32, #tpu.memory_space<vmem>>, vector<5x10xf32>
    %c0_13 = arith.constant 0 : index
    %c0_14 = arith.constant 0 : index
    %7 = vector.load %arg10[%c0_13, %c0_14] : memref<5x10xf32, #tpu.memory_space<vmem>>, vector<5x10xf32>
    %c0_15 = arith.constant 0 : index
    %c0_16 = arith.constant 0 : index
    %8 = vector.load %arg11[%c0_15, %c0_16] : memref<160x80xf32, #tpu.memory_space<vmem>>, vector<160x80xf32>
    %c0_17 = arith.constant 0 : index
    %c0_18 = arith.constant 0 : index
    %9 = vector.load %arg12[%c0_17, %c0_18] : memref<160x80xf32, #tpu.memory_space<vmem>>, vector<160x80xf32>
    %c0_19 = arith.constant 0 : index
    %c0_20 = arith.constant 0 : index
    %10 = vector.load %arg14[%c0_19, %c0_20] : memref<1x128xf32, #tpu.memory_space<vmem>>, vector<1x128xf32>
    %c0_21 = arith.constant 0 : index
    %c0_22 = arith.constant 0 : index
    %11 = vector.load %arg16[%c0_21, %c0_22] : memref<1x10xf32, #tpu.memory_space<vmem>>, vector<1x10xf32>
    %c0_23 = arith.constant 0 : index
    %c0_24 = arith.constant 0 : index
    %12 = vector.load %arg15[%c0_23, %c0_24] : memref<128x10xf32, #tpu.memory_space<vmem>>, vector<128x10xf32>
    %c0_25 = arith.constant 0 : index
    %c0_26 = arith.constant 0 : index
    %c0_27 = arith.constant 0 : index
    %13 = vector.load %arg0[%c0_25, %c0_26, %c0_27] : memref<2x32x96xf32, #tpu.memory_space<vmem>>, vector<1x32x96xf32>
    %14 = vector.shape_cast %13 : vector<1x32x96xf32> to vector<32x96xf32>
    %15 = vector.extract_strided_slice %14 {offsets = [0, 0], sizes = [28, 96], strides = [1, 1]} : vector<32x96xf32> to vector<28x96xf32>
    %c0_28 = arith.constant 0 : index
    %c0_29 = arith.constant 0 : index
    %c0_30 = arith.constant 0 : index
    %16 = vector.load %arg1[%c0_28, %c0_29, %c0_30] : memref<5x96x168xf32, #tpu.memory_space<vmem>>, vector<1x96x168xf32>
    %17 = vector.shape_cast %16 : vector<1x96x168xf32> to vector<96x168xf32>
    %cst = arith.constant dense<0.000000e+00> : vector<28x168xf32>
    %18 = tpu.matmul %15, %17, %cst {dimension_numbers = #tpu.dot_dimension_numbers<[1], [0], [0], [1], [0, 0, 1, 1], [], []>} : vector<28x96xf32>, vector<96x168xf32>, vector<28x168xf32> -> vector<28x168xf32>
    %19 = vector.extract_strided_slice %14 {offsets = [1, 0], sizes = [28, 96], strides = [1, 1]} : vector<32x96xf32> to vector<28x96xf32>
    %c1 = arith.constant 1 : index
    %c0_31 = arith.constant 0 : index
    %c0_32 = arith.constant 0 : index
    %20 = vector.load %arg1[%c1, %c0_31, %c0_32] : memref<5x96x168xf32, #tpu.memory_space<vmem>>, vector<1x96x168xf32>
    %21 = vector.shape_cast %20 : vector<1x96x168xf32> to vector<96x168xf32>
    %cst_33 = arith.constant dense<0.000000e+00> : vector<28x168xf32>
    %22 = tpu.matmul %19, %21, %cst_33 {dimension_numbers = #tpu.dot_dimension_numbers<[1], [0], [0], [1], [0, 0, 1, 1], [], []>} : vector<28x96xf32>, vector<96x168xf32>, vector<28x168xf32> -> vector<28x168xf32>
    %23 = arith.addf %18, %22 : vector<28x168xf32>
    %24 = vector.extract_strided_slice %14 {offsets = [2, 0], sizes = [28, 96], strides = [1, 1]} : vector<32x96xf32> to vector<28x96xf32>
    %c2 = arith.constant 2 : index
    %c0_34 = arith.constant 0 : index
    %c0_35 = arith.constant 0 : index
    %25 = vector.load %arg1[%c2, %c0_34, %c0_35] : memref<5x96x168xf32, #tpu.memory_space<vmem>>, vector<1x96x168xf32>
    %26 = vector.shape_cast %25 : vector<1x96x168xf32> to vector<96x168xf32>
    %cst_36 = arith.constant dense<0.000000e+00> : vector<28x168xf32>
    %27 = tpu.matmul %24, %26, %cst_36 {dimension_numbers = #tpu.dot_dimension_numbers<[1], [0], [0], [1], [0, 0, 1, 1], [], []>} : vector<28x96xf32>, vector<96x168xf32>, vector<28x168xf32> -> vector<28x168xf32>
    %28 = arith.addf %23, %27 : vector<28x168xf32>
    %29 = vector.extract_strided_slice %14 {offsets = [3, 0], sizes = [28, 96], strides = [1, 1]} : vector<32x96xf32> to vector<28x96xf32>
    %c3 = arith.constant 3 : index
    %c0_37 = arith.constant 0 : index
    %c0_38 = arith.constant 0 : index
    %30 = vector.load %arg1[%c3, %c0_37, %c0_38] : memref<5x96x168xf32, #tpu.memory_space<vmem>>, vector<1x96x168xf32>
    %31 = vector.shape_cast %30 : vector<1x96x168xf32> to vector<96x168xf32>
    %cst_39 = arith.constant dense<0.000000e+00> : vector<28x168xf32>
    %32 = tpu.matmul %29, %31, %cst_39 {dimension_numbers = #tpu.dot_dimension_numbers<[1], [0], [0], [1], [0, 0, 1, 1], [], []>} : vector<28x96xf32>, vector<96x168xf32>, vector<28x168xf32> -> vector<28x168xf32>
    %33 = arith.addf %28, %32 : vector<28x168xf32>
    %34 = vector.extract_strided_slice %14 {offsets = [4, 0], sizes = [28, 96], strides = [1, 1]} : vector<32x96xf32> to vector<28x96xf32>
    %c4 = arith.constant 4 : index
    %c0_40 = arith.constant 0 : index
    %c0_41 = arith.constant 0 : index
    %35 = vector.load %arg1[%c4, %c0_40, %c0_41] : memref<5x96x168xf32, #tpu.memory_space<vmem>>, vector<1x96x168xf32>
    %36 = vector.shape_cast %35 : vector<1x96x168xf32> to vector<96x168xf32>
    %cst_42 = arith.constant dense<0.000000e+00> : vector<28x168xf32>
    %37 = tpu.matmul %34, %36, %cst_42 {dimension_numbers = #tpu.dot_dimension_numbers<[1], [0], [0], [1], [0, 0, 1, 1], [], []>} : vector<28x96xf32>, vector<96x168xf32>, vector<28x168xf32> -> vector<28x168xf32>
    %38 = arith.addf %33, %37 : vector<28x168xf32>
    %39 = vector.broadcast %0 : vector<1x168xf32> to vector<28x168xf32>
    %40 = arith.addf %38, %39 : vector<28x168xf32>
    %41 = math.tanh %40 : vector<28x168xf32>
    %cst_43 = arith.constant dense<0.000000e+00> : vector<14x168xf32>
    %42 = tpu.matmul %2, %41, %cst_43 {dimension_numbers = #tpu.dot_dimension_numbers<[1], [0], [0], [1], [0, 0, 1, 1], [], []>} : vector<14x28xf32>, vector<28x168xf32>, vector<14x168xf32> -> vector<14x168xf32>
    %cst_44 = arith.constant dense<0.000000e+00> : vector<14x168xf32>
    %43 = tpu.matmul %3, %41, %cst_44 {dimension_numbers = #tpu.dot_dimension_numbers<[1], [0], [0], [1], [0, 0, 1, 1], [], []>} : vector<14x28xf32>, vector<28x168xf32>, vector<14x168xf32> -> vector<14x168xf32>
    %44 = arith.maximumf %42, %43 : vector<14x168xf32>
    %cst_45 = arith.constant dense<0.000000e+00> : vector<14x84xf32>
    %45 = tpu.matmul %44, %4, %cst_45 {dimension_numbers = #tpu.dot_dimension_numbers<[1], [0], [0], [1], [0, 0, 1, 1], [], []>} : vector<14x168xf32>, vector<168x84xf32>, vector<14x84xf32> -> vector<14x84xf32>
    %cst_46 = arith.constant dense<0.000000e+00> : vector<14x84xf32>
    %46 = tpu.matmul %44, %5, %cst_46 {dimension_numbers = #tpu.dot_dimension_numbers<[1], [0], [0], [1], [0, 0, 1, 1], [], []>} : vector<14x168xf32>, vector<168x84xf32>, vector<14x84xf32> -> vector<14x84xf32>
    %47 = arith.maximumf %45, %46 : vector<14x84xf32>
    %48 = vector.extract_strided_slice %47 {offsets = [0, 0], sizes = [10, 84], strides = [1, 1]} : vector<14x84xf32> to vector<10x84xf32>
    %c0_47 = arith.constant 0 : index
    %c0_48 = arith.constant 0 : index
    %c0_49 = arith.constant 0 : index
    %49 = vector.load %arg7[%c0_47, %c0_48, %c0_49] : memref<5x84x160xf32, #tpu.memory_space<vmem>>, vector<1x84x160xf32>
    %50 = vector.shape_cast %49 : vector<1x84x160xf32> to vector<84x160xf32>
    %cst_50 = arith.constant dense<0.000000e+00> : vector<10x160xf32>
    %51 = tpu.matmul %48, %50, %cst_50 {dimension_numbers = #tpu.dot_dimension_numbers<[1], [0], [0], [1], [0, 0, 1, 1], [], []>} : vector<10x84xf32>, vector<84x160xf32>, vector<10x160xf32> -> vector<10x160xf32>
    %52 = vector.extract_strided_slice %47 {offsets = [1, 0], sizes = [10, 84], strides = [1, 1]} : vector<14x84xf32> to vector<10x84xf32>
    %c1_51 = arith.constant 1 : index
    %c0_52 = arith.constant 0 : index
    %c0_53 = arith.constant 0 : index
    %53 = vector.load %arg7[%c1_51, %c0_52, %c0_53] : memref<5x84x160xf32, #tpu.memory_space<vmem>>, vector<1x84x160xf32>
    %54 = vector.shape_cast %53 : vector<1x84x160xf32> to vector<84x160xf32>
    %cst_54 = arith.constant dense<0.000000e+00> : vector<10x160xf32>
    %55 = tpu.matmul %52, %54, %cst_54 {dimension_numbers = #tpu.dot_dimension_numbers<[1], [0], [0], [1], [0, 0, 1, 1], [], []>} : vector<10x84xf32>, vector<84x160xf32>, vector<10x160xf32> -> vector<10x160xf32>
    %56 = arith.addf %51, %55 : vector<10x160xf32>
    %57 = vector.extract_strided_slice %47 {offsets = [2, 0], sizes = [10, 84], strides = [1, 1]} : vector<14x84xf32> to vector<10x84xf32>
    %c2_55 = arith.constant 2 : index
    %c0_56 = arith.constant 0 : index
    %c0_57 = arith.constant 0 : index
    %58 = vector.load %arg7[%c2_55, %c0_56, %c0_57] : memref<5x84x160xf32, #tpu.memory_space<vmem>>, vector<1x84x160xf32>
    %59 = vector.shape_cast %58 : vector<1x84x160xf32> to vector<84x160xf32>
    %cst_58 = arith.constant dense<0.000000e+00> : vector<10x160xf32>
    %60 = tpu.matmul %57, %59, %cst_58 {dimension_numbers = #tpu.dot_dimension_numbers<[1], [0], [0], [1], [0, 0, 1, 1], [], []>} : vector<10x84xf32>, vector<84x160xf32>, vector<10x160xf32> -> vector<10x160xf32>
    %61 = arith.addf %56, %60 : vector<10x160xf32>
    %62 = vector.extract_strided_slice %47 {offsets = [3, 0], sizes = [10, 84], strides = [1, 1]} : vector<14x84xf32> to vector<10x84xf32>
    %c3_59 = arith.constant 3 : index
    %c0_60 = arith.constant 0 : index
    %c0_61 = arith.constant 0 : index
    %63 = vector.load %arg7[%c3_59, %c0_60, %c0_61] : memref<5x84x160xf32, #tpu.memory_space<vmem>>, vector<1x84x160xf32>
    %64 = vector.shape_cast %63 : vector<1x84x160xf32> to vector<84x160xf32>
    %cst_62 = arith.constant dense<0.000000e+00> : vector<10x160xf32>
    %65 = tpu.matmul %62, %64, %cst_62 {dimension_numbers = #tpu.dot_dimension_numbers<[1], [0], [0], [1], [0, 0, 1, 1], [], []>} : vector<10x84xf32>, vector<84x160xf32>, vector<10x160xf32> -> vector<10x160xf32>
    %66 = arith.addf %61, %65 : vector<10x160xf32>
    %67 = vector.extract_strided_slice %47 {offsets = [4, 0], sizes = [10, 84], strides = [1, 1]} : vector<14x84xf32> to vector<10x84xf32>
    %c4_63 = arith.constant 4 : index
    %c0_64 = arith.constant 0 : index
    %c0_65 = arith.constant 0 : index
    %68 = vector.load %arg7[%c4_63, %c0_64, %c0_65] : memref<5x84x160xf32, #tpu.memory_space<vmem>>, vector<1x84x160xf32>
    %69 = vector.shape_cast %68 : vector<1x84x160xf32> to vector<84x160xf32>
    %cst_66 = arith.constant dense<0.000000e+00> : vector<10x160xf32>
    %70 = tpu.matmul %67, %69, %cst_66 {dimension_numbers = #tpu.dot_dimension_numbers<[1], [0], [0], [1], [0, 0, 1, 1], [], []>} : vector<10x84xf32>, vector<84x160xf32>, vector<10x160xf32> -> vector<10x160xf32>
    %71 = arith.addf %66, %70 : vector<10x160xf32>
    %72 = vector.broadcast %1 : vector<1x160xf32> to vector<10x160xf32>
    %73 = arith.addf %71, %72 : vector<10x160xf32>
    %74 = math.tanh %73 : vector<10x160xf32>
    %cst_67 = arith.constant dense<0.000000e+00> : vector<5x160xf32>
    %75 = tpu.matmul %6, %74, %cst_67 {dimension_numbers = #tpu.dot_dimension_numbers<[1], [0], [0], [1], [0, 0, 1, 1], [], []>} : vector<5x10xf32>, vector<10x160xf32>, vector<5x160xf32> -> vector<5x160xf32>
    %cst_68 = arith.constant dense<0.000000e+00> : vector<5x160xf32>
    %76 = tpu.matmul %7, %74, %cst_68 {dimension_numbers = #tpu.dot_dimension_numbers<[1], [0], [0], [1], [0, 0, 1, 1], [], []>} : vector<5x10xf32>, vector<10x160xf32>, vector<5x160xf32> -> vector<5x160xf32>
    %77 = arith.maximumf %75, %76 : vector<5x160xf32>
    %cst_69 = arith.constant dense<0.000000e+00> : vector<5x80xf32>
    %78 = tpu.matmul %77, %8, %cst_69 {dimension_numbers = #tpu.dot_dimension_numbers<[1], [0], [0], [1], [0, 0, 1, 1], [], []>} : vector<5x160xf32>, vector<160x80xf32>, vector<5x80xf32> -> vector<5x80xf32>
    %cst_70 = arith.constant dense<0.000000e+00> : vector<5x80xf32>
    %79 = tpu.matmul %77, %9, %cst_70 {dimension_numbers = #tpu.dot_dimension_numbers<[1], [0], [0], [1], [0, 0, 1, 1], [], []>} : vector<5x160xf32>, vector<160x80xf32>, vector<5x80xf32> -> vector<5x80xf32>
    %80 = arith.maximumf %78, %79 : vector<5x80xf32>
    %81 = vector.extract_strided_slice %80 {offsets = [0, 0], sizes = [1, 80], strides = [1, 1]} : vector<5x80xf32> to vector<1x80xf32>
    %c0_71 = arith.constant 0 : index
    %c0_72 = arith.constant 0 : index
    %c0_73 = arith.constant 0 : index
    %82 = vector.load %arg13[%c0_71, %c0_72, %c0_73] : memref<5x80x128xf32, #tpu.memory_space<vmem>>, vector<1x80x128xf32>
    %83 = vector.shape_cast %82 : vector<1x80x128xf32> to vector<80x128xf32>
    %cst_74 = arith.constant dense<0.000000e+00> : vector<1x128xf32>
    %84 = tpu.matmul %81, %83, %cst_74 {dimension_numbers = #tpu.dot_dimension_numbers<[1], [0], [0], [1], [0, 0, 1, 1], [], []>} : vector<1x80xf32>, vector<80x128xf32>, vector<1x128xf32> -> vector<1x128xf32>
    %85 = vector.extract_strided_slice %80 {offsets = [1, 0], sizes = [1, 80], strides = [1, 1]} : vector<5x80xf32> to vector<1x80xf32>
    %c1_75 = arith.constant 1 : index
    %c0_76 = arith.constant 0 : index
    %c0_77 = arith.constant 0 : index
    %86 = vector.load %arg13[%c1_75, %c0_76, %c0_77] : memref<5x80x128xf32, #tpu.memory_space<vmem>>, vector<1x80x128xf32>
    %87 = vector.shape_cast %86 : vector<1x80x128xf32> to vector<80x128xf32>
    %cst_78 = arith.constant dense<0.000000e+00> : vector<1x128xf32>
    %88 = tpu.matmul %85, %87, %cst_78 {dimension_numbers = #tpu.dot_dimension_numbers<[1], [0], [0], [1], [0, 0, 1, 1], [], []>} : vector<1x80xf32>, vector<80x128xf32>, vector<1x128xf32> -> vector<1x128xf32>
    %89 = arith.addf %84, %88 : vector<1x128xf32>
    %90 = vector.extract_strided_slice %80 {offsets = [2, 0], sizes = [1, 80], strides = [1, 1]} : vector<5x80xf32> to vector<1x80xf32>
    %c2_79 = arith.constant 2 : index
    %c0_80 = arith.constant 0 : index
    %c0_81 = arith.constant 0 : index
    %91 = vector.load %arg13[%c2_79, %c0_80, %c0_81] : memref<5x80x128xf32, #tpu.memory_space<vmem>>, vector<1x80x128xf32>
    %92 = vector.shape_cast %91 : vector<1x80x128xf32> to vector<80x128xf32>
    %cst_82 = arith.constant dense<0.000000e+00> : vector<1x128xf32>
    %93 = tpu.matmul %90, %92, %cst_82 {dimension_numbers = #tpu.dot_dimension_numbers<[1], [0], [0], [1], [0, 0, 1, 1], [], []>} : vector<1x80xf32>, vector<80x128xf32>, vector<1x128xf32> -> vector<1x128xf32>
    %94 = arith.addf %89, %93 : vector<1x128xf32>
    %95 = vector.extract_strided_slice %80 {offsets = [3, 0], sizes = [1, 80], strides = [1, 1]} : vector<5x80xf32> to vector<1x80xf32>
    %c3_83 = arith.constant 3 : index
    %c0_84 = arith.constant 0 : index
    %c0_85 = arith.constant 0 : index
    %96 = vector.load %arg13[%c3_83, %c0_84, %c0_85] : memref<5x80x128xf32, #tpu.memory_space<vmem>>, vector<1x80x128xf32>
    %97 = vector.shape_cast %96 : vector<1x80x128xf32> to vector<80x128xf32>
    %cst_86 = arith.constant dense<0.000000e+00> : vector<1x128xf32>
    %98 = tpu.matmul %95, %97, %cst_86 {dimension_numbers = #tpu.dot_dimension_numbers<[1], [0], [0], [1], [0, 0, 1, 1], [], []>} : vector<1x80xf32>, vector<80x128xf32>, vector<1x128xf32> -> vector<1x128xf32>
    %99 = arith.addf %94, %98 : vector<1x128xf32>
    %100 = vector.extract_strided_slice %80 {offsets = [4, 0], sizes = [1, 80], strides = [1, 1]} : vector<5x80xf32> to vector<1x80xf32>
    %c4_87 = arith.constant 4 : index
    %c0_88 = arith.constant 0 : index
    %c0_89 = arith.constant 0 : index
    %101 = vector.load %arg13[%c4_87, %c0_88, %c0_89] : memref<5x80x128xf32, #tpu.memory_space<vmem>>, vector<1x80x128xf32>
    %102 = vector.shape_cast %101 : vector<1x80x128xf32> to vector<80x128xf32>
    %cst_90 = arith.constant dense<0.000000e+00> : vector<1x128xf32>
    %103 = tpu.matmul %100, %102, %cst_90 {dimension_numbers = #tpu.dot_dimension_numbers<[1], [0], [0], [1], [0, 0, 1, 1], [], []>} : vector<1x80xf32>, vector<80x128xf32>, vector<1x128xf32> -> vector<1x128xf32>
    %104 = arith.addf %99, %103 : vector<1x128xf32>
    %105 = arith.addf %104, %10 : vector<1x128xf32>
    %106 = math.tanh %105 : vector<1x128xf32>
    %cst_91 = arith.constant dense<0.000000e+00> : vector<1x10xf32>
    %107 = tpu.matmul %106, %12, %cst_91 {dimension_numbers = #tpu.dot_dimension_numbers<[1], [0], [0], [1], [0, 0, 1, 1], [], []>} : vector<1x128xf32>, vector<128x10xf32>, vector<1x10xf32> -> vector<1x10xf32>
    %108 = arith.addf %107, %11 : vector<1x10xf32>
    %c0_92 = arith.constant 0 : index
    %c0_93 = arith.constant 0 : index
    %109 = vector.load %arg17[%c0_92, %c0_93] : memref<2x10xf32, #tpu.memory_space<vmem>>, vector<1x10xf32>
    tpu.vector_store %arg17[%c0_92, %c0_93], %108 {strides = array<i32>} : memref<2x10xf32, #tpu.memory_space<vmem>>, vector<1x10xf32>,
    %c1_94 = arith.constant 1 : index
    %c0_95 = arith.constant 0 : index
    %c0_96 = arith.constant 0 : index
    %110 = vector.load %arg0[%c1_94, %c0_95, %c0_96] : memref<2x32x96xf32, #tpu.memory_space<vmem>>, vector<1x32x96xf32>
    %111 = vector.shape_cast %110 : vector<1x32x96xf32> to vector<32x96xf32>
    %112 = vector.extract_strided_slice %111 {offsets = [0, 0], sizes = [28, 96], strides = [1, 1]} : vector<32x96xf32> to vector<28x96xf32>
    %c0_97 = arith.constant 0 : index
    %c0_98 = arith.constant 0 : index
    %c0_99 = arith.constant 0 : index
    %113 = vector.load %arg1[%c0_97, %c0_98, %c0_99] : memref<5x96x168xf32, #tpu.memory_space<vmem>>, vector<1x96x168xf32>
    %114 = vector.shape_cast %113 : vector<1x96x168xf32> to vector<96x168xf32>
    %cst_100 = arith.constant dense<0.000000e+00> : vector<28x168xf32>
    %115 = tpu.matmul %112, %114, %cst_100 {dimension_numbers = #tpu.dot_dimension_numbers<[1], [0], [0], [1], [0, 0, 1, 1], [], []>} : vector<28x96xf32>, vector<96x168xf32>, vector<28x168xf32> -> vector<28x168xf32>
    %116 = vector.extract_strided_slice %111 {offsets = [1, 0], sizes = [28, 96], strides = [1, 1]} : vector<32x96xf32> to vector<28x96xf32>
    %c1_101 = arith.constant 1 : index
    %c0_102 = arith.constant 0 : index
    %c0_103 = arith.constant 0 : index
    %117 = vector.load %arg1[%c1_101, %c0_102, %c0_103] : memref<5x96x168xf32, #tpu.memory_space<vmem>>, vector<1x96x168xf32>
    %118 = vector.shape_cast %117 : vector<1x96x168xf32> to vector<96x168xf32>
    %cst_104 = arith.constant dense<0.000000e+00> : vector<28x168xf32>
    %119 = tpu.matmul %116, %118, %cst_104 {dimension_numbers = #tpu.dot_dimension_numbers<[1], [0], [0], [1], [0, 0, 1, 1], [], []>} : vector<28x96xf32>, vector<96x168xf32>, vector<28x168xf32> -> vector<28x168xf32>
    %120 = arith.addf %115, %119 : vector<28x168xf32>
    %121 = vector.extract_strided_slice %111 {offsets = [2, 0], sizes = [28, 96], strides = [1, 1]} : vector<32x96xf32> to vector<28x96xf32>
    %c2_105 = arith.constant 2 : index
    %c0_106 = arith.constant 0 : index
    %c0_107 = arith.constant 0 : index
    %122 = vector.load %arg1[%c2_105, %c0_106, %c0_107] : memref<5x96x168xf32, #tpu.memory_space<vmem>>, vector<1x96x168xf32>
    %123 = vector.shape_cast %122 : vector<1x96x168xf32> to vector<96x168xf32>
    %cst_108 = arith.constant dense<0.000000e+00> : vector<28x168xf32>
    %124 = tpu.matmul %121, %123, %cst_108 {dimension_numbers = #tpu.dot_dimension_numbers<[1], [0], [0], [1], [0, 0, 1, 1], [], []>} : vector<28x96xf32>, vector<96x168xf32>, vector<28x168xf32> -> vector<28x168xf32>
    %125 = arith.addf %120, %124 : vector<28x168xf32>
    %126 = vector.extract_strided_slice %111 {offsets = [3, 0], sizes = [28, 96], strides = [1, 1]} : vector<32x96xf32> to vector<28x96xf32>
    %c3_109 = arith.constant 3 : index
    %c0_110 = arith.constant 0 : index
    %c0_111 = arith.constant 0 : index
    %127 = vector.load %arg1[%c3_109, %c0_110, %c0_111] : memref<5x96x168xf32, #tpu.memory_space<vmem>>, vector<1x96x168xf32>
    %128 = vector.shape_cast %127 : vector<1x96x168xf32> to vector<96x168xf32>
    %cst_112 = arith.constant dense<0.000000e+00> : vector<28x168xf32>
    %129 = tpu.matmul %126, %128, %cst_112 {dimension_numbers = #tpu.dot_dimension_numbers<[1], [0], [0], [1], [0, 0, 1, 1], [], []>} : vector<28x96xf32>, vector<96x168xf32>, vector<28x168xf32> -> vector<28x168xf32>
    %130 = arith.addf %125, %129 : vector<28x168xf32>
    %131 = vector.extract_strided_slice %111 {offsets = [4, 0], sizes = [28, 96], strides = [1, 1]} : vector<32x96xf32> to vector<28x96xf32>
    %c4_113 = arith.constant 4 : index
    %c0_114 = arith.constant 0 : index
    %c0_115 = arith.constant 0 : index
    %132 = vector.load %arg1[%c4_113, %c0_114, %c0_115] : memref<5x96x168xf32, #tpu.memory_space<vmem>>, vector<1x96x168xf32>
    %133 = vector.shape_cast %132 : vector<1x96x168xf32> to vector<96x168xf32>
    %cst_116 = arith.constant dense<0.000000e+00> : vector<28x168xf32>
    %134 = tpu.matmul %131, %133, %cst_116 {dimension_numbers = #tpu.dot_dimension_numbers<[1], [0], [0], [1], [0, 0, 1, 1], [], []>} : vector<28x96xf32>, vector<96x168xf32>, vector<28x168xf32> -> vector<28x168xf32>
    %135 = arith.addf %130, %134 : vector<28x168xf32>
    %136 = vector.broadcast %0 : vector<1x168xf32> to vector<28x168xf32>
    %137 = arith.addf %135, %136 : vector<28x168xf32>
    %138 = math.tanh %137 : vector<28x168xf32>
    %cst_117 = arith.constant dense<0.000000e+00> : vector<14x168xf32>
    %139 = tpu.matmul %2, %138, %cst_117 {dimension_numbers = #tpu.dot_dimension_numbers<[1], [0], [0], [1], [0, 0, 1, 1], [], []>} : vector<14x28xf32>, vector<28x168xf32>, vector<14x168xf32> -> vector<14x168xf32>
    %cst_118 = arith.constant dense<0.000000e+00> : vector<14x168xf32>
    %140 = tpu.matmul %3, %138, %cst_118 {dimension_numbers = #tpu.dot_dimension_numbers<[1], [0], [0], [1], [0, 0, 1, 1], [], []>} : vector<14x28xf32>, vector<28x168xf32>, vector<14x168xf32> -> vector<14x168xf32>
    %141 = arith.maximumf %139, %140 : vector<14x168xf32>
    %cst_119 = arith.constant dense<0.000000e+00> : vector<14x84xf32>
    %142 = tpu.matmul %141, %4, %cst_119 {dimension_numbers = #tpu.dot_dimension_numbers<[1], [0], [0], [1], [0, 0, 1, 1], [], []>} : vector<14x168xf32>, vector<168x84xf32>, vector<14x84xf32> -> vector<14x84xf32>
    %cst_120 = arith.constant dense<0.000000e+00> : vector<14x84xf32>
    %143 = tpu.matmul %141, %5, %cst_120 {dimension_numbers = #tpu.dot_dimension_numbers<[1], [0], [0], [1], [0, 0, 1, 1], [], []>} : vector<14x168xf32>, vector<168x84xf32>, vector<14x84xf32> -> vector<14x84xf32>
    %144 = arith.maximumf %142, %143 : vector<14x84xf32>
    %145 = vector.extract_strided_slice %144 {offsets = [0, 0], sizes = [10, 84], strides = [1, 1]} : vector<14x84xf32> to vector<10x84xf32>
    %c0_121 = arith.constant 0 : index
    %c0_122 = arith.constant 0 : index
    %c0_123 = arith.constant 0 : index
    %146 = vector.load %arg7[%c0_121, %c0_122, %c0_123] : memref<5x84x160xf32, #tpu.memory_space<vmem>>, vector<1x84x160xf32>
    %147 = vector.shape_cast %146 : vector<1x84x160xf32> to vector<84x160xf32>
    %cst_124 = arith.constant dense<0.000000e+00> : vector<10x160xf32>
    %148 = tpu.matmul %145, %147, %cst_124 {dimension_numbers = #tpu.dot_dimension_numbers<[1], [0], [0], [1], [0, 0, 1, 1], [], []>} : vector<10x84xf32>, vector<84x160xf32>, vector<10x160xf32> -> vector<10x160xf32>
    %149 = vector.extract_strided_slice %144 {offsets = [1, 0], sizes = [10, 84], strides = [1, 1]} : vector<14x84xf32> to vector<10x84xf32>
    %c1_125 = arith.constant 1 : index
    %c0_126 = arith.constant 0 : index
    %c0_127 = arith.constant 0 : index
    %150 = vector.load %arg7[%c1_125, %c0_126, %c0_127] : memref<5x84x160xf32, #tpu.memory_space<vmem>>, vector<1x84x160xf32>
    %151 = vector.shape_cast %150 : vector<1x84x160xf32> to vector<84x160xf32>
    %cst_128 = arith.constant dense<0.000000e+00> : vector<10x160xf32>
    %152 = tpu.matmul %149, %151, %cst_128 {dimension_numbers = #tpu.dot_dimension_numbers<[1], [0], [0], [1], [0, 0, 1, 1], [], []>} : vector<10x84xf32>, vector<84x160xf32>, vector<10x160xf32> -> vector<10x160xf32>
    %153 = arith.addf %148, %152 : vector<10x160xf32>
    %154 = vector.extract_strided_slice %144 {offsets = [2, 0], sizes = [10, 84], strides = [1, 1]} : vector<14x84xf32> to vector<10x84xf32>
    %c2_129 = arith.constant 2 : index
    %c0_130 = arith.constant 0 : index
    %c0_131 = arith.constant 0 : index
    %155 = vector.load %arg7[%c2_129, %c0_130, %c0_131] : memref<5x84x160xf32, #tpu.memory_space<vmem>>, vector<1x84x160xf32>
    %156 = vector.shape_cast %155 : vector<1x84x160xf32> to vector<84x160xf32>
    %cst_132 = arith.constant dense<0.000000e+00> : vector<10x160xf32>
    %157 = tpu.matmul %154, %156, %cst_132 {dimension_numbers = #tpu.dot_dimension_numbers<[1], [0], [0], [1], [0, 0, 1, 1], [], []>} : vector<10x84xf32>, vector<84x160xf32>, vector<10x160xf32> -> vector<10x160xf32>
    %158 = arith.addf %153, %157 : vector<10x160xf32>
    %159 = vector.extract_strided_slice %144 {offsets = [3, 0], sizes = [10, 84], strides = [1, 1]} : vector<14x84xf32> to vector<10x84xf32>
    %c3_133 = arith.constant 3 : index
    %c0_134 = arith.constant 0 : index
    %c0_135 = arith.constant 0 : index
    %160 = vector.load %arg7[%c3_133, %c0_134, %c0_135] : memref<5x84x160xf32, #tpu.memory_space<vmem>>, vector<1x84x160xf32>
    %161 = vector.shape_cast %160 : vector<1x84x160xf32> to vector<84x160xf32>
    %cst_136 = arith.constant dense<0.000000e+00> : vector<10x160xf32>
    %162 = tpu.matmul %159, %161, %cst_136 {dimension_numbers = #tpu.dot_dimension_numbers<[1], [0], [0], [1], [0, 0, 1, 1], [], []>} : vector<10x84xf32>, vector<84x160xf32>, vector<10x160xf32> -> vector<10x160xf32>
    %163 = arith.addf %158, %162 : vector<10x160xf32>
    %164 = vector.extract_strided_slice %144 {offsets = [4, 0], sizes = [10, 84], strides = [1, 1]} : vector<14x84xf32> to vector<10x84xf32>
    %c4_137 = arith.constant 4 : index
    %c0_138 = arith.constant 0 : index
    %c0_139 = arith.constant 0 : index
    %165 = vector.load %arg7[%c4_137, %c0_138, %c0_139] : memref<5x84x160xf32, #tpu.memory_space<vmem>>, vector<1x84x160xf32>
    %166 = vector.shape_cast %165 : vector<1x84x160xf32> to vector<84x160xf32>
    %cst_140 = arith.constant dense<0.000000e+00> : vector<10x160xf32>
    %167 = tpu.matmul %164, %166, %cst_140 {dimension_numbers = #tpu.dot_dimension_numbers<[1], [0], [0], [1], [0, 0, 1, 1], [], []>} : vector<10x84xf32>, vector<84x160xf32>, vector<10x160xf32> -> vector<10x160xf32>
    %168 = arith.addf %163, %167 : vector<10x160xf32>
    %169 = vector.broadcast %1 : vector<1x160xf32> to vector<10x160xf32>
    %170 = arith.addf %168, %169 : vector<10x160xf32>
    %171 = math.tanh %170 : vector<10x160xf32>
    %cst_141 = arith.constant dense<0.000000e+00> : vector<5x160xf32>
    %172 = tpu.matmul %6, %171, %cst_141 {dimension_numbers = #tpu.dot_dimension_numbers<[1], [0], [0], [1], [0, 0, 1, 1], [], []>} : vector<5x10xf32>, vector<10x160xf32>, vector<5x160xf32> -> vector<5x160xf32>
    %cst_142 = arith.constant dense<0.000000e+00> : vector<5x160xf32>
    %173 = tpu.matmul %7, %171, %cst_142 {dimension_numbers = #tpu.dot_dimension_numbers<[1], [0], [0], [1], [0, 0, 1, 1], [], []>} : vector<5x10xf32>, vector<10x160xf32>, vector<5x160xf32> -> vector<5x160xf32>
    %174 = arith.maximumf %172, %173 : vector<5x160xf32>
    %cst_143 = arith.constant dense<0.000000e+00> : vector<5x80xf32>
    %175 = tpu.matmul %174, %8, %cst_143 {dimension_numbers = #tpu.dot_dimension_numbers<[1], [0], [0], [1], [0, 0, 1, 1], [], []>} : vector<5x160xf32>, vector<160x80xf32>, vector<5x80xf32> -> vector<5x80xf32>
    %cst_144 = arith.constant dense<0.000000e+00> : vector<5x80xf32>
    %176 = tpu.matmul %174, %9, %cst_144 {dimension_numbers = #tpu.dot_dimension_numbers<[1], [0], [0], [1], [0, 0, 1, 1], [], []>} : vector<5x160xf32>, vector<160x80xf32>, vector<5x80xf32> -> vector<5x80xf32>
    %177 = arith.maximumf %175, %176 : vector<5x80xf32>
    %178 = vector.extract_strided_slice %177 {offsets = [0, 0], sizes = [1, 80], strides = [1, 1]} : vector<5x80xf32> to vector<1x80xf32>
    %c0_145 = arith.constant 0 : index
    %c0_146 = arith.constant 0 : index
    %c0_147 = arith.constant 0 : index
    %179 = vector.load %arg13[%c0_145, %c0_146, %c0_147] : memref<5x80x128xf32, #tpu.memory_space<vmem>>, vector<1x80x128xf32>
    %180 = vector.shape_cast %179 : vector<1x80x128xf32> to vector<80x128xf32>
    %cst_148 = arith.constant dense<0.000000e+00> : vector<1x128xf32>
    %181 = tpu.matmul %178, %180, %cst_148 {dimension_numbers = #tpu.dot_dimension_numbers<[1], [0], [0], [1], [0, 0, 1, 1], [], []>} : vector<1x80xf32>, vector<80x128xf32>, vector<1x128xf32> -> vector<1x128xf32>
    %182 = vector.extract_strided_slice %177 {offsets = [1, 0], sizes = [1, 80], strides = [1, 1]} : vector<5x80xf32> to vector<1x80xf32>
    %c1_149 = arith.constant 1 : index
    %c0_150 = arith.constant 0 : index
    %c0_151 = arith.constant 0 : index
    %183 = vector.load %arg13[%c1_149, %c0_150, %c0_151] : memref<5x80x128xf32, #tpu.memory_space<vmem>>, vector<1x80x128xf32>
    %184 = vector.shape_cast %183 : vector<1x80x128xf32> to vector<80x128xf32>
    %cst_152 = arith.constant dense<0.000000e+00> : vector<1x128xf32>
    %185 = tpu.matmul %182, %184, %cst_152 {dimension_numbers = #tpu.dot_dimension_numbers<[1], [0], [0], [1], [0, 0, 1, 1], [], []>} : vector<1x80xf32>, vector<80x128xf32>, vector<1x128xf32> -> vector<1x128xf32>
    %186 = arith.addf %181, %185 : vector<1x128xf32>
    %187 = vector.extract_strided_slice %177 {offsets = [2, 0], sizes = [1, 80], strides = [1, 1]} : vector<5x80xf32> to vector<1x80xf32>
    %c2_153 = arith.constant 2 : index
    %c0_154 = arith.constant 0 : index
    %c0_155 = arith.constant 0 : index
    %188 = vector.load %arg13[%c2_153, %c0_154, %c0_155] : memref<5x80x128xf32, #tpu.memory_space<vmem>>, vector<1x80x128xf32>
    %189 = vector.shape_cast %188 : vector<1x80x128xf32> to vector<80x128xf32>
    %cst_156 = arith.constant dense<0.000000e+00> : vector<1x128xf32>
    %190 = tpu.matmul %187, %189, %cst_156 {dimension_numbers = #tpu.dot_dimension_numbers<[1], [0], [0], [1], [0, 0, 1, 1], [], []>} : vector<1x80xf32>, vector<80x128xf32>, vector<1x128xf32> -> vector<1x128xf32>
    %191 = arith.addf %186, %190 : vector<1x128xf32>
    %192 = vector.extract_strided_slice %177 {offsets = [3, 0], sizes = [1, 80], strides = [1, 1]} : vector<5x80xf32> to vector<1x80xf32>
    %c3_157 = arith.constant 3 : index
    %c0_158 = arith.constant 0 : index
    %c0_159 = arith.constant 0 : index
    %193 = vector.load %arg13[%c3_157, %c0_158, %c0_159] : memref<5x80x128xf32, #tpu.memory_space<vmem>>, vector<1x80x128xf32>
    %194 = vector.shape_cast %193 : vector<1x80x128xf32> to vector<80x128xf32>
    %cst_160 = arith.constant dense<0.000000e+00> : vector<1x128xf32>
    %195 = tpu.matmul %192, %194, %cst_160 {dimension_numbers = #tpu.dot_dimension_numbers<[1], [0], [0], [1], [0, 0, 1, 1], [], []>} : vector<1x80xf32>, vector<80x128xf32>, vector<1x128xf32> -> vector<1x128xf32>
    %196 = arith.addf %191, %195 : vector<1x128xf32>
    %197 = vector.extract_strided_slice %177 {offsets = [4, 0], sizes = [1, 80], strides = [1, 1]} : vector<5x80xf32> to vector<1x80xf32>
    %c4_161 = arith.constant 4 : index
    %c0_162 = arith.constant 0 : index
    %c0_163 = arith.constant 0 : index
    %198 = vector.load %arg13[%c4_161, %c0_162, %c0_163] : memref<5x80x128xf32, #tpu.memory_space<vmem>>, vector<1x80x128xf32>
    %199 = vector.shape_cast %198 : vector<1x80x128xf32> to vector<80x128xf32>
    %cst_164 = arith.constant dense<0.000000e+00> : vector<1x128xf32>
    %200 = tpu.matmul %197, %199, %cst_164 {dimension_numbers = #tpu.dot_dimension_numbers<[1], [0], [0], [1], [0, 0, 1, 1], [], []>} : vector<1x80xf32>, vector<80x128xf32>, vector<1x128xf32> -> vector<1x128xf32>
    %201 = arith.addf %196, %200 : vector<1x128xf32>
    %202 = arith.addf %201, %10 : vector<1x128xf32>
    %203 = math.tanh %202 : vector<1x128xf32>
    %cst_165 = arith.constant dense<0.000000e+00> : vector<1x10xf32>
    %204 = tpu.matmul %203, %12, %cst_165 {dimension_numbers = #tpu.dot_dimension_numbers<[1], [0], [0], [1], [0, 0, 1, 1], [], []>} : vector<1x128xf32>, vector<128x10xf32>, vector<1x10xf32> -> vector<1x10xf32>
    %205 = arith.addf %204, %11 : vector<1x10xf32>
    %c1_166 = arith.constant 1 : index
    %c0_167 = arith.constant 0 : index
    %206 = vector.load %arg17[%c1_166, %c0_167] : memref<2x10xf32, #tpu.memory_space<vmem>>, vector<1x10xf32>
    tpu.vector_store %arg17[%c1_166, %c0_167], %205 {strides = array<i32>} : memref<2x10xf32, #tpu.memory_space<vmem>>, vector<1x10xf32>,
    return
  }
}

</mosaic_0001>

<bundles_post_ra>
// kernel: tile.13
= control target key start
LH: loop header
LB: loop body
LE: loop exit
PB: predicated region body
PF: predicated region fallthrough
CT: control target
= control target key end

     0   :  { %s40_s0 = inlined_call_operand.vmem [shape: f32[6], index: 0, kind: input, shape index: {}]   ;;  %s41_s1 = inlined_call_operand.vmem [shape: f32[28,6], index: 1, kind: output, shape index: {}]  }
   0x1   :  { %v4_v0 = vld [vmem:[%s40_s0] ss:$0 sm:$0xff] }
   0x2   :  { %5 = vst [vmem:[%s41_s1] sm:$0xff] %v4_v0 }
   0x3   :  { %12 = vst [vmem:[%s41_s1 + $0x8] sm:$0xff] %v4_v0 }
   0x4   :  { %13 = vst [vmem:[%s41_s1 + $0x10] sm:$0xff] %v4_v0 }
   0x5   :  { %14 = vst [vmem:[%s41_s1 + $0x18] sm:$0xff] %v4_v0 }

// kernel: tile.14
= control target key start
LH: loop header
LB: loop body
LE: loop exit
PB: predicated region body
PF: predicated region fallthrough
CT: control target
= control target key end

     0   :  { %vm9_vm0 = vcmask 15360   ;;  %s248_s12 = smov 126   ;;  %s249_s13 = smov 114   ;;  %vm3_vm1 = vcmask 48128   ;;  %vm13_vm2 = vcmask 31744   ;;  %vm16_vm3 = vcmask 1048560   ;;  %s378_s0 = inlined_call_operand.vmem [shape: f32[28,6], index: 0, kind: input, shape index: {}]   ;;  %s379_s1 = inlined_call_operand.vmem [shape: f32[1,168], index: 1, kind: output, shape index: {}]  }
   0x1   :  { %v192_v0 = vld [vmem:[%s378_s0 + $0x15] sm:$0x1]   ;;  %v195_v3 = vld [vmem:[%s378_s0 + $0x13] sm:$0x1]   ;;  %v197_v4 = vld [vmem:[%s378_s0 + $0x11] sm:$0x1]  }
   0x2   :  { %v193_v1 = vld [vmem:[%s378_s0 + $0x15] sm:$0x1]   ;;  %26 = vrot.lane.b32.xlu1 %v195_v3, %s249_s13  ;;  %s250_s16 = smov 102   ;;  %v194_v5 = vld [vmem:[%s378_s0 + $0x14] sm:$0x1]   ;;  %s251_s21 = smov 120  }
   0x3   :  { %v10_v2 = vsel %vm9_vm0, %v193_v1, %v192_v0  ;;  %38 = vrot.lane.b32.xlu2 %v197_v4, %s250_s16  ;;  %v196_v6 = vld [vmem:[%s378_s0 + $0x12] sm:$0x1]   ;;  %s252_s22 = smov 108   ;;  %v198_v7 = vld [vmem:[%s378_s0 + $0x10] sm:$0x1]   ;;  %s253_s25 = smov 96  }
   0x4   :  { %11 = vrot.lane.b32.xlu0 %v10_v2, %s248_s12  ;;  %v199_v8 = vld [vmem:[%s378_s0 + $0xf] sm:$0x1]   ;;  %v200_v9 = vld [vmem:[%s378_s0 + $0xe] sm:$0x1]   ;;  %s254_s30 = smov 90   ;;  %s255_s2 = smov 84  }
   0x5   :  { %v201_v10 = vld [vmem:[%s378_s0 + $0xd] sm:$0x1]   ;;  %s256_s5 = smov 78   ;;  %v202_v11 = vld [vmem:[%s378_s0 + $0xc] sm:$0x1]   ;;  %s257_s10 = smov 72  }
   0x6   :  { %v203_v12 = vld [vmem:[%s378_s0 + $0xb] sm:$0x1]   ;;  %s258_s11 = smov 66   ;;  %v204_v13 = vld [vmem:[%s378_s0 + $0xa] sm:$0x1]   ;;  %s259_s14 = smov 60  }
   0x7   :  { %v205_v14 = vld [vmem:[%s378_s0 + $0x9] sm:$0x1]   ;;  %v206_v15 = vld [vmem:[%s378_s0 + $0x8] sm:$0x1]   ;;  %s260_s19 = smov 54   ;;  %s261_s20 = smov 48  }
   0x8   :  { %v207_v16 = vld [vmem:[%s378_s0 + $0x7] sm:$0x1]   ;;  %s262_s23 = smov 42   ;;  %v208_v17 = vld [vmem:[%s378_s0 + $0x6] sm:$0x1]   ;;  %s263_s28 = smov 36  }
   0x9   :  { %v209_v18 = vld [vmem:[%s378_s0 + $0x1b] sm:$0x1]   ;;  %s264_s29 = smov 34   ;;  %v210_v19 = vld [vmem:[%s378_s0 + $0x5] sm:$0x1]   ;;  %s265_s3 = smov 30  }
   0xa   :  { %32 = vrot.lane.b32.xlu1 %v196_v6, %s252_s22  ;;  %v211_v20 = vld [vmem:[%s378_s0 + $0x1a] sm:$0x1]   ;;  %v212_v21 = vld [vmem:[%s378_s0 + $0x4] sm:$0x1]   ;;  %s266_s8 = smov 28   ;;  %s267_s9 = smov 24  }
   0xb   :  { %44 = vrot.lane.b32.xlu2 %v198_v7, %s253_s25  ;;  %v213_v22 = vld [vmem:[%s378_s0 + $0x19] sm:$0x1]   ;;  %s268_s12 = smov 22   ;;  %v214_v23 = vld [vmem:[%s378_s0 + $0x3] sm:$0x1]   ;;  %s269_s17 = smov 18  }
   0xc   :  { %20 = vrot.lane.b32.xlu0 %v194_v5, %s251_s21  ;;  %v215_v24 = vld [vmem:[%s378_s0 + $0x18] sm:$0x1]   ;;  %s270_s18 = smov 16   ;;  %v216_v25 = vld [vmem:[%s378_s0 + $0x2] sm:$0x1]   ;;  %s271_s21 = smov 12  }
   0xd   :  { %v217_v26 = vld [vmem:[%s378_s0 + $0x17] sm:$0x1]   ;;  %v218_v27 = vld [vmem:[%s378_s0 + $0x1] sm:$0x1]   ;;  %s272_s26 = smov 10   ;;  %s273_s27 = smov 6  }
   0xe   :  { %v219_v28 = vld [vmem:[%s378_s0 + $0x16] sm:$0x1]   ;;  %v2_v29 = vld [vmem:[%s378_s0] sm:$0x1]   ;;  %vm22_vm4 = vcmask 1032128   ;;  %vm28_vm5 = vcmask 982928  }
   0xf   :  { %4 = vst.msk [vmem:[#allocation0] sm:$0x1] %vm3_vm1, %v2_v29   ;;  %vm34_vm6 = vcmask 933728   ;;  %vm40_vm7 = vcmask 884528   ;;  %vm46_vm8 = vcmask 835328   ;;  %vm52_vm9 = vcmask 786128  }
  0x10   :  { %vm58_vm10 = vcmask 736928   ;;  %vm64_vm11 = vcmask 687728   ;;  %vm70_vm12 = vcmask 638528   ;;  %vm76_vm13 = vcmask 589328  }
  0x11   :  { %vm82_vm14 = vcmask 540128   ;;  %vm88_vm15 = vcmask 490928   ;;  %vm94_vm0 = vcmask 441728   ;;  %vm100_vm1 = vcmask 392528  }
  0x12   :  { %56 = vrot.lane.b32.xlu1 %v200_v9, %s255_s2 }
  0x13   :  { %62 = vrot.lane.b32.xlu2 %v201_v10, %s256_s5 }
  0x14   :  { %50 = vrot.lane.b32.xlu0 %v199_v8, %s254_s30  ;;  %s274_s30 = smov 4  }
  0x1a   :  { %74 = vrot.lane.b32.xlu1 %v203_v12, %s258_s11 }
  0x1b   :  { %80 = vrot.lane.b32.xlu2 %v204_v13, %s259_s14 }
  0x1c   :  { %68 = vrot.lane.b32.xlu0 %v202_v11, %s257_s10 }
  0x22   :  { %92 = vrot.lane.b32.xlu1 %v206_v15, %s261_s20 }
  0x23   :  { %98 = vrot.lane.b32.xlu2 %v207_v16, %s262_s23 }
  0x24   :  { %86 = vrot.lane.b32.xlu0 %v205_v14, %s260_s19 }
  0x2a   :  { %110 = vrot.lane.b32.xlu1 %v209_v18, %s264_s29 }
  0x2b   :  { %117 = vrot.lane.b32.xlu2 %v210_v19, %s265_s3 }
  0x2c   :  { %104 = vrot.lane.b32.xlu0 %v208_v17, %s263_s28 }
  0x32   :  { %130 = vrot.lane.b32.xlu1 %v212_v21, %s267_s9 }
  0x33   :  { %136 = vrot.lane.b32.xlu2 %v213_v22, %s268_s12 }
  0x34   :  { %123 = vrot.lane.b32.xlu0 %v211_v20, %s266_s8 }
  0x3a   :  { %149 = vrot.lane.b32.xlu1 %v215_v24, %s270_s18 }
  0x3b   :  { %156 = vrot.lane.b32.xlu2 %v216_v25, %s271_s21 }
  0x3c   :  { %143 = vrot.lane.b32.xlu0 %v214_v23, %s269_s17 }
  0x42   :  { %169 = vrot.lane.b32.xlu1 %v218_v27, %s273_s27 }
  0x43   :  { %175 = vrot.lane.b32.xlu2 %v219_v28, %s274_s30 }
  0x44   :  { %162 = vrot.lane.b32.xlu0 %v217_v26, %s272_s26 }
  0x5d   :  { %v39_v30 = vpop.permute.xlu2 %38  }
  0x65   :  { %v45_v31 = vpop.permute.xlu2 %44  }
  0x6d   :  { %v63_v32 = vpop.permute.xlu2 %62  }
  0x74   :  { %v27_v34 = vpop.permute.xlu1 %26  }
  0x75   :  { %v81_v35 = vpop.permute.xlu2 %80  }
  0x76   :  { %v12_v33 = vpop.permute.xlu0 %11  }
  0x77   :  { %15 = vst.msk [vmem:[#allocation0 + $0x8] sm:$0x1] %vm13_vm2, %v12_v33   ;;  %vm106_vm2 = vcmask 343328  }
  0x78   :  { %17 = vst.msk [vmem:[#allocation0] sm:$0x1] %vm16_vm3, %v12_v33   ;;  %vm119_vm3 = vcmask 294128  }
  0x7c   :  { %v33_v37 = vpop.permute.xlu1 %32  }
  0x7d   :  { %v99_v38 = vpop.permute.xlu2 %98  }
  0x7e   :  { %v21_v36 = vpop.permute.xlu0 %20  }
  0x7f   :  { %23 = vst.msk [vmem:[#allocation0] sm:$0x1] %vm22_vm4, %v21_v36   ;;  %vm112_vm4 = vcmask 326928  }
  0x80   :  { %29 = vst.msk [vmem:[#allocation0] sm:$0x1] %vm28_vm5, %v27_v34   ;;  %vm125_vm5 = vcmask 277728  }
  0x81   :  { %35 = vst.msk [vmem:[#allocation0] sm:$0x1] %vm34_vm6, %v33_v37   ;;  %vm138_vm6 = vcmask 228528  }
  0x82   :  { %41 = vst.msk [vmem:[#allocation0] sm:$0x1] %vm40_vm7, %v39_v30   ;;  %vm132_vm7 = vcmask 244928  }
  0x83   :  { %47 = vst.msk [vmem:[#allocation0] sm:$0x1] %vm46_vm8, %v45_v31   ;;  %vm145_vm8 = vcmask 195728  }
  0x84   :  { %v57_v40 = vpop.permute.xlu1 %56  }
  0x85   :  { %v118_v41 = vpop.permute.xlu2 %117  }
  0x86   :  { %v51_v39 = vpop.permute.xlu0 %50  }
  0x87   :  { %53 = vst.msk [vmem:[#allocation0] sm:$0x1] %vm52_vm9, %v51_v39   ;;  %vm158_vm9 = vcmask 146528  }
  0x88   :  { %59 = vst.msk [vmem:[#allocation0] sm:$0x1] %vm58_vm10, %v57_v40   ;;  %vm151_vm10 = vcmask 179328  }
  0x89   :  { %65 = vst.msk [vmem:[#allocation0] sm:$0x1] %vm64_vm11, %v63_v32   ;;  %vm164_vm11 = vcmask 130128  }
  0x8c   :  { %v75_v43 = vpop.permute.xlu1 %74  }
  0x8d   :  { %v137_v44 = vpop.permute.xlu2 %136  }
  0x8e   :  { %v69_v42 = vpop.permute.xlu0 %68  }
  0x8f   :  { %71 = vst.msk [vmem:[#allocation0] sm:$0x1] %vm70_vm12, %v69_v42   ;;  %vm177_vm12 = vcmask 80928  }
  0x90   :  { %77 = vst.msk [vmem:[#allocation0] sm:$0x1] %vm76_vm13, %v75_v43   ;;  %vm171_vm13 = vcmask 97328  }
  0x91   :  { %83 = vst.msk [vmem:[#allocation0] sm:$0x1] %vm82_vm14, %v81_v35  }
  0x94   :  { %v93_v46 = vpop.permute.xlu1 %92  }
  0x95   :  { %v157_v47 = vpop.permute.xlu2 %156  }
  0x96   :  { %v87_v45 = vpop.permute.xlu0 %86  }
  0x97   :  { %89 = vst.msk [vmem:[#allocation0] sm:$0x1] %vm88_vm15, %v87_v45  }
  0x98   :  { %95 = vst.msk [vmem:[#allocation0] sm:$0x1] %vm94_vm0, %v93_v46  }
  0x99   :  { %101 = vst.msk [vmem:[#allocation0] sm:$0x1] %vm100_vm1, %v99_v38  }
  0x9c   :  { %v111_v49 = vpop.permute.xlu1 %110  }
  0x9d   :  { %114 = vst.msk [vmem:[#allocation0 + $0x8] sm:$0x1] %vm112_vm4, %v111_v49   ;;  %v176_v50 = vpop.permute.xlu2 %175  }
  0x9e   :  { %v105_v48 = vpop.permute.xlu0 %104  }
  0x9f   :  { %107 = vst.msk [vmem:[#allocation0] sm:$0x1] %vm106_vm2, %v105_v48  }
  0xa0   :  { %120 = vst.msk [vmem:[#allocation0] sm:$0x1] %vm119_vm3, %v118_v41  }
  0xa4   :  { %v131_v52 = vpop.permute.xlu1 %130  }
  0xa5   :  { %133 = vst.msk [vmem:[#allocation0] sm:$0x1] %vm132_vm7, %v131_v52  }
  0xa6   :  { %v124_v51 = vpop.permute.xlu0 %123  }
  0xa7   :  { %127 = vst.msk [vmem:[#allocation0 + $0x8] sm:$0x1] %vm125_vm5, %v124_v51  }
  0xa8   :  { %140 = vst.msk [vmem:[#allocation0 + $0x8] sm:$0x1] %vm138_vm6, %v137_v44  }
  0xac   :  { %v150_v54 = vpop.permute.xlu1 %149  }
  0xad   :  { %153 = vst.msk [vmem:[#allocation0 + $0x8] sm:$0x1] %vm151_vm10, %v150_v54  }
  0xae   :  { %v144_v53 = vpop.permute.xlu0 %143  }
  0xaf   :  { %146 = vst.msk [vmem:[#allocation0] sm:$0x1] %vm145_vm8, %v144_v53  }
  0xb0   :  { %159 = vst.msk [vmem:[#allocation0] sm:$0x1] %vm158_vm9, %v157_v47  }
  0xb4   :  { %v170_v56 = vpop.permute.xlu1 %169  }
  0xb5   :  { %172 = vst.msk [vmem:[#allocation0] sm:$0x1] %vm171_vm13, %v170_v56  }
  0xb6   :  { %v163_v55 = vpop.permute.xlu0 %162  }
  0xb7   :  { %166 = vst.msk [vmem:[#allocation0 + $0x8] sm:$0x1] %vm164_vm11, %v163_v55  }
  0xb8   :  { %179 = vst.msk [vmem:[#allocation0 + $0x8] sm:$0x1] %vm177_vm12, %v176_v50  }
  0xbc   :  { %v182_v58 = vld [vmem:[#allocation0] sm:$0x1] }
  0xbd   :  { %185 = vst [vmem:[%s379_s1] sm:$0x1] %v182_v58 }
  0xbf   :  { %v187_v57 = vld [vmem:[#allocation0 + $0x8] sm:$0x1] }
  0xc0   :  { %220 = vst [vmem:[%s379_s1 + $0x1] sm:$0x1] %v187_v57 }

// kernel: tile.18
= control target key start
LH: loop header
LB: loop body
LE: loop exit
PB: predicated region body
PF: predicated region fallthrough
CT: control target
= control target key end

     0   :  { %s28_s0 = inlined_call_operand.vmem [shape: f32[16], index: 0, kind: input, shape index: {}]   ;;  %s29_s1 = inlined_call_operand.vmem [shape: f32[10,16], index: 1, kind: output, shape index: {}]  }
   0x1   :  { %v4_v0 = vld [vmem:[%s28_s0] ss:$0 sm:$0xff] }
   0x2   :  { %5 = vst [vmem:[%s29_s1] sm:$0xff] %v4_v0 }
   0x3   :  { %8 = vst [vmem:[%s29_s1 + $0x8] sm:$0xff] %v4_v0 }

// kernel: tile.19
= control target key start
LH: loop header
LB: loop body
LE: loop exit
PB: predicated region body
PF: predicated region fallthrough
CT: control target
= control target key end

     0   :  { %s76_s10 = smov 112   ;;  %s77_s11 = smov 80   ;;  %vm4_vm0 = vcmask 130048   ;;  %vm10_vm1 = vcmask 1048448   ;;  %vm16_vm2 = vcmask 917248   ;;  %vm22_vm3 = vcmask 786048   ;;  %s123_s0 = inlined_call_operand.vmem [shape: f32[10,16], index: 0, kind: input, shape index: {}]   ;;  %s124_s1 = inlined_call_operand.vmem [shape: f32[1,160], index: 1, kind: output, shape index: {}]  }
   0x1   :  { %v61_v0 = vld [vmem:[%s123_s0 + $0x7] sm:$0x1]   ;;  %v63_v1 = vld [vmem:[%s123_s0 + $0x5] sm:$0x1]   ;;  %v65_v2 = vld [vmem:[%s123_s0 + $0x3] sm:$0x1]  }
   0x2   :  { %8 = vrot.lane.b32.xlu0 %v61_v0, %s76_s10  ;;  %20 = vrot.lane.b32.xlu1 %v63_v1, %s77_s11  ;;  %s78_s14 = smov 48   ;;  %v62_v3 = vld [vmem:[%s123_s0 + $0x6] sm:$0x1]   ;;  %v64_v4 = vld [vmem:[%s123_s0 + $0x4] sm:$0x1]   ;;  %s79_s19 = smov 96  }
   0x3   :  { %32 = vrot.lane.b32.xlu2 %v65_v2, %s78_s14  ;;  %s80_s20 = smov 64   ;;  %v66_v5 = vld [vmem:[%s123_s0 + $0x2] sm:$0x1]   ;;  %s43_s23 = smov 3  ;;  %vm28_vm4 = vcmask 654848   ;;  %vm34_vm5 = vcmask 523648  }
   0x4   :  { %s81_s24 = smov 32   ;;  %v67_v6 = vld [vmem:[%s123_s0 + $0x1] ss:$8 sm:%s43_s23]   ;;  %s82_s27 = smov 16   ;;  %vm40_vm6 = vcmask 392448   ;;  %vm47_vm7 = vcmask 261248  }
   0x5   :  { %s2_s28 = smov 3 }
   0x6   :  { %v3_v7 = vld [vmem:[%s123_s0] ss:$8 sm:%s2_s28]  }
   0x7   :  { %5 = vst.msk [vmem:[#allocation0] ss:$8 sm:$0x3] %vm4_vm0, %v3_v7  }
   0xa   :  { %14 = vrot.lane.b32.xlu0 %v62_v3, %s79_s19  ;;  %26 = vrot.lane.b32.xlu1 %v64_v4, %s80_s20 }
   0xb   :  { %38 = vrot.lane.b32.xlu2 %v66_v5, %s81_s24 }
  0x12   :  { %45 = vrot.lane.b32.xlu0 %v67_v6, %s82_s27 }
  0x5d   :  { %v33_v8 = vpop.permute.xlu2 %32  }
  0x65   :  { %v39_v9 = vpop.permute.xlu2 %38  }
  0x74   :  { %v9_v10 = vpop.permute.xlu0 %8   ;;  %v21_v11 = vpop.permute.xlu1 %20  }
  0x75   :  { %11 = vst.msk [vmem:[#allocation0] sm:$0x1] %vm10_vm1, %v9_v10  }
  0x7c   :  { %v15_v12 = vpop.permute.xlu0 %14   ;;  %v27_v13 = vpop.permute.xlu1 %26  }
  0x7d   :  { %17 = vst.msk [vmem:[#allocation0] sm:$0x1] %vm16_vm2, %v15_v12  }
  0x7e   :  { %23 = vst.msk [vmem:[#allocation0] sm:$0x1] %vm22_vm3, %v21_v11  }
  0x7f   :  { %29 = vst.msk [vmem:[#allocation0] sm:$0x1] %vm28_vm4, %v27_v13  }
  0x80   :  { %35 = vst.msk [vmem:[#allocation0] sm:$0x1] %vm34_vm5, %v33_v8  }
  0x81   :  { %41 = vst.msk [vmem:[#allocation0] sm:$0x1] %vm40_vm6, %v39_v9  }
  0x84   :  { %v46_v14 = vpop.permute.xlu0 %45  }
  0x85   :  { %48 = vst.msk [vmem:[#allocation0] ss:$8 sm:$0x3] %vm47_vm7, %v46_v14  }
  0x8c   :  { %v51_v15 = vld [vmem:[#allocation0] sm:$0x1]  ;;  %v56_v16 = vld [vmem:[#allocation0 + $0x8] sm:$0x1] }
  0x8d   :  { %54 = vst [vmem:[%s124_s1] sm:$0x1] %v51_v15 }
  0x8e   :  { %68 = vst [vmem:[%s124_s1 + $0x1] sm:$0x1] %v56_v16 }

// kernel: net_cifar10_forward.1
= control target key start
LH: loop header
LB: loop body
LE: loop exit
PB: predicated region body
PF: predicated region fallthrough
CT: control target
= control target key end

     0   :  { %s7044_s0 = inlined_call_operand.vmem [shape: f32[2,32,96], index: 0, kind: input, shape index: {}]   ;;  %s7045_s1 = inlined_call_operand.vmem [shape: f32[5,96,168], index: 1, kind: input, shape index: {}]   ;;  %s7046_s2 = inlined_call_operand.vmem [shape: f32[1,168], index: 2, kind: input, shape index: {}]   ;;  %s7047_s3 = inlined_call_operand.vmem [shape: f32[14,28], index: 3, kind: input, shape index: {}]   ;;  %s7048_s4 = inlined_call_operand.vmem [shape: f32[14,28], index: 4, kind: input, shape index: {}]   ;;  %s7049_s5 = inlined_call_operand.vmem [shape: f32[168,84], index: 5, kind: input, shape index: {}]   ;;  %s7050_s6 = inlined_call_operand.vmem [shape: f32[168,84], index: 6, kind: input, shape index: {}]   ;;  %s7051_s7 = inlined_call_operand.vmem [shape: f32[5,84,160], index: 7, kind: input, shape index: {}]   ;;  %s7052_s8 = inlined_call_operand.vmem [shape: f32[1,160], index: 8, kind: input, shape index: {}]   ;;  %s7053_s9 = inlined_call_operand.vmem [shape: f32[5,10], index: 9, kind: input, shape index: {}]   ;;  %s7054_s10 = inlined_call_operand.vmem [shape: f32[5,10], index: 10, kind: input, shape index: {}]   ;;  %s7055_s11 = inlined_call_operand.vmem [shape: f32[160,80], index: 11, kind: input, shape index: {}]   ;;  %s7056_s12 = inlined_call_operand.vmem [shape: f32[160,80], index: 12, kind: input, shape index: {}]   ;;  %s7057_s13 = inlined_call_operand.vmem [shape: f32[5,80,128], index: 13, kind: input, shape index: {}]   ;;  %s7058_s14 = inlined_call_operand.vmem [shape: f32[1,128], index: 14, kind: input, shape index: {}]   ;;  %s7059_s15 = inlined_call_operand.vmem [shape: f32[128,10], index: 15, kind: input, shape index: {}]   ;;  %s7060_s16 = inlined_call_operand.vmem [shape: f32[1,10], index: 16, kind: input, shape index: {}]   ;;  %s7061_s17 = inlined_call_operand.hbm [shape: f32[2,10], index: 17, kind: output, shape index: {}]  }
   0x1   :  { %7064 = sst [smem:[#allocation5_spill]] %s7044_s0 }
   0x2   :  { %7065 = sst [smem:[#allocation6_spill]] %s7045_s1 }
   0x3   :  { %s7066_s26 = sld [smem:[#allocation6_spill]]  ;;  %vm222_vm0 = vcmask 1046528   ;;  %vm230_vm1 = vcmask 785408  }
   0x4   :  { %s7067_s19 = sld [smem:[#allocation5_spill]] }
   0x9   :  { %v3287_v0 = vld [vmem:[%s7066_s26 + $0x170] sm:$0xff]  ;;  %v3288_v1 = vld [vmem:[%s7066_s26 + $0x178] sm:$0xff]  ;;  %v3285_v4 = vld [vmem:[%s7066_s26 + $0x160] sm:$0xff] }
   0xa   :  { %v191_v2 = vld [vmem:[%s7066_s26 + $0xb0] sm:$0xff]  ;;  %243 = vmatpush.msra.mxu0 %v3287_v0  ;;  %272 = vmatpush.msra.mxu1 %v3288_v1  ;;  %v192_v3 = vld [vmem:[%s7066_s26 + $0xb8] sm:$0xff]  ;;  %v3286_v5 = vld [vmem:[%s7066_s26 + $0x168] sm:$0xff] }
   0xb   :  { %309 = vmatpush.msra.mxu2 %v191_v2  ;;  %338 = vmatpush.msra.mxu3 %v192_v3  ;;  %v189_v6 = vld [vmem:[%s7066_s26 + $0xa0] sm:$0xff]  ;;  %v190_v7 = vld [vmem:[%s7066_s26 + $0xa8] sm:$0xff]  ;;  %v3283_v8 = vld [vmem:[%s7066_s26 + $0x150] sm:$0xff] }
   0xc   :  { %244 = vmatpush.msra.mxu0 %v3285_v4  ;;  %273 = vmatpush.msra.mxu1 %v3286_v5  ;;  %v3284_v9 = vld [vmem:[%s7066_s26 + $0x158] sm:$0xff]  ;;  %v187_v10 = vld [vmem:[%s7066_s26 + $0x90] sm:$0xff]  ;;  %v3281_v12 = vld [vmem:[%s7066_s26 + $0x140] sm:$0xff] }
   0xd   :  { %v188_v11 = vld [vmem:[%s7066_s26 + $0x98] sm:$0xff]  ;;  %310 = vmatpush.msra.mxu2 %v189_v6  ;;  %339 = vmatpush.msra.mxu3 %v190_v7  ;;  %v3282_v13 = vld [vmem:[%s7066_s26 + $0x148] sm:$0xff]  ;;  %v185_v14 = vld [vmem:[%s7066_s26 + $0x80] sm:$0xff] }
   0xe   :  { %245 = vmatpush.msra.mxu0 %v3283_v8  ;;  %274 = vmatpush.msra.mxu1 %v3284_v9  ;;  %v186_v15 = vld [vmem:[%s7066_s26 + $0x88] sm:$0xff]  ;;  %v3279_v16 = vld [vmem:[%s7066_s26 + $0x130] sm:$0xff]  ;;  %v3280_v17 = vld [vmem:[%s7066_s26 + $0x138] sm:$0xff] }
   0xf   :  { %311 = vmatpush.msra.mxu2 %v187_v10  ;;  %340 = vmatpush.msra.mxu3 %v188_v11  ;;  %v183_v18 = vld [vmem:[%s7066_s26 + $0x70] sm:$0xff]  ;;  %v184_v19 = vld [vmem:[%s7066_s26 + $0x78] sm:$0xff]  ;;  %v3277_v20 = vld [vmem:[%s7066_s26 + $0x120] sm:$0xff] }
  0x10   :  { %246 = vmatpush.msra.mxu0 %v3281_v12  ;;  %275 = vmatpush.msra.mxu1 %v3282_v13  ;;  %v3278_v21 = vld [vmem:[%s7066_s26 + $0x128] sm:$0xff]  ;;  %v181_v22 = vld [vmem:[%s7066_s26 + $0x60] sm:$0xff]  ;;  %v3275_v24 = vld [vmem:[%s7066_s26 + $0x110] sm:$0xff] }
  0x11   :  { %312 = vmatpush.msra.mxu2 %v185_v14  ;;  %341 = vmatpush.msra.mxu3 %v186_v15  ;;  %v182_v23 = vld [vmem:[%s7066_s26 + $0x68] sm:$0xff]  ;;  %v3276_v25 = vld [vmem:[%s7066_s26 + $0x118] sm:$0xff]  ;;  %v179_v26 = vld [vmem:[%s7066_s26 + $0x50] sm:$0xff] }
  0x12   :  { %247 = vmatpush.msra.mxu0 %v3279_v16  ;;  %276 = vmatpush.msra.mxu1 %v3280_v17  ;;  %v180_v27 = vld [vmem:[%s7066_s26 + $0x58] sm:$0xff]  ;;  %v3273_v28 = vld [vmem:[%s7066_s26 + $0x100] sm:$0xff]  ;;  %v3274_v29 = vld [vmem:[%s7066_s26 + $0x108] sm:$0xff] }
  0x13   :  { %313 = vmatpush.msra.mxu2 %v183_v18  ;;  %342 = vmatpush.msra.mxu3 %v184_v19  ;;  %v177_v30 = vld [vmem:[%s7066_s26 + $0x40] sm:$0xff]  ;;  %v178_v31 = vld [vmem:[%s7066_s26 + $0x48] sm:$0xff]  ;;  %v3271_v32 = vld [vmem:[%s7066_s26 + $0xf0] sm:$0xff] }
  0x14   :  { %248 = vmatpush.msra.mxu0 %v3277_v20  ;;  %277 = vmatpush.msra.mxu1 %v3278_v21  ;;  %v3272_v33 = vld [vmem:[%s7066_s26 + $0xf8] sm:$0xff]  ;;  %v175_v34 = vld [vmem:[%s7066_s26 + $0x30] sm:$0xff]  ;;  %v3269_v36 = vld [vmem:[%s7066_s26 + $0xe0] sm:$0xff] }
  0x15   :  { %314 = vmatpush.msra.mxu2 %v181_v22  ;;  %343 = vmatpush.msra.mxu3 %v182_v23  ;;  %v176_v35 = vld [vmem:[%s7066_s26 + $0x38] sm:$0xff]  ;;  %v3270_v37 = vld [vmem:[%s7066_s26 + $0xe8] sm:$0xff]  ;;  %v4324_v38 = vld [vmem:[%s7067_s19] sm:$0xff] }
  0x16   :  { %249 = vmatpush.msra.mxu0 %v3275_v24  ;;  %278 = vmatpush.msra.mxu1 %v3276_v25  ;;  %v4329_v39 = vld [vmem:[%s7067_s19 + $0x8] sm:$0xff]  ;;  %v173_v40 = vld [vmem:[%s7066_s26 + $0x20] sm:$0xff]  ;;  %v3267_v42 = vld [vmem:[%s7066_s26 + $0xd0] sm:$0xff]  ;;  %v223_v44 = vrot.slane %v4324_v38, 1 }
  0x17   :  { %315 = vmatpush.msra.mxu2 %v179_v26  ;;  %344 = vmatpush.msra.mxu3 %v180_v27  ;;  %v174_v41 = vld [vmem:[%s7066_s26 + $0x28] sm:$0xff]  ;;  %v3268_v43 = vld [vmem:[%s7066_s26 + $0xd8] sm:$0xff]  ;;  %v224_v45 = vrot.slane %v4329_v39, 1  ;;  %v171_v46 = vld [vmem:[%s7066_s26 + $0x10] sm:$0xff] }
  0x18   :  { %250 = vmatpush.msra.mxu0 %v3273_v28  ;;  %279 = vmatpush.msra.mxu1 %v3274_v29  ;;  %v172_v47 = vld [vmem:[%s7066_s26 + $0x18] sm:$0xff]  ;;  %v3265_v48 = vld [vmem:[%s7066_s26 + $0xc0] sm:$0xff]  ;;  %v3266_v49 = vld [vmem:[%s7066_s26 + $0xc8] sm:$0xff] }
  0x19   :  { %316 = vmatpush.msra.mxu2 %v177_v30  ;;  %345 = vmatpush.msra.mxu3 %v178_v31  ;;  %v169_v50 = vld [vmem:[%s7066_s26] sm:$0xff]  ;;  %v170_v51 = vld [vmem:[%s7066_s26 + $0x8] sm:$0xff]  ;;  %v225_v52 = vsel %vm222_vm0, %v223_v44, %v224_v45  ;;  %v4367_v53 = vld [vmem:[%s7067_s19 + $0x10] sm:$0xff] }
  0x1a   :  { %251 = vmatpush.msra.mxu0 %v3271_v32  ;;  %280 = vmatpush.msra.mxu1 %v3272_v33  ;;  %v3327_v54 = vld [vmem:[%s7066_s26 + $0x230] sm:$0xff]  ;;  %v3328_v55 = vld [vmem:[%s7066_s26 + $0x238] sm:$0xff]  ;;  %v226_v58 = vrot.slane %v4367_v53, 1  ;;  %v3325_v59 = vld [vmem:[%s7066_s26 + $0x220] sm:$0xff] }
  0x1b   :  { %317 = vmatpush.msra.mxu2 %v175_v34  ;;  %346 = vmatpush.msra.mxu3 %v176_v35  ;;  %v3359_v56 = vld [vmem:[%s7066_s26 + $0x2f0] sm:$0xff]  ;;  %v3360_v57 = vld [vmem:[%s7066_s26 + $0x2f8] sm:$0xff]  ;;  %v3326_v60 = vld [vmem:[%s7066_s26 + $0x228] sm:$0xff] }
  0x1c   :  { %252 = vmatpush.msra.mxu0 %v3269_v36  ;;  %281 = vmatpush.msra.mxu1 %v3270_v37  ;;  %v3357_v61 = vld [vmem:[%s7066_s26 + $0x2e0] sm:$0xff]  ;;  %v3358_v62 = vld [vmem:[%s7066_s26 + $0x2e8] sm:$0xff]  ;;  %v3323_v63 = vld [vmem:[%s7066_s26 + $0x210] sm:$0xff]  ;;  %v227_v3 = vsel %vm222_vm0, %v224_v45, %v226_v58 }
  0x1d   :  { %318 = vmatpush.msra.mxu2 %v173_v40  ;;  %347 = vmatpush.msra.mxu3 %v174_v41  ;;  %v3324_v0 = vld [vmem:[%s7066_s26 + $0x218] sm:$0xff]  ;;  %v3355_v1 = vld [vmem:[%s7066_s26 + $0x2d0] sm:$0xff]  ;;  %v3321_v5 = vld [vmem:[%s7066_s26 + $0x200] sm:$0xff] }
  0x1e   :  { %253 = vmatpush.msra.mxu0 %v3267_v42  ;;  %282 = vmatpush.msra.mxu1 %v3268_v43  ;;  %v3356_v2 = vld [vmem:[%s7066_s26 + $0x2d8] sm:$0xff]  ;;  %v3322_v6 = vld [vmem:[%s7066_s26 + $0x208] sm:$0xff]  ;;  %v3353_v7 = vld [vmem:[%s7066_s26 + $0x2c0] sm:$0xff] }
  0x1f   :  { %319 = vmatpush.msra.mxu2 %v171_v46  ;;  %348 = vmatpush.msra.mxu3 %v172_v47  ;;  %v4416_v4 = vld [vmem:[%s7067_s19 + $0x18] sm:$0xff]  ;;  %v3354_v8 = vld [vmem:[%s7066_s26 + $0x2c8] sm:$0xff] }
  0x20   :  { %254 = vmatpush.msra.mxu0 %v3265_v48  ;;  %283 = vmatpush.msra.mxu1 %v3266_v49 }
  0x21   :  { %320 = vmatpush.msra.mxu2 %v169_v50  ;;  %349 = vmatpush.msra.mxu3 %v170_v51 }
  0x22   :  { %3289 = vmatmul.msk.f32.vlgmr.msra.gmra.mxu0 %vm230_vm1, %v225_v52  ;;  %3293 = vmatmul.msk.f32.vlgmr.msra.gmra.mxu1 %vm230_vm1, %v225_v52 }
  0x23   :  { %3297 = vmatmul.msk.f32.vlgmr.msra.gmra.mxu2 %vm230_vm1, %v4324_v38  ;;  %3301 = vmatmul.msk.f32.vlgmr.msra.gmra.mxu3 %vm230_vm1, %v4324_v38 }
  0x24   :  { %408 = vmatpush.msrb.mxu0 %v3327_v54  ;;  %437 = vmatpush.msrb.mxu1 %v3328_v55 }
  0x25   :  { %515 = vmatpush.msrb.mxu2 %v3359_v56  ;;  %544 = vmatpush.msrb.mxu3 %v3360_v57 }
  0x26   :  { %409 = vmatpush.msrb.mxu0 %v3325_v59  ;;  %438 = vmatpush.msrb.mxu1 %v3326_v60 }
  0x27   :  { %516 = vmatpush.msrb.mxu2 %v3357_v61  ;;  %545 = vmatpush.msrb.mxu3 %v3358_v62 }
  0x28   :  { %410 = vmatpush.msrb.mxu0 %v3323_v63  ;;  %439 = vmatpush.msrb.mxu1 %v3324_v0 }
  0x29   :  { %517 = vmatpush.msrb.mxu2 %v3355_v1  ;;  %546 = vmatpush.msrb.mxu3 %v3356_v2 }
  0x2a   :  { %3290 = vmatmul.msk.f32.gmra.mxu0 %vm230_vm1, %v227_v3  ;;  %3294 = vmatmul.msk.f32.gmra.mxu1 %vm230_vm1, %v227_v3 }
  0x2b   :  { %22 = vsyncpa [#allocation3], 0  ;;  %3298 = vmatmul.msk.f32.gmra.mxu2 %vm230_vm1, %v4329_v39  ;;  %3302 = vmatmul.msk.f32.gmra.mxu3 %vm230_vm1, %v4329_v39  ;;  %v228_v9 = vrot.slane %v4416_v4, 1  ;;  %v3319_v10 = vld [vmem:[%s7066_s26 + $0x1f0] sm:$0xff]  ;;  %v3320_v11 = vld [vmem:[%s7066_s26 + $0x1f8] sm:$0xff]  ;;  %v389_v37 = vrot.slane %v4324_v38, 2 }
  0x2c   :  { %411 = vmatpush.msrb.mxu0 %v3321_v5  ;;  %440 = vmatpush.msrb.mxu1 %v3322_v6  ;;  %v3351_v12 = vld [vmem:[%s7066_s26 + $0x2b0] sm:$0xff]  ;;  %v3352_v13 = vld [vmem:[%s7066_s26 + $0x2b8] sm:$0xff]  ;;  %v3317_v14 = vld [vmem:[%s7066_s26 + $0x1e0] sm:$0xff]  ;;  %v390_v40 = vrot.slane %v4329_v39, 2  ;;  %vm388_vm2 = vcmask 1045504   ;;  %v496_v43 = vrot.slane %v4324_v38, 3 }
  0x2d   :  { %518 = vmatpush.msrb.mxu2 %v3353_v7  ;;  %547 = vmatpush.msrb.mxu3 %v3354_v8  ;;  %v3318_v15 = vld [vmem:[%s7066_s26 + $0x1e8] sm:$0xff]  ;;  %v3349_v16 = vld [vmem:[%s7066_s26 + $0x2a0] sm:$0xff]  ;;  %v229_v18 = vsel %vm222_vm0, %v226_v58, %v228_v9  ;;  %v3315_v19 = vld [vmem:[%s7066_s26 + $0x1d0] sm:$0xff]  ;;  %v497_v44 = vrot.slane %v4329_v39, 3  ;;  %vm495_vm3 = vcmask 1044480   ;;  %vm602_vm4 = vcmask 1043456  }
  0x2e   :  { %412 = vmatpush.msrb.mxu0 %v3319_v10  ;;  %441 = vmatpush.msrb.mxu1 %v3320_v11  ;;  %v3350_v17 = vld [vmem:[%s7066_s26 + $0x2a8] sm:$0xff]  ;;  %v3316_v20 = vld [vmem:[%s7066_s26 + $0x1d8] sm:$0xff]  ;;  %v3347_v21 = vld [vmem:[%s7066_s26 + $0x290] sm:$0xff]  ;;  %v391_v49 = vsel %vm388_vm2, %v389_v37, %v390_v40  ;;  %v603_v51 = vrot.slane %v4324_v38, 4  ;;  %v604_v52 = vrot.slane %v4329_v39, 4  ;;  %v606_v38 = vrot.slane %v4367_v53, 4 }
  0x2f   :  { %519 = vmatpush.msrb.mxu2 %v3351_v12  ;;  %548 = vmatpush.msrb.mxu3 %v3352_v13  ;;  %v3348_v22 = vld [vmem:[%s7066_s26 + $0x298] sm:$0xff]  ;;  %v3313_v23 = vld [vmem:[%s7066_s26 + $0x1c0] sm:$0xff]  ;;  %v3314_v24 = vld [vmem:[%s7066_s26 + $0x1c8] sm:$0xff]  ;;  %v498_v50 = vsel %vm495_vm3, %v496_v43, %v497_v44  ;;  %v392_v39 = vrot.slane %v4367_v53, 2  ;;  %v499_v59 = vrot.slane %v4367_v53, 3  ;;  %v608_v2 = vrot.slane %v4416_v4, 4 }
  0x30   :  { %413 = vmatpush.msrb.mxu0 %v3317_v14  ;;  %442 = vmatpush.msrb.mxu1 %v3318_v15  ;;  %v3345_v25 = vld [vmem:[%s7066_s26 + $0x280] sm:$0xff]  ;;  %v3346_v26 = vld [vmem:[%s7066_s26 + $0x288] sm:$0xff]  ;;  %v3311_v27 = vld [vmem:[%s7066_s26 + $0x1b0] sm:$0xff]  ;;  %v4563_v56 = vsel %vm602_vm4, %v603_v51, %v604_v52  ;;  %v4577_v60 = vsel %vm602_vm4, %v604_v52, %v606_v38  ;;  %v394_v3 = vrot.slane %v4416_v4, 2  ;;  %v501_v7 = vrot.slane %v4416_v4, 3  ;;  %s4116_s20 = smov [#allocation2]  }
  0x31   :  { %520 = vmatpush.msrb.mxu2 %v3349_v16  ;;  %549 = vmatpush.msrb.mxu3 %v3350_v17  ;;  %v3312_v28 = vld [vmem:[%s7066_s26 + $0x1b8] sm:$0xff]  ;;  %v3343_v29 = vld [vmem:[%s7066_s26 + $0x270] sm:$0xff]  ;;  %v3309_v31 = vld [vmem:[%s7066_s26 + $0x1a0] sm:$0xff]  ;;  %v393_v63 = vsel %vm388_vm2, %v390_v40, %v392_v39  ;;  %v500_v0 = vsel %vm495_vm3, %v497_v44, %v499_v59  ;;  %v609_v8 = vsel %vm602_vm4, %v606_v38, %v608_v2  ;;  %vm705_vm5 = vcmask 228352   ;;  %s3254_s21 = sshll.u32 %s4116_s20, 4  ;;  %s3255_s21 = int_to_ptr.vmem [resolvable:$true] %s3254_s21 }
  0x32   :  { %3291 = vmatmul.msk.f32.gmra.mxu0 %vm230_vm1, %v229_v18  ;;  %3295 = vmatmul.msk.f32.gmra.mxu1 %vm230_vm1, %v229_v18  ;;  %v3344_v30 = vld [vmem:[%s7066_s26 + $0x278] sm:$0xff]  ;;  %v3310_v32 = vld [vmem:[%s7066_s26 + $0x1a8] sm:$0xff]  ;;  %v3341_v33 = vld [vmem:[%s7066_s26 + $0x260] sm:$0xff]  ;;  %v395_v11 = vsel %vm388_vm2, %v392_v39, %v394_v3  ;;  %v502_v12 = vsel %vm495_vm3, %v499_v59, %v501_v7  ;;  %vm820_vm6 = vcmask 326656   ;;  %vm971_vm7 = vcmask 687104  }
  0x33   :  { %3299 = vmatmul.msk.f32.gmra.mxu2 %vm230_vm1, %v4367_v53  ;;  %3303 = vmatmul.msk.f32.gmra.mxu3 %vm230_vm1, %v4367_v53  ;;  %v3342_v34 = vld [vmem:[%s7066_s26 + $0x268] sm:$0xff]  ;;  %v3307_v35 = vld [vmem:[%s7066_s26 + $0x190] sm:$0xff]  ;;  %v3308_v36 = vld [vmem:[%s7066_s26 + $0x198] sm:$0xff]  ;;  %vm1359_vm8 = vcmask 1041408   ;;  %vm1355_vm9 = vcmask 80896   ;;  %vm1451_vm10 = vcmask 261120  }
  0x34   :  { %414 = vmatpush.msrb.mxu0 %v3315_v19  ;;  %443 = vmatpush.msrb.mxu1 %v3316_v20  ;;  %v3339_v41 = vld [vmem:[%s7066_s26 + $0x250] sm:$0xff]  ;;  %v3340_v42 = vld [vmem:[%s7066_s26 + $0x258] sm:$0xff]  ;;  %v3305_v45 = vld [vmem:[%s7066_s26 + $0x180] sm:$0xff]  ;;  %vm1559_vm11 = vcmask 654336   ;;  %vm1731_vm12 = vcmask 73728  }
  0x35   :  { %521 = vmatpush.msrb.mxu2 %v3347_v21  ;;  %550 = vmatpush.msrb.mxu3 %v3348_v22  ;;  %v3306_v46 = vld [vmem:[%s7066_s26 + $0x188] sm:$0xff]  ;;  %v3337_v47 = vld [vmem:[%s7066_s26 + $0x240] sm:$0xff]  ;;  %v3391_v54 = vld [vmem:[%s7066_s26 + $0x3b0] sm:$0xff] }
  0x36   :  { %415 = vmatpush.msrb.mxu0 %v3313_v23  ;;  %444 = vmatpush.msrb.mxu1 %v3314_v24  ;;  %v3338_v48 = vld [vmem:[%s7066_s26 + $0x248] sm:$0xff]  ;;  %v3392_v55 = vld [vmem:[%s7066_s26 + $0x3b8] sm:$0xff]  ;;  %v3389_v57 = vld [vmem:[%s7066_s26 + $0x3a0] sm:$0xff] }
  0x37   :  { %522 = vmatpush.msrb.mxu2 %v3345_v25  ;;  %551 = vmatpush.msrb.mxu3 %v3346_v26  ;;  %v3390_v58 = vld [vmem:[%s7066_s26 + $0x3a8] sm:$0xff]  ;;  %v3387_v61 = vld [vmem:[%s7066_s26 + $0x390] sm:$0xff]  ;;  %v3388_v62 = vld [vmem:[%s7066_s26 + $0x398] sm:$0xff] }
  0x38   :  { %416 = vmatpush.msrb.mxu0 %v3311_v27  ;;  %445 = vmatpush.msrb.mxu1 %v3312_v28  ;;  %v3385_v53 = vld [vmem:[%s7066_s26 + $0x380] sm:$0xff]  ;;  %v3386_v1 = vld [vmem:[%s7066_s26 + $0x388] sm:$0xff]  ;;  %v3383_v5 = vld [vmem:[%s7066_s26 + $0x370] sm:$0xff] }
  0x39   :  { %523 = vmatpush.msrb.mxu2 %v3343_v29  ;;  %552 = vmatpush.msrb.mxu3 %v3344_v30  ;;  %v3384_v6 = vld [vmem:[%s7066_s26 + $0x378] sm:$0xff]  ;;  %v3382_v10 = vld [vmem:[%s7066_s26 + $0x368] sm:$0xff]  ;;  %v3377_v14 = vld [vmem:[%s7066_s26 + $0x340] sm:$0xff] }
  0x3a   :  { %3292 = vmatmul.msk.f32.gmra.mxu0 %vm230_vm1, %v228_v9  ;;  %3296 = vmatmul.msk.f32.gmra.mxu1 %vm230_vm1, %v228_v9  ;;  %v3381_v9 = vld [vmem:[%s7066_s26 + $0x360] sm:$0xff]  ;;  %v3380_v13 = vld [vmem:[%s7066_s26 + $0x358] sm:$0xff]  ;;  %v3378_v15 = vld [vmem:[%s7066_s26 + $0x348] sm:$0xff] }
  0x3b   :  { %3300 = vmatmul.msk.f32.gmra.mxu2 %vm230_vm1, %v4416_v4  ;;  %3304 = vmatmul.msk.f32.gmra.mxu3 %vm230_vm1, %v4416_v4  ;;  %v3379_v4 = vld [vmem:[%s7066_s26 + $0x350] sm:$0xff]  ;;  %v3376_v17 = vld [vmem:[%s7066_s26 + $0x338] sm:$0xff]  ;;  %v3373_v18 = vld [vmem:[%s7066_s26 + $0x320] sm:$0xff] }
  0x3c   :  { %417 = vmatpush.msrb.mxu0 %v3309_v31  ;;  %446 = vmatpush.msrb.mxu1 %v3310_v32  ;;  %v3375_v16 = vld [vmem:[%s7066_s26 + $0x330] sm:$0xff]  ;;  %v3374_v19 = vld [vmem:[%s7066_s26 + $0x328] sm:$0xff]  ;;  %v3372_v21 = vld [vmem:[%s7066_s26 + $0x318] sm:$0xff] }
  0x3d   :  { %524 = vmatpush.msrb.mxu2 %v3341_v33  ;;  %553 = vmatpush.msrb.mxu3 %v3342_v34  ;;  %v3371_v20 = vld [vmem:[%s7066_s26 + $0x310] sm:$0xff]  ;;  %v3369_v22 = vld [vmem:[%s7066_s26 + $0x300] sm:$0xff]  ;;  %v3370_v23 = vld [vmem:[%s7066_s26 + $0x308] sm:$0xff] }
  0x3e   :  { %418 = vmatpush.msrb.mxu0 %v3307_v35  ;;  %447 = vmatpush.msrb.mxu1 %v3308_v36 }
  0x3f   :  { %525 = vmatpush.msrb.mxu2 %v3339_v41  ;;  %554 = vmatpush.msrb.mxu3 %v3340_v42 }
  0x40   :  { %419 = vmatpush.msrb.mxu0 %v3305_v45  ;;  %448 = vmatpush.msrb.mxu1 %v3306_v46 }
  0x41   :  { %526 = vmatpush.msrb.mxu2 %v3337_v47  ;;  %555 = vmatpush.msrb.mxu3 %v3338_v48 }
  0x42   :  { %3329 = vmatmul.msk.f32.vlgmr.msrb.gmra.mxu0 %vm230_vm1, %v391_v49  ;;  %3333 = vmatmul.msk.f32.vlgmr.msrb.gmra.mxu1 %vm230_vm1, %v391_v49 }
  0x43   :  { %3361 = vmatmul.msk.f32.vlgmr.msrb.gmra.mxu2 %vm230_vm1, %v498_v50  ;;  %3365 = vmatmul.msk.f32.vlgmr.msrb.gmra.mxu3 %vm230_vm1, %v498_v50 }
  0x44   :  { %622 = vmatpush.msra.mxu0 %v3391_v54  ;;  %651 = vmatpush.msra.mxu1 %v3392_v55 }
  0x46   :  { %623 = vmatpush.msra.mxu0 %v3389_v57  ;;  %652 = vmatpush.msra.mxu1 %v3390_v58 }
  0x48   :  { %624 = vmatpush.msra.mxu0 %v3387_v61  ;;  %653 = vmatpush.msra.mxu1 %v3388_v62 }
  0x4a   :  { %3330 = vmatmul.msk.f32.gmra.mxu0 %vm230_vm1, %v393_v63  ;;  %3334 = vmatmul.msk.f32.gmra.mxu1 %vm230_vm1, %v393_v63 }
  0x4b   :  { %3362 = vmatmul.msk.f32.gmra.mxu2 %vm230_vm1, %v500_v0  ;;  %3366 = vmatmul.msk.f32.gmra.mxu3 %vm230_vm1, %v500_v0 }
  0x4c   :  { %625 = vmatpush.msra.mxu0 %v3385_v53  ;;  %654 = vmatpush.msra.mxu1 %v3386_v1 }
  0x4e   :  { %626 = vmatpush.msra.mxu0 %v3383_v5  ;;  %655 = vmatpush.msra.mxu1 %v3384_v6 }
  0x50   :  { %627 = vmatpush.msra.mxu0 %v3381_v9  ;;  %656 = vmatpush.msra.mxu1 %v3382_v10 }
  0x52   :  { %3331 = vmatmul.msk.f32.gmra.mxu0 %vm230_vm1, %v395_v11  ;;  %3335 = vmatmul.msk.f32.gmra.mxu1 %vm230_vm1, %v395_v11 }
  0x53   :  { %3363 = vmatmul.msk.f32.gmra.mxu2 %vm230_vm1, %v502_v12  ;;  %3367 = vmatmul.msk.f32.gmra.mxu3 %vm230_vm1, %v502_v12 }
  0x54   :  { %628 = vmatpush.msra.mxu0 %v3379_v4  ;;  %657 = vmatpush.msra.mxu1 %v3380_v13  ;;  %v57_v4 = vld [vmem:[%s7046_s2] sm:$0x3] }
  0x56   :  { %629 = vmatpush.msra.mxu0 %v3377_v14  ;;  %658 = vmatpush.msra.mxu1 %v3378_v15 }
  0x58   :  { %630 = vmatpush.msra.mxu0 %v3375_v16  ;;  %659 = vmatpush.msra.mxu1 %v3376_v17 }
  0x5a   :  { %3332 = vmatmul.msk.f32.gmra.mxu0 %vm230_vm1, %v394_v3  ;;  %3336 = vmatmul.msk.f32.gmra.mxu1 %vm230_vm1, %v394_v3 }
  0x5b   :  { %3364 = vmatmul.msk.f32.gmra.mxu2 %vm230_vm1, %v501_v7  ;;  %3368 = vmatmul.msk.f32.gmra.mxu3 %vm230_vm1, %v501_v7 }
  0x5c   :  { %631 = vmatpush.msra.mxu0 %v3373_v18  ;;  %660 = vmatpush.msra.mxu1 %v3374_v19 }
  0x5e   :  { %632 = vmatpush.msra.mxu0 %v3371_v20  ;;  %661 = vmatpush.msra.mxu1 %v3372_v21 }
  0x60   :  { %633 = vmatpush.msra.mxu0 %v3369_v22  ;;  %662 = vmatpush.msra.mxu1 %v3370_v23  ;;  %v4674_v22 = vperm.slane %v57_v4, 0  ;;  %v4676_v23 = vperm.slane %v57_v4, 1  ;;  %v89_v4 = vld [vmem:[%s7050_s6 + $0x28] sm:$0xff] }
  0x62   :  { %3393 = vmatmul.msk.f32.vlgmr.msra.gmra.mxu0 %vm230_vm1, %v4563_v56  ;;  %3397 = vmatmul.msk.f32.vlgmr.msra.gmra.mxu1 %vm230_vm1, %v4563_v56 }
  0x6a   :  { %3394 = vmatmul.msk.f32.gmra.mxu0 %vm230_vm1, %v4577_v60  ;;  %3398 = vmatmul.msk.f32.gmra.mxu1 %vm230_vm1, %v4577_v60 }
  0x72   :  { %3395 = vmatmul.msk.f32.gmra.mxu0 %vm230_vm1, %v609_v8  ;;  %3399 = vmatmul.msk.f32.gmra.mxu1 %vm230_vm1, %v609_v8 }
  0x7a   :  { %3396 = vmatmul.msk.f32.gmra.mxu0 %vm230_vm1, %v608_v2  ;;  %3400 = vmatmul.msk.f32.gmra.mxu1 %vm230_vm1, %v608_v2 }
  0x9f   :  { %v256_v24 = vpop.f32.mrf.mxu0  ;;  %v285_v25 = vpop.f32.mrf.mxu1 }
  0xa6   :  { %v322_v28 = vpop.f32.mrf.mxu2  ;;  %v351_v29 = vpop.f32.mrf.mxu3 }
  0xa7   :  { %v259_v26 = vpop.f32.mrf.mxu0  ;;  %v288_v27 = vpop.f32.mrf.mxu1  ;;  %v323_v2 = vadd.f32 %v322_v28, %v256_v24  ;;  %v352_v3 = vadd.f32 %v351_v29, %v285_v25 }
  0xae   :  { %v325_v32 = vpop.f32.mrf.mxu2  ;;  %v354_v33 = vpop.f32.mrf.mxu3 }
  0xaf   :  { %v262_v30 = vpop.f32.mrf.mxu0  ;;  %v291_v31 = vpop.f32.mrf.mxu1  ;;  %v326_v63 = vadd.f32 %v325_v32, %v259_v26  ;;  %v355_v5 = vadd.f32 %v354_v33, %v288_v27 }
  0xb6   :  { %v328_v40 = vpop.f32.mrf.mxu2  ;;  %v357_v41 = vpop.f32.mrf.mxu3 }
  0xb7   :  { %v265_v34 = vpop.f32.mrf.mxu0  ;;  %v294_v35 = vpop.f32.mrf.mxu1  ;;  %v329_v61 = vadd.f32 %v328_v40, %v262_v30  ;;  %v358_v62 = vadd.f32 %v357_v41, %v291_v31 }
  0xbe   :  { %v331_v44 = vpop.f32.mrf.mxu2  ;;  %v360_v45 = vpop.f32.mrf.mxu3 }
  0xbf   :  { %v421_v36 = vpop.f32.mrf.mxu0  ;;  %v450_v37 = vpop.f32.mrf.mxu1  ;;  %v332_v0 = vadd.f32 %v331_v44, %v265_v34  ;;  %v361_v53 = vadd.f32 %v360_v45, %v294_v35 }
  0xc0   :  { %v462_v13 = vadd.f32 %v421_v36, %v323_v2  ;;  %v463_v14 = vadd.f32 %v450_v37, %v352_v3  ;;  %v62_v2 = vld [vmem:[%s7048_s4 + $0x8] sm:$0x3f] }
  0xc1   :  { %v72_v3 = vld [vmem:[%s7049_s5 + $0x48] sm:$0xff] }
  0xc6   :  { %v528_v48 = vpop.f32.mrf.mxu2  ;;  %v557_v49 = vpop.f32.mrf.mxu3 }
  0xc7   :  { %v424_v42 = vpop.f32.mrf.mxu0  ;;  %v453_v43 = vpop.f32.mrf.mxu1  ;;  %v569_v27 = vadd.f32 %v528_v48, %v462_v13  ;;  %v570_v31 = vadd.f32 %v557_v49, %v463_v14  ;;  %v77_v48 = vld [vmem:[%s7049_s5 + $0x70] sm:$0xff]  ;;  %v67_v13 = vld [vmem:[%s7049_s5 + $0x20] sm:$0xff] }
  0xc8   :  { %v464_v9 = vadd.f32 %v424_v42, %v326_v63  ;;  %v465_v15 = vadd.f32 %v453_v43, %v355_v5  ;;  %v96_v63 = vld [vmem:[%s7050_s6 + $0x60] sm:$0xff]  ;;  %v93_v5 = vld [vmem:[%s7050_s6 + $0x48] sm:$0xff] }
  0xc9   :  { %v83_v14 = vld [vmem:[%s7049_s5 + $0xa0] sm:$0xff] }
  0xca   :  { %861 = vmatpush.msrb.mxu1 %v83_v14  ;;  %v3426_v14 = vld [vmem:[%s7051_s7 + $0xf8] sm:$0xff] }
  0xce   :  { %v531_v52 = vpop.f32.mrf.mxu2  ;;  %v560_v54 = vpop.f32.mrf.mxu3 }
  0xcf   :  { %v427_v46 = vpop.f32.mrf.mxu0  ;;  %v456_v47 = vpop.f32.mrf.mxu1  ;;  %v571_v17 = vadd.f32 %v531_v52, %v464_v9  ;;  %v572_v21 = vadd.f32 %v560_v54, %v465_v15  ;;  %v91_v9 = vld [vmem:[%s7050_s6 + $0x38] sm:$0xff]  ;;  %v88_v15 = vld [vmem:[%s7050_s6 + $0x20] sm:$0xff] }
  0xd0   :  { %v466_v1 = vadd.f32 %v427_v46, %v329_v61  ;;  %v467_v6 = vadd.f32 %v456_v47, %v358_v62  ;;  %v78_v47 = vld [vmem:[%s7049_s5 + $0x78] sm:$0xff]  ;;  %v98_v61 = vld [vmem:[%s7050_s6 + $0x70] sm:$0xff]  ;;  %v97_v62 = vld [vmem:[%s7050_s6 + $0x68] sm:$0xff] }
  0xd1   :  { %827 = vmatpush.msrb.mxu0 %v78_v47 }
  0xd3   :  { %828 = vmatpush.msrb.mxu0 %v77_v48  ;;  %v935_v48 = vld [vmem:[%s7051_s7 + $0x70] sm:$0xff] }
  0xd6   :  { %v534_v57 = vpop.f32.mrf.mxu2  ;;  %v563_v58 = vpop.f32.mrf.mxu3 }
  0xd7   :  { %v430_v50 = vpop.f32.mrf.mxu0  ;;  %v459_v51 = vpop.f32.mrf.mxu1  ;;  %v573_v10 = vadd.f32 %v534_v57, %v466_v1  ;;  %v574_v16 = vadd.f32 %v563_v58, %v467_v6  ;;  %v74_v57 = vld [vmem:[%s7049_s5 + $0x58] sm:$0xff]  ;;  %v73_v58 = vld [vmem:[%s7049_s5 + $0x50] sm:$0xff]  ;;  %v71_v6 = vld [vmem:[%s7049_s5 + $0x40] sm:$0xff] }
  0xd8   :  { %v468_v11 = vadd.f32 %v430_v50, %v332_v0  ;;  %v469_v12 = vadd.f32 %v459_v51, %v361_v53  ;;  %v76_v51 = vld [vmem:[%s7049_s5 + $0x68] sm:$0xff]  ;;  %v61_v0 = vld [vmem:[%s7048_s4] sm:$0xff]  ;;  %v95_v53 = vld [vmem:[%s7050_s6 + $0x58] sm:$0xff] }
  0xd9   :  { %829 = vmatpush.msrb.mxu0 %v76_v51  ;;  %v94_v1 = vld [vmem:[%s7050_s6 + $0x50] sm:$0xff] }
  0xda   :  { %v3433_v51 = vld [vmem:[%s7051_s7 + $0x130] sm:$0xff] }
  0xde   :  { %v537_v7 = vpop.f32.mrf.mxu2  ;;  %v566_v8 = vpop.f32.mrf.mxu3 }
  0xdf   :  { %v635_v55 = vpop.f32.mrf.mxu0  ;;  %v664_v56 = vpop.f32.mrf.mxu1  ;;  %v575_v18 = vadd.f32 %v537_v7, %v468_v11  ;;  %v576_v19 = vadd.f32 %v566_v8, %v469_v12  ;;  %v92_v7 = vld [vmem:[%s7050_s6 + $0x40] sm:$0xff]  ;;  %v70_v8 = vld [vmem:[%s7049_s5 + $0x38] sm:$0xff]  ;;  %v90_v11 = vld [vmem:[%s7050_s6 + $0x30] sm:$0xff] }
  0xe0   :  { %v676_v33 = vadd.f32 %v635_v55, %v569_v27  ;;  %v677_v37 = vadd.f32 %v664_v56, %v570_v31  ;;  %v59_v55 = vld [vmem:[%s7047_s3] sm:$0xff]  ;;  %v68_v12 = vld [vmem:[%s7049_s5 + $0x28] sm:$0xff] }
  0xe1   :  { %v64_v27 = vld [vmem:[%s7049_s5 + $0x8] sm:$0xff]  ;;  %v63_v31 = vld [vmem:[%s7049_s5] sm:$0xff] }
  0xe2   :  { %v689_v43 = vadd.f32 %v4674_v22, %v676_v33  ;;  %v690_v44 = vadd.f32 %v4676_v23, %v677_v37  ;;  %v84_v33 = vld [vmem:[%s7050_s6] sm:$0xff]  ;;  %v939_v37 = vld [vmem:[%s7051_s7 + $0x90] sm:$0xff] }
  0xe7   :  { %v638_v38 = vpop.f32.mrf.mxu0  ;;  %v667_v39 = vpop.f32.mrf.mxu1 }
  0xe8   :  { %v678_v28 = vadd.f32 %v638_v38, %v571_v17  ;;  %v679_v32 = vadd.f32 %v667_v39, %v572_v21  ;;  %v75_v39 = vld [vmem:[%s7049_s5 + $0x60] sm:$0xff]  ;;  %v66_v17 = vld [vmem:[%s7049_s5 + $0x18] sm:$0xff]  ;;  %v81_v21 = vld [vmem:[%s7049_s5 + $0x90] sm:$0xff] }
  0xe9   :  { %830 = vmatpush.msrb.mxu0 %v75_v39  ;;  %v931_v39 = vld [vmem:[%s7051_s7 + $0x50] sm:$0xff] }
  0xea   :  { %v691_v41 = vadd.f32 %v4674_v22, %v678_v28  ;;  %v692_v42 = vadd.f32 %v4676_v23, %v679_v32  ;;  %v80_v28 = vld [vmem:[%s7049_s5 + $0x88] sm:$0xff]  ;;  %v79_v32 = vld [vmem:[%s7049_s5 + $0x80] sm:$0xff] }
  0xeb   :  { %831 = vmatpush.msrb.mxu0 %v74_v57  ;;  %v932_v57 = vld [vmem:[%s7051_s7 + $0x58] sm:$0xff] }
  0xed   :  { %832 = vmatpush.msrb.mxu0 %v73_v58  ;;  %v3429_v58 = vld [vmem:[%s7051_s7 + $0x110] sm:$0xff] }
  0xef   :  { %v641_v59 = vpop.f32.mrf.mxu0  ;;  %v670_v60 = vpop.f32.mrf.mxu1  ;;  %833 = vmatpush.msrb.mxu0 %v72_v3 }
  0xf0   :  { %v680_v20 = vadd.f32 %v641_v59, %v573_v10  ;;  %v681_v24 = vadd.f32 %v670_v60, %v574_v16  ;;  %v60_v59 = vld [vmem:[%s7047_s3 + $0x8] sm:$0x3f]  ;;  %v99_v60 = vld [vmem:[%s7050_s6 + $0x78] sm:$0xff]  ;;  %v69_v10 = vld [vmem:[%s7049_s5 + $0x30] sm:$0xff] }
  0xf1   :  { %834 = vmatpush.msrb.mxu0 %v71_v6  ;;  %v104_v16 = vld [vmem:[%s7050_s6 + $0xa0] sm:$0xff] }
  0xf2   :  { %v693_v34 = vadd.f32 %v4674_v22, %v680_v20  ;;  %v694_v40 = vadd.f32 %v4676_v23, %v681_v24  ;;  %v103_v20 = vld [vmem:[%s7050_s6 + $0x98] sm:$0xff]  ;;  %v65_v24 = vld [vmem:[%s7049_s5 + $0x10] sm:$0xff] }
  0xf3   :  { %835 = vmatpush.msrb.mxu0 %v70_v8 }
  0xf5   :  { %836 = vmatpush.msrb.mxu0 %v69_v10  ;;  %v3427_v10 = vld [vmem:[%s7051_s7 + $0x100] sm:$0xff] }
  0xf7   :  { %v644_v25 = vpop.f32.mrf.mxu0  ;;  %v673_v26 = vpop.f32.mrf.mxu1  ;;  %837 = vmatpush.msrb.mxu0 %v68_v12  ;;  %v925_v12 = vld [vmem:[%s7051_s7 + $0x20] sm:$0xff] }
  0xf8   :  { %v682_v29 = vadd.f32 %v644_v25, %v575_v18  ;;  %v683_v30 = vadd.f32 %v673_v26, %v576_v19  ;;  %v82_v18 = vld [vmem:[%s7049_s5 + $0x98] sm:$0xff]  ;;  %v86_v25 = vld [vmem:[%s7050_s6 + $0x10] sm:$0xff] }
  0xf9   :  { %v87_v19 = vld [vmem:[%s7050_s6 + $0x18] sm:$0xff]  ;;  %838 = vmatpush.msrb.mxu0 %v67_v13  ;;  %862 = vmatpush.msrb.mxu1 %v82_v18  ;;  %v102_v26 = vld [vmem:[%s7050_s6 + $0x90] sm:$0xff]  ;;  %v3424_v18 = vld [vmem:[%s7051_s7 + $0xe8] sm:$0xff] }
  0xfa   :  { %v695_v35 = vadd.f32 %v4674_v22, %v682_v29  ;;  %v696_v36 = vadd.f32 %v4676_v23, %v683_v30  ;;  %v85_v29 = vld [vmem:[%s7050_s6 + $0x8] sm:$0xff]  ;;  %v3425_v13 = vld [vmem:[%s7051_s7 + $0xf0] sm:$0xff] }
  0xfb   :  { %839 = vmatpush.msrb.mxu0 %v66_v17  ;;  %863 = vmatpush.msrb.mxu1 %v81_v21  ;;  %v101_v30 = vld [vmem:[%s7050_s6 + $0x88] sm:$0xff]  ;;  %v3423_v17 = vld [vmem:[%s7051_s7 + $0xe0] sm:$0xff]  ;;  %v3499_v21 = vld [vmem:[%s7051_s7 + $0x2b0] sm:$0xf] }
  0xfc   :  { %3932 = vtanh.f32 %v695_v35  ;;  %v941_v35 = vld [vmem:[%s7051_s7 + $0xa0] sm:$0xf] }
  0xfd   :  { %3934 = vtanh.f32 %v696_v36  ;;  %840 = vmatpush.msrb.mxu0 %v65_v24  ;;  %864 = vmatpush.msrb.mxu1 %v80_v28  ;;  %v942_v36 = vld [vmem:[%s7051_s7 + $0xa8] sm:$0xf]  ;;  %v3500_v24 = vld [vmem:[%s7051_s7 + $0x2b8] sm:$0xf] }
  0xfe   :  { %3936 = vtanh.f32 %v693_v34  ;;  %v100_v34 = vld [vmem:[%s7050_s6 + $0x80] sm:$0xff]  ;;  %v3498_v28 = vld [vmem:[%s7051_s7 + $0x2a8] sm:$0xff] }
  0xff   :  { %3938 = vtanh.f32 %v694_v40  ;;  %841 = vmatpush.msrb.mxu0 %v64_v27  ;;  %865 = vmatpush.msrb.mxu1 %v79_v32  ;;  %v940_v40 = vld [vmem:[%s7051_s7 + $0x98] sm:$0xff]  ;;  %v3497_v27 = vld [vmem:[%s7051_s7 + $0x2a0] sm:$0xff] }
 0x100   :  { %3940 = vtanh.f32 %v691_v41  ;;  %v937_v41 = vld [vmem:[%s7051_s7 + $0x80] sm:$0xff]  ;;  %v3496_v32 = vld [vmem:[%s7051_s7 + $0x298] sm:$0xff] }
 0x101   :  { %3942 = vtanh.f32 %v692_v42  ;;  %842 = vmatpush.msrb.mxu0 %v63_v31  ;;  %v938_v42 = vld [vmem:[%s7051_s7 + $0x88] sm:$0xff]  ;;  %v3495_v31 = vld [vmem:[%s7051_s7 + $0x290] sm:$0xff] }
 0x102   :  { %v3933_v45 = vpop.eup %3932  ;;  %3944 = vtanh.f32 %v689_v43  ;;  %v3437_v43 = vld [vmem:[%s7051_s7 + $0x150] sm:$0xf] }
 0x103   :  { %v3935_v46 = vpop.eup %3934  ;;  %3946 = vtanh.f32 %v690_v44  ;;  %3401 = vmatpush.msk.msra.mxu2 %vm602_vm4, %v3933_v45  ;;  %v3438_v44 = vld [vmem:[%s7051_s7 + $0x158] sm:$0xf]  ;;  %3439 = vmatpush.msk.msra.mxu0 %vm602_vm4, %v3437_v43  ;;  %v3491_v43 = vld [vmem:[%s7051_s7 + $0x270] sm:$0xff] }
 0x104   :  { %v3937_v49 = vpop.eup %3936  ;;  %3404 = vmatpush.msk.msra.mxu3 %vm602_vm4, %v3935_v46  ;;  %3442 = vmatpush.msk.msra.mxu1 %vm602_vm4, %v3438_v44  ;;  %v3492_v44 = vld [vmem:[%s7051_s7 + $0x278] sm:$0xff] }
 0x105   :  { %v3939_v50 = vpop.eup %3938  ;;  %731 = vmatpush.msra.mxu2 %v3937_v49 }
 0x106   :  { %v3941_v52 = vpop.eup %3940  ;;  %754 = vmatpush.msra.mxu3 %v3939_v50 }
 0x107   :  { %v3943_v54 = vpop.eup %3942  ;;  %732 = vmatpush.msra.mxu2 %v3941_v52 }
 0x108   :  { %v3945_v56 = vpop.eup %3944  ;;  %755 = vmatpush.msra.mxu3 %v3943_v54 }
 0x109   :  { %v3947_v38 = vpop.eup %3946  ;;  %733 = vmatpush.msra.mxu2 %v3945_v56 }
 0x10a   :  { %756 = vmatpush.msra.mxu3 %v3947_v38  ;;  %3402 = vmatmul.msk.f32.vlgmr.msra.gmra.mxu2 %vm705_vm5, %v59_v55 }
 0x10b   :  { %3405 = vmatmul.msk.f32.vlgmr.msra.gmra.mxu3 %vm705_vm5, %v59_v55  ;;  %3407 = vmatpush.msk.msrb.mxu2 %vm602_vm4, %v3933_v45  ;;  %v3435_v45 = vld [vmem:[%s7051_s7 + $0x140] sm:$0xff]  ;;  %v934_v55 = vld [vmem:[%s7051_s7 + $0x68] sm:$0xff] }
 0x10c   :  { %3410 = vmatpush.msk.msrb.mxu3 %vm602_vm4, %v3935_v46  ;;  %v3436_v46 = vld [vmem:[%s7051_s7 + $0x148] sm:$0xff]  ;;  %988 = vmatpush.msra.mxu0 %v3435_v45  ;;  %v3467_v45 = vld [vmem:[%s7051_s7 + $0x1e0] sm:$0xff] }
 0x10d   :  { %783 = vmatpush.msrb.mxu2 %v3937_v49  ;;  %v936_v49 = vld [vmem:[%s7051_s7 + $0x78] sm:$0xff]  ;;  %1011 = vmatpush.msra.mxu1 %v3436_v46  ;;  %v3468_v46 = vld [vmem:[%s7051_s7 + $0x1e8] sm:$0xff] }
 0x10e   :  { %806 = vmatpush.msrb.mxu3 %v3939_v50  ;;  %989 = vmatpush.msra.mxu0 %v3433_v51  ;;  %v3487_v51 = vld [vmem:[%s7051_s7 + $0x250] sm:$0xff] }
 0x10f   :  { %784 = vmatpush.msrb.mxu2 %v3941_v52  ;;  %v3434_v52 = vld [vmem:[%s7051_s7 + $0x138] sm:$0xff] }
 0x110   :  { %807 = vmatpush.msrb.mxu3 %v3943_v54  ;;  %v933_v54 = vld [vmem:[%s7051_s7 + $0x60] sm:$0xff]  ;;  %1012 = vmatpush.msra.mxu1 %v3434_v52  ;;  %v3488_v52 = vld [vmem:[%s7051_s7 + $0x258] sm:$0xff] }
 0x111   :  { %785 = vmatpush.msrb.mxu2 %v3945_v56  ;;  %v3431_v56 = vld [vmem:[%s7051_s7 + $0x120] sm:$0xff] }
 0x112   :  { %808 = vmatpush.msrb.mxu3 %v3947_v38  ;;  %3403 = vmatmul.msk.f32.gmra.mxu2 %vm705_vm5, %v60_v59  ;;  %v3432_v38 = vld [vmem:[%s7051_s7 + $0x128] sm:$0xff] }
 0x113   :  { %3406 = vmatmul.msk.f32.gmra.mxu3 %vm705_vm5, %v60_v59  ;;  %873 = vmatpush.msra.mxu2 %v99_v60  ;;  %v3430_v59 = vld [vmem:[%s7051_s7 + $0x118] sm:$0xff]  ;;  %v929_v60 = vld [vmem:[%s7051_s7 + $0x40] sm:$0xff] }
 0x114   :  { %907 = vmatpush.msra.mxu3 %v104_v16  ;;  %990 = vmatpush.msra.mxu0 %v3431_v56  ;;  %v924_v16 = vld [vmem:[%s7051_s7 + $0x18] sm:$0xff]  ;;  %v3485_v56 = vld [vmem:[%s7051_s7 + $0x240] sm:$0xff] }
 0x115   :  { %874 = vmatpush.msra.mxu2 %v98_v61  ;;  %1013 = vmatpush.msra.mxu1 %v3432_v38  ;;  %v930_v61 = vld [vmem:[%s7051_s7 + $0x48] sm:$0xff] }
 0x116   :  { %908 = vmatpush.msra.mxu3 %v103_v20  ;;  %991 = vmatpush.msra.mxu0 %v3429_v58  ;;  %v922_v20 = vld [vmem:[%s7051_s7 + $0x8] sm:$0xff]  ;;  %v3483_v58 = vld [vmem:[%s7051_s7 + $0x230] sm:$0xff] }
 0x117   :  { %875 = vmatpush.msra.mxu2 %v97_v62  ;;  %1014 = vmatpush.msra.mxu1 %v3430_v59  ;;  %v3486_v38 = vld [vmem:[%s7051_s7 + $0x248] sm:$0xff]  ;;  %v3484_v59 = vld [vmem:[%s7051_s7 + $0x238] sm:$0xff] }
 0x118   :  { %909 = vmatpush.msra.mxu3 %v102_v26  ;;  %992 = vmatpush.msra.mxu0 %v3427_v10  ;;  %v3422_v26 = vld [vmem:[%s7051_s7 + $0xd8] sm:$0xff] }
 0x119   :  { %876 = vmatpush.msra.mxu2 %v96_v63  ;;  %v927_v63 = vld [vmem:[%s7051_s7 + $0x30] sm:$0xff] }
 0x11a   :  { %3408 = vmatmul.msk.f32.vlgmr.msrb.gmra.mxu2 %vm705_vm5, %v61_v0  ;;  %910 = vmatpush.msra.mxu3 %v101_v30  ;;  %v3420_v30 = vld [vmem:[%s7051_s7 + $0xc8] sm:$0xff] }
 0x11b   :  { %3411 = vmatmul.msk.f32.vlgmr.msrb.gmra.mxu3 %vm705_vm5, %v61_v0  ;;  %877 = vmatpush.msra.mxu2 %v95_v53  ;;  %v928_v0 = vld [vmem:[%s7051_s7 + $0x38] sm:$0xff] }
 0x11c   :  { %911 = vmatpush.msra.mxu3 %v100_v34  ;;  %993 = vmatpush.msra.mxu0 %v3425_v13  ;;  %v3418_v34 = vld [vmem:[%s7051_s7 + $0xb8] sm:$0xff] }
 0x11d   :  { %878 = vmatpush.msra.mxu2 %v94_v1 }
 0x11e   :  { %3445 = vmatpush.msk.msrb.mxu3 %vm602_vm4, %v941_v35  ;;  %994 = vmatpush.msra.mxu0 %v3423_v17  ;;  %v3471_v35 = vld [vmem:[%s7051_s7 + $0x200] sm:$0xf] }
 0x11f   :  { %879 = vmatpush.msra.mxu2 %v93_v5 }
 0x120   :  { %1044 = vmatpush.msrb.mxu3 %v939_v37  ;;  %v3493_v37 = vld [vmem:[%s7051_s7 + $0x280] sm:$0xff] }
 0x121   :  { %880 = vmatpush.msra.mxu2 %v92_v7 }
 0x122   :  { %3409 = vmatmul.msk.f32.gmra.mxu2 %vm705_vm5, %v62_v2  ;;  %1045 = vmatpush.msrb.mxu3 %v937_v41  ;;  %v3469_v41 = vld [vmem:[%s7051_s7 + $0x1f0] sm:$0xff] }
 0x123   :  { %3412 = vmatmul.msk.f32.gmra.mxu3 %vm705_vm5, %v62_v2  ;;  %881 = vmatpush.msra.mxu2 %v91_v9 }
 0x124   :  { %1046 = vmatpush.msrb.mxu3 %v935_v48  ;;  %v3490_v48 = vld [vmem:[%s7051_s7 + $0x268] sm:$0xff] }
 0x125   :  { %882 = vmatpush.msra.mxu2 %v90_v11  ;;  %v3428_v11 = vld [vmem:[%s7051_s7 + $0x108] sm:$0xff] }
 0x126   :  { %1047 = vmatpush.msrb.mxu3 %v933_v54  ;;  %1015 = vmatpush.msra.mxu1 %v3428_v11  ;;  %v3463_v54 = vld [vmem:[%s7051_s7 + $0x1c0] sm:$0xff] }
 0x127   :  { %883 = vmatpush.msra.mxu2 %v89_v4  ;;  %v926_v4 = vld [vmem:[%s7051_s7 + $0x28] sm:$0xff] }
 0x128   :  { %1048 = vmatpush.msrb.mxu3 %v931_v39  ;;  %1016 = vmatpush.msra.mxu1 %v3426_v14  ;;  %v3461_v39 = vld [vmem:[%s7051_s7 + $0x1b0] sm:$0xff] }
 0x129   :  { %884 = vmatpush.msra.mxu2 %v88_v15  ;;  %v923_v15 = vld [vmem:[%s7051_s7 + $0x10] sm:$0xff] }
 0x12a   :  { %1049 = vmatpush.msrb.mxu3 %v929_v60  ;;  %1017 = vmatpush.msra.mxu1 %v3424_v18  ;;  %v3459_v60 = vld [vmem:[%s7051_s7 + $0x1a0] sm:$0xff] }
 0x12b   :  { %885 = vmatpush.msra.mxu2 %v87_v19  ;;  %v921_v19 = vld [vmem:[%s7051_s7] sm:$0xff] }
 0x12c   :  { %1050 = vmatpush.msrb.mxu3 %v927_v63  ;;  %1018 = vmatpush.msra.mxu1 %v3422_v26  ;;  %v3482_v63 = vld [vmem:[%s7051_s7 + $0x228] sm:$0xff] }
 0x12d   :  { %886 = vmatpush.msra.mxu2 %v86_v25  ;;  %v3421_v25 = vld [vmem:[%s7051_s7 + $0xd0] sm:$0xff] }
 0x12e   :  { %1051 = vmatpush.msrb.mxu3 %v925_v12  ;;  %995 = vmatpush.msra.mxu0 %v3421_v25 }
 0x12f   :  { %887 = vmatpush.msra.mxu2 %v85_v29  ;;  %v3419_v29 = vld [vmem:[%s7051_s7 + $0xc0] sm:$0xff]  ;;  %1019 = vmatpush.msra.mxu1 %v3420_v30 }
 0x130   :  { %1052 = vmatpush.msrb.mxu3 %v923_v15  ;;  %996 = vmatpush.msra.mxu0 %v3419_v29 }
 0x131   :  { %888 = vmatpush.msra.mxu2 %v84_v33  ;;  %v3417_v33 = vld [vmem:[%s7051_s7 + $0xb0] sm:$0xff]  ;;  %1020 = vmatpush.msra.mxu1 %v3418_v34  ;;  %v3523_v34 = vld [vmem:[%s7051_s7 + $0x340] sm:$0xff] }
 0x132   :  { %1053 = vmatpush.msrb.mxu3 %v921_v19  ;;  %997 = vmatpush.msra.mxu0 %v3417_v33 }
 0x133   :  { %3448 = vmatpush.msk.msrb.mxu2 %vm602_vm4, %v942_v36  ;;  %v3472_v36 = vld [vmem:[%s7051_s7 + $0x208] sm:$0xf] }
 0x135   :  { %1067 = vmatpush.msrb.mxu2 %v940_v40  ;;  %v3494_v40 = vld [vmem:[%s7051_s7 + $0x288] sm:$0xff] }
 0x137   :  { %1068 = vmatpush.msrb.mxu2 %v938_v42  ;;  %v3470_v42 = vld [vmem:[%s7051_s7 + $0x1f8] sm:$0xff] }
 0x139   :  { %1069 = vmatpush.msrb.mxu2 %v936_v49  ;;  %v3465_v49 = vld [vmem:[%s7051_s7 + $0x1d0] sm:$0xff] }
 0x13b   :  { %1070 = vmatpush.msrb.mxu2 %v934_v55  ;;  %v3464_v55 = vld [vmem:[%s7051_s7 + $0x1c8] sm:$0xff] }
 0x13d   :  { %1071 = vmatpush.msrb.mxu2 %v932_v57  ;;  %v3462_v57 = vld [vmem:[%s7051_s7 + $0x1b8] sm:$0xff] }
 0x13f   :  { %1072 = vmatpush.msrb.mxu2 %v930_v61  ;;  %v3460_v61 = vld [vmem:[%s7051_s7 + $0x1a8] sm:$0xff] }
 0x141   :  { %1073 = vmatpush.msrb.mxu2 %v928_v0  ;;  %v3457_v0 = vld [vmem:[%s7051_s7 + $0x190] sm:$0xff] }
 0x143   :  { %1074 = vmatpush.msrb.mxu2 %v926_v4 }
 0x145   :  { %1075 = vmatpush.msrb.mxu2 %v924_v16 }
 0x147   :  { %1076 = vmatpush.msrb.mxu2 %v922_v20 }
 0x18d   :  { %v735_v47 = vpop.f32.mrf.mxu2 }
 0x18e   :  { %v758_v50 = vpop.f32.mrf.mxu3 }
 0x195   :  { %v738_v62 = vpop.f32.mrf.mxu2 }
 0x196   :  { %v761_v53 = vpop.f32.mrf.mxu3 }
 0x19d   :  { %v787_v1 = vpop.f32.mrf.mxu2 }
 0x19e   :  { %v816_v2 = vmax.f32 %v735_v47, %v787_v1  ;;  %v810_v3 = vpop.f32.mrf.mxu3  ;;  %v3489_v47 = vld [vmem:[%s7051_s7 + $0x260] sm:$0xff]  ;;  %v3479_v1 = vld [vmem:[%s7051_s7 + $0x210] sm:$0xff] }
 0x19f   :  { %v817_v5 = vmax.f32 %v758_v50, %v810_v3  ;;  %v3466_v50 = vld [vmem:[%s7051_s7 + $0x1d8] sm:$0xff]  ;;  %v3455_v3 = vld [vmem:[%s7051_s7 + $0x180] sm:$0xff] }
 0x1a0   :  { %843 = vmatmul.f32.vlgmr.msrb.gmra.mxu0 %v816_v2  ;;  %889 = vmatmul.f32.vlgmr.msra.gmra.mxu2 %v816_v2  ;;  %v3480_v2 = vld [vmem:[%s7051_s7 + $0x218] sm:$0xff] }
 0x1a1   :  { %3413 = vmatmul.msk.f32.vlgmr.msrb.gmra.mxu1 %vm820_vm6, %v817_v5  ;;  %3415 = vmatmul.msk.f32.vlgmr.msra.gmra.mxu3 %vm820_vm6, %v817_v5  ;;  %v3456_v5 = vld [vmem:[%s7051_s7 + $0x188] sm:$0xff] }
 0x1a2   :  { %3501 = vmatpush.msk.msra.mxu3 %vm602_vm4, %v3499_v21  ;;  %3504 = vmatpush.msk.msra.mxu2 %vm602_vm4, %v3500_v24 }
 0x1a3   :  { %3473 = vmatpush.msk.msrb.mxu0 %vm602_vm4, %v3471_v35  ;;  %3476 = vmatpush.msk.msrb.mxu1 %vm602_vm4, %v3472_v36  ;;  %v3524_v35 = vld [vmem:[%s7051_s7 + $0x348] sm:$0xff] }
 0x1a4   :  { %1212 = vmatpush.msra.mxu3 %v3497_v27  ;;  %1235 = vmatpush.msra.mxu2 %v3498_v28  ;;  %v3527_v27 = vld [vmem:[%s7051_s7 + $0x360] sm:$0xf]  ;;  %v3528_v28 = vld [vmem:[%s7051_s7 + $0x368] sm:$0xf] }
 0x1a5   :  { %v790_v6 = vpop.f32.mrf.mxu2  ;;  %1126 = vmatpush.msrb.mxu0 %v3469_v41  ;;  %1149 = vmatpush.msrb.mxu1 %v3470_v42  ;;  %v3519_v41 = vld [vmem:[%s7051_s7 + $0x320] sm:$0xff]  ;;  %v3520_v42 = vld [vmem:[%s7051_s7 + $0x328] sm:$0xff] }
 0x1a6   :  { %v813_v7 = vpop.f32.mrf.mxu3  ;;  %v818_v8 = vmax.f32 %v738_v62, %v790_v6  ;;  %1213 = vmatpush.msra.mxu3 %v3495_v31  ;;  %1236 = vmatpush.msra.mxu2 %v3496_v32  ;;  %v3481_v62 = vld [vmem:[%s7051_s7 + $0x220] sm:$0xff]  ;;  %v3453_v6 = vld [vmem:[%s7051_s7 + $0x170] sm:$0xff]  ;;  %v3526_v32 = vld [vmem:[%s7051_s7 + $0x358] sm:$0xff] }
 0x1a7   :  { %v819_v9 = vmax.f32 %v761_v53, %v813_v7  ;;  %1127 = vmatpush.msrb.mxu0 %v3467_v45  ;;  %1150 = vmatpush.msrb.mxu1 %v3468_v46  ;;  %v3458_v53 = vld [vmem:[%s7051_s7 + $0x198] sm:$0xff]  ;;  %v3525_v31 = vld [vmem:[%s7051_s7 + $0x350] sm:$0xff] }
 0x1a8   :  { %846 = vmatmul.f32.gmra.mxu0 %v818_v8  ;;  %892 = vmatmul.f32.gmra.mxu2 %v818_v8  ;;  %v3454_v7 = vld [vmem:[%s7051_s7 + $0x178] sm:$0xff]  ;;  %v3451_v8 = vld [vmem:[%s7051_s7 + $0x160] sm:$0xff] }
 0x1a9   :  { %3414 = vmatmul.msk.f32.gmra.mxu1 %vm820_vm6, %v819_v9  ;;  %3416 = vmatmul.msk.f32.gmra.mxu3 %vm820_vm6, %v819_v9  ;;  %v3452_v9 = vld [vmem:[%s7051_s7 + $0x168] sm:$0xff]  ;;  %v3518_v45 = vld [vmem:[%s7051_s7 + $0x318] sm:$0xff] }
 0x1aa   :  { %1214 = vmatpush.msra.mxu3 %v3493_v37  ;;  %1237 = vmatpush.msra.mxu2 %v3494_v40  ;;  %v3521_v37 = vld [vmem:[%s7051_s7 + $0x330] sm:$0xff]  ;;  %v3522_v40 = vld [vmem:[%s7051_s7 + $0x338] sm:$0xff] }
 0x1ab   :  { %1128 = vmatpush.msrb.mxu0 %v3465_v49  ;;  %1151 = vmatpush.msrb.mxu1 %v3466_v50  ;;  %v3513_v50 = vld [vmem:[%s7051_s7 + $0x2f0] sm:$0xff] }
 0x1ac   :  { %1215 = vmatpush.msra.mxu3 %v3491_v43  ;;  %1238 = vmatpush.msra.mxu2 %v3492_v44  ;;  %v3517_v44 = vld [vmem:[%s7051_s7 + $0x310] sm:$0xff] }
 0x1ad   :  { %1129 = vmatpush.msrb.mxu0 %v3463_v54  ;;  %1152 = vmatpush.msrb.mxu1 %v3464_v55  ;;  %v3512_v54 = vld [vmem:[%s7051_s7 + $0x2e8] sm:$0xff]  ;;  %v3509_v55 = vld [vmem:[%s7051_s7 + $0x2d0] sm:$0xff] }
 0x1ae   :  { %1216 = vmatpush.msra.mxu3 %v3489_v47  ;;  %1239 = vmatpush.msra.mxu2 %v3490_v48  ;;  %v3515_v47 = vld [vmem:[%s7051_s7 + $0x300] sm:$0xff]  ;;  %v3516_v48 = vld [vmem:[%s7051_s7 + $0x308] sm:$0xff] }
 0x1af   :  { %1130 = vmatpush.msrb.mxu0 %v3461_v39  ;;  %1153 = vmatpush.msrb.mxu1 %v3462_v57  ;;  %v3508_v39 = vld [vmem:[%s7051_s7 + $0x2c8] sm:$0xff] }
 0x1b0   :  { %1217 = vmatpush.msra.mxu3 %v3487_v51  ;;  %1240 = vmatpush.msra.mxu2 %v3488_v52  ;;  %v3514_v51 = vld [vmem:[%s7051_s7 + $0x2f8] sm:$0xff]  ;;  %v3511_v52 = vld [vmem:[%s7051_s7 + $0x2e0] sm:$0xff] }
 0x1b1   :  { %1131 = vmatpush.msrb.mxu0 %v3459_v60  ;;  %1154 = vmatpush.msrb.mxu1 %v3460_v61 }
 0x1b2   :  { %1218 = vmatpush.msra.mxu3 %v3485_v56  ;;  %1241 = vmatpush.msra.mxu2 %v3486_v38  ;;  %v3510_v56 = vld [vmem:[%s7051_s7 + $0x2d8] sm:$0xff]  ;;  %v3507_v38 = vld [vmem:[%s7051_s7 + $0x2c0] sm:$0xff] }
 0x1b3   :  { %1132 = vmatpush.msrb.mxu0 %v3457_v0  ;;  %1155 = vmatpush.msrb.mxu1 %v3458_v53 }
 0x1b4   :  { %1219 = vmatpush.msra.mxu3 %v3483_v58  ;;  %1242 = vmatpush.msra.mxu2 %v3484_v59 }
 0x1b5   :  { %1133 = vmatpush.msrb.mxu0 %v3455_v3  ;;  %1156 = vmatpush.msrb.mxu1 %v3456_v5 }
 0x1b6   :  { %1220 = vmatpush.msra.mxu3 %v3481_v62  ;;  %1243 = vmatpush.msra.mxu2 %v3482_v63 }
 0x1b7   :  { %1134 = vmatpush.msrb.mxu0 %v3453_v6  ;;  %1157 = vmatpush.msrb.mxu1 %v3454_v7 }
 0x1b8   :  { %1221 = vmatpush.msra.mxu3 %v3479_v1  ;;  %1244 = vmatpush.msra.mxu2 %v3480_v2 }
 0x1b9   :  { %1135 = vmatpush.msrb.mxu0 %v3451_v8  ;;  %1158 = vmatpush.msrb.mxu1 %v3452_v9 }
 0x21d   :  { %v844_v10 = vpop.f32.mrf.mxu0 }
 0x21e   :  { %v867_v11 = vpop.f32.mrf.mxu1 }
 0x21f   :  { %v868_v13 = vadd.f32 %v867_v11, %v844_v10 }
 0x223   :  { %v890_v12 = vpop.f32.mrf.mxu2 }
 0x224   :  { %v913_v4 = vpop.f32.mrf.mxu3 }
 0x225   :  { %v914_v14 = vadd.f32 %v913_v4, %v890_v12  ;;  %v847_v16 = vpop.f32.mrf.mxu0 }
 0x226   :  { %v870_v17 = vpop.f32.mrf.mxu1 }
 0x227   :  { %v5112_v15 = vmax.f32 %v868_v13, %v914_v14  ;;  %v871_v20 = vadd.f32 %v870_v17, %v847_v16 }
 0x229   :  { %3446 = vmatmul.msk.f32.vlgmr.msrb.gmra.mxu3 %vm971_vm7, %v5112_v15  ;;  %3449 = vmatmul.msk.f32.vlgmr.msrb.gmra.mxu2 %vm971_vm7, %v5112_v15  ;;  %v968_v25 = vrot.slane %v5112_v15, 1  ;;  %v1193_v33 = vrot.slane %v5112_v15, 3  ;;  %v1107_v46 = vrot.slane %v5112_v15, 2  ;;  %v1279_v58 = vrot.slane %v5112_v15, 4 }
 0x22b   :  { %v893_v18 = vpop.f32.mrf.mxu2 }
 0x22c   :  { %v916_v19 = vpop.f32.mrf.mxu3 }
 0x22d   :  { %v917_v21 = vadd.f32 %v916_v19, %v893_v18  ;;  %v58_v18 = vld [vmem:[%s7052_s8] sm:$0x3] }
 0x22f   :  { %v5118_v24 = vmax.f32 %v871_v20, %v917_v21 }
 0x231   :  { %3447 = vmatmul.msk.f32.gmra.mxu3 %vm971_vm7, %v5118_v24  ;;  %3450 = vmatmul.msk.f32.gmra.mxu2 %vm971_vm7, %v5118_v24  ;;  %v969_v26 = vrot.slane %v5118_v24, 1  ;;  %v1194_v30 = vrot.slane %v5118_v24, 3  ;;  %v1108_v43 = vrot.slane %v5118_v24, 2  ;;  %v1280_v57 = vrot.slane %v5118_v24, 4 }
 0x233   :  { %v970_v29 = vsel %vm222_vm0, %v968_v25, %v969_v26  ;;  %v1195_v36 = vsel %vm495_vm3, %v1193_v33, %v1194_v30  ;;  %v1109_v49 = vsel %vm388_vm2, %v1107_v46, %v1108_v43  ;;  %v1281_v59 = vsel %vm602_vm4, %v1279_v58, %v1280_v57  ;;  %v140_v58 = vld [vmem:[%s7056_s12 + $0x68] sm:$0xff] }
 0x234   :  { %3440 = vmatmul.msk.f32.vlgmr.msra.gmra.mxu0 %vm971_vm7, %v970_v29  ;;  %3443 = vmatmul.msk.f32.vlgmr.msra.gmra.mxu1 %vm971_vm7, %v970_v29  ;;  %v122_v29 = vld [vmem:[%s7055_s11 + $0x78] sm:$0xff] }
 0x235   :  { %3529 = vmatpush.msk.msra.mxu0 %vm602_vm4, %v3527_v27  ;;  %3532 = vmatpush.msk.msra.mxu1 %vm602_vm4, %v3528_v28 }
 0x237   :  { %1298 = vmatpush.msra.mxu0 %v3525_v31  ;;  %1321 = vmatpush.msra.mxu1 %v3526_v32 }
 0x239   :  { %3502 = vmatmul.msk.f32.vlgmr.msra.gmra.mxu3 %vm971_vm7, %v1195_v36  ;;  %3505 = vmatmul.msk.f32.vlgmr.msra.gmra.mxu2 %vm971_vm7, %v1195_v36  ;;  %v120_v36 = vld [vmem:[%s7055_s11 + $0x68] sm:$0xff] }
 0x23a   :  { %1299 = vmatpush.msra.mxu0 %v3523_v34  ;;  %1322 = vmatpush.msra.mxu1 %v3524_v35 }
 0x23c   :  { %3441 = vmatmul.msk.f32.gmra.mxu0 %vm971_vm7, %v969_v26  ;;  %3444 = vmatmul.msk.f32.gmra.mxu1 %vm971_vm7, %v969_v26  ;;  %v5223_v26 = vperm.slane %v58_v18, 0 }
 0x23d   :  { %1300 = vmatpush.msra.mxu0 %v3521_v37  ;;  %1323 = vmatpush.msra.mxu1 %v3522_v40 }
 0x23f   :  { %1301 = vmatpush.msra.mxu0 %v3519_v41  ;;  %1324 = vmatpush.msra.mxu1 %v3520_v42  ;;  %v5235_v41 = vperm.slane %v58_v18, 1  ;;  %v124_v18 = vld [vmem:[%s7055_s11 + $0x88] sm:$0xff] }
 0x241   :  { %3503 = vmatmul.msk.f32.gmra.mxu3 %vm971_vm7, %v1194_v30  ;;  %3506 = vmatmul.msk.f32.gmra.mxu2 %vm971_vm7, %v1194_v30  ;;  %v121_v30 = vld [vmem:[%s7055_s11 + $0x70] sm:$0xff] }
 0x242   :  { %1302 = vmatpush.msra.mxu0 %v3517_v44  ;;  %1325 = vmatpush.msra.mxu1 %v3518_v45  ;;  %v118_v45 = vld [vmem:[%s7055_s11 + $0x58] sm:$0xff] }
 0x244   :  { %3474 = vmatmul.msk.f32.vlgmr.msrb.gmra.mxu0 %vm971_vm7, %v1109_v49  ;;  %3477 = vmatmul.msk.f32.vlgmr.msrb.gmra.mxu1 %vm971_vm7, %v1109_v49 }
 0x245   :  { %1303 = vmatpush.msra.mxu0 %v3515_v47  ;;  %1326 = vmatpush.msra.mxu1 %v3516_v48  ;;  %v117_v47 = vld [vmem:[%s7055_s11 + $0x50] sm:$0xff]  ;;  %v116_v48 = vld [vmem:[%s7055_s11 + $0x48] sm:$0xff] }
 0x247   :  { %1304 = vmatpush.msra.mxu0 %v3513_v50  ;;  %1327 = vmatpush.msra.mxu1 %v3514_v51  ;;  %v105_v50 = vld [vmem:[%s7053_s9] sm:$0x1f] }
 0x248   :  { %v106_v51 = vld [vmem:[%s7054_s10] sm:$0x1f] }
 0x249   :  { %1305 = vmatpush.msra.mxu0 %v3511_v52  ;;  %1328 = vmatpush.msra.mxu1 %v3512_v54  ;;  %v142_v54 = vld [vmem:[%s7056_s12 + $0x78] sm:$0xff] }
 0x24b   :  { %1306 = vmatpush.msra.mxu0 %v3509_v55  ;;  %1329 = vmatpush.msra.mxu1 %v3510_v56  ;;  %v115_v55 = vld [vmem:[%s7055_s11 + $0x40] sm:$0xff] }
 0x24c   :  { %3475 = vmatmul.msk.f32.gmra.mxu0 %vm971_vm7, %v1108_v43  ;;  %3478 = vmatmul.msk.f32.gmra.mxu1 %vm971_vm7, %v1108_v43  ;;  %v119_v43 = vld [vmem:[%s7055_s11 + $0x60] sm:$0xff] }
 0x24d   :  { %1307 = vmatpush.msra.mxu0 %v3507_v38  ;;  %1330 = vmatpush.msra.mxu1 %v3508_v39  ;;  %v141_v38 = vld [vmem:[%s7056_s12 + $0x70] sm:$0xff]  ;;  %v114_v39 = vld [vmem:[%s7055_s11 + $0x38] sm:$0xff] }
 0x24f   :  { %1455 = vmatpush.msrb.mxu0 %v122_v29 }
 0x251   :  { %1456 = vmatpush.msrb.mxu0 %v121_v30 }
 0x253   :  { %1457 = vmatpush.msrb.mxu0 %v120_v36  ;;  %v3552_v36 = vld [vmem:[%s7057_s13 + $0x88] sm:$0xff] }
 0x254   :  { %3530 = vmatmul.msk.f32.vlgmr.msra.gmra.mxu0 %vm971_vm7, %v1281_v59  ;;  %3533 = vmatmul.msk.f32.vlgmr.msra.gmra.mxu1 %vm971_vm7, %v1281_v59  ;;  %v113_v59 = vld [vmem:[%s7055_s11 + $0x30] sm:$0xff] }
 0x255   :  { %1458 = vmatpush.msrb.mxu0 %v119_v43  ;;  %v3550_v43 = vld [vmem:[%s7057_s13 + $0x78] sm:$0xff] }
 0x257   :  { %1459 = vmatpush.msrb.mxu0 %v118_v45  ;;  %v3549_v45 = vld [vmem:[%s7057_s13 + $0x70] sm:$0xff] }
 0x259   :  { %1460 = vmatpush.msrb.mxu0 %v117_v47  ;;  %v3566_v47 = vld [vmem:[%s7057_s13 + $0xe8] sm:$0xff] }
 0x25b   :  { %1461 = vmatpush.msrb.mxu0 %v116_v48  ;;  %v3548_v48 = vld [vmem:[%s7057_s13 + $0x68] sm:$0xff] }
 0x25c   :  { %3531 = vmatmul.msk.f32.gmra.mxu0 %vm971_vm7, %v1280_v57  ;;  %3534 = vmatmul.msk.f32.gmra.mxu1 %vm971_vm7, %v1280_v57 }
 0x25d   :  { %1462 = vmatpush.msrb.mxu0 %v115_v55  ;;  %v3546_v55 = vld [vmem:[%s7057_s13 + $0x58] sm:$0xff] }
 0x25f   :  { %1463 = vmatpush.msrb.mxu0 %v114_v39  ;;  %v3588_v39 = vld [vmem:[%s7057_s13 + $0x188] sm:$0xff] }
 0x261   :  { %1464 = vmatpush.msrb.mxu0 %v113_v59  ;;  %v3577_v59 = vld [vmem:[%s7057_s13 + $0x138] sm:$0xff] }
 0x2ac   :  { %v1055_v62 = vpop.f32.mrf.mxu3  ;;  %v1078_v63 = vpop.f32.mrf.mxu2 }
 0x2b1   :  { %v999_v60 = vpop.f32.mrf.mxu0  ;;  %v1022_v61 = vpop.f32.mrf.mxu1 }
 0x2b2   :  { %v1056_v10 = vadd.f32 %v1055_v62, %v999_v60  ;;  %v1079_v15 = vadd.f32 %v1078_v63, %v1022_v61  ;;  %v139_v60 = vld [vmem:[%s7056_s12 + $0x60] sm:$0xff]  ;;  %v112_v61 = vld [vmem:[%s7055_s11 + $0x28] sm:$0xff]  ;;  %v138_v62 = vld [vmem:[%s7056_s12 + $0x58] sm:$0xff] }
 0x2b3   :  { %v111_v63 = vld [vmem:[%s7055_s11 + $0x20] sm:$0xff]  ;;  %1465 = vmatpush.msrb.mxu0 %v112_v61 }
 0x2b4   :  { %v1058_v3 = vpop.f32.mrf.mxu3  ;;  %v1081_v5 = vpop.f32.mrf.mxu2  ;;  %v3561_v61 = vld [vmem:[%s7057_s13 + $0xc0] sm:$0xff] }
 0x2b5   :  { %1466 = vmatpush.msrb.mxu0 %v111_v63  ;;  %v3586_v63 = vld [vmem:[%s7057_s13 + $0x178] sm:$0xff] }
 0x2b9   :  { %v1002_v0 = vpop.f32.mrf.mxu0  ;;  %v1025_v53 = vpop.f32.mrf.mxu1 }
 0x2ba   :  { %v1059_v4 = vadd.f32 %v1058_v3, %v1002_v0  ;;  %v1082_v13 = vadd.f32 %v1081_v5, %v1025_v53  ;;  %v137_v0 = vld [vmem:[%s7056_s12 + $0x50] sm:$0xff]  ;;  %v110_v53 = vld [vmem:[%s7055_s11 + $0x18] sm:$0xff]  ;;  %v135_v3 = vld [vmem:[%s7056_s12 + $0x40] sm:$0xff] }
 0x2bb   :  { %1467 = vmatpush.msrb.mxu0 %v110_v53  ;;  %v134_v5 = vld [vmem:[%s7056_s12 + $0x38] sm:$0xff]  ;;  %v3575_v53 = vld [vmem:[%s7057_s13 + $0x128] sm:$0xff] }
 0x2bc   :  { %v1223_v8 = vpop.f32.mrf.mxu3  ;;  %v1246_v9 = vpop.f32.mrf.mxu2 }
 0x2c1   :  { %v1137_v1 = vpop.f32.mrf.mxu0  ;;  %v1160_v2 = vpop.f32.mrf.mxu1 }
 0x2c2   :  { %v1166_v14 = vadd.f32 %v1137_v1, %v1056_v10  ;;  %v1167_v19 = vadd.f32 %v1160_v2, %v1079_v15  ;;  %v136_v1 = vld [vmem:[%s7056_s12 + $0x48] sm:$0xff]  ;;  %v109_v2 = vld [vmem:[%s7055_s11 + $0x10] sm:$0xff]  ;;  %v146_v15 = vld [vmem:[%s7056_s12 + $0x98] sm:$0xff] }
 0x2c3   :  { %1468 = vmatpush.msrb.mxu0 %v109_v2  ;;  %v129_v10 = vld [vmem:[%s7056_s12 + $0x10] sm:$0xff] }
 0x2c4   :  { %v1252_v20 = vadd.f32 %v1223_v8, %v1166_v14  ;;  %v1226_v21 = vpop.f32.mrf.mxu3  ;;  %v1249_v24 = vpop.f32.mrf.mxu2  ;;  %v1253_v33 = vadd.f32 %v1246_v9, %v1167_v19  ;;  %v131_v8 = vld [vmem:[%s7056_s12 + $0x20] sm:$0xff]  ;;  %v130_v9 = vld [vmem:[%s7056_s12 + $0x18] sm:$0xff]  ;;  %v144_v19 = vld [vmem:[%s7056_s12 + $0x88] sm:$0xff] }
 0x2c5   :  { %v126_v14 = vld [vmem:[%s7055_s11 + $0x98] sm:$0xff]  ;;  %v3559_v2 = vld [vmem:[%s7057_s13 + $0xb0] sm:$0xff] }
 0x2c6   :  { %1487 = vmatpush.msrb.mxu1 %v126_v14  ;;  %v3580_v14 = vld [vmem:[%s7057_s13 + $0x148] sm:$0xff] }
 0x2c9   :  { %v1140_v6 = vpop.f32.mrf.mxu0  ;;  %v1163_v7 = vpop.f32.mrf.mxu1 }
 0x2ca   :  { %v1168_v16 = vadd.f32 %v1140_v6, %v1059_v4  ;;  %v1169_v17 = vadd.f32 %v1163_v7, %v1082_v13  ;;  %v133_v6 = vld [vmem:[%s7056_s12 + $0x30] sm:$0xff]  ;;  %v132_v7 = vld [vmem:[%s7056_s12 + $0x28] sm:$0xff]  ;;  %v107_v4 = vld [vmem:[%s7055_s11] sm:$0xff] }
 0x2cb   :  { %v127_v13 = vld [vmem:[%s7056_s12] sm:$0xff] }
 0x2cc   :  { %v1254_v27 = vadd.f32 %v1226_v21, %v1168_v16  ;;  %v1255_v28 = vadd.f32 %v1249_v24, %v1169_v17  ;;  %v125_v16 = vld [vmem:[%s7055_s11 + $0x90] sm:$0xff]  ;;  %v143_v21 = vld [vmem:[%s7056_s12 + $0x80] sm:$0xff]  ;;  %v1545_v24 = vld [vmem:[%s7057_s13 + $0x48] sm:$0xff] }
 0x2cd   :  { %v145_v17 = vld [vmem:[%s7056_s12 + $0x90] sm:$0xff]  ;;  %1488 = vmatpush.msrb.mxu1 %v125_v16  ;;  %v3579_v16 = vld [vmem:[%s7057_s13 + $0x140] sm:$0xff] }
 0x2cf   :  { %1489 = vmatpush.msrb.mxu1 %v124_v18  ;;  %v3616_v18 = vld [vmem:[%s7066_s26 + $0x170] sm:$0xff] }
 0x2d1   :  { %v1309_v11 = vpop.f32.mrf.mxu0  ;;  %v1332_v12 = vpop.f32.mrf.mxu1 }
 0x2d2   :  { %v1338_v25 = vadd.f32 %v1309_v11, %v1252_v20  ;;  %v1339_v40 = vadd.f32 %v1332_v12, %v1253_v33  ;;  %v108_v11 = vld [vmem:[%s7055_s11 + $0x8] sm:$0xff]  ;;  %v123_v20 = vld [vmem:[%s7055_s11 + $0x80] sm:$0xff] }
 0x2d3   :  { %v128_v12 = vld [vmem:[%s7056_s12 + $0x8] sm:$0xff]  ;;  %1469 = vmatpush.msrb.mxu0 %v108_v11  ;;  %1490 = vmatpush.msrb.mxu1 %v123_v20  ;;  %v3582_v11 = vld [vmem:[%s7057_s13 + $0x158] sm:$0xff]  ;;  %v3612_v20 = vld [vmem:[%s7066_s26 + $0x150] sm:$0xff] }
 0x2d4   :  { %v1347_v37 = vadd.f32 %v5223_v26, %v1338_v25  ;;  %v1348_v46 = vadd.f32 %v5235_v41, %v1339_v40  ;;  %v3554_v25 = vld [vmem:[%s7057_s13 + $0x98] sm:$0xff]  ;;  %v3551_v40 = vld [vmem:[%s7057_s13 + $0x80] sm:$0xff] }
 0x2d5   :  { %1470 = vmatpush.msrb.mxu0 %v107_v4  ;;  %1568 = vmatpush.msra.mxu1 %v3554_v25  ;;  %v3581_v4 = vld [vmem:[%s7057_s13 + $0x150] sm:$0xff] }
 0x2d6   :  { %v3608_v25 = vld [vmem:[%s7066_s26 + $0x130] sm:$0xff] }
 0x2d7   :  { %1624 = vmatpush.msra.mxu0 %v3566_v47  ;;  %v3596_v47 = vld [vmem:[%s7066_s26 + $0xd0] sm:$0xff] }
 0x2d9   :  { %v1312_v31 = vpop.f32.mrf.mxu0  ;;  %v1335_v32 = vpop.f32.mrf.mxu1 }
 0x2da   :  { %v1340_v34 = vadd.f32 %v1312_v31, %v1254_v27  ;;  %v1341_v35 = vadd.f32 %v1335_v32, %v1255_v28  ;;  %v1544_v27 = vld [vmem:[%s7057_s13 + $0x40] sm:$0xff] }
 0x2dc   :  { %v1349_v42 = vadd.f32 %v5223_v26, %v1340_v34  ;;  %v1350_v44 = vadd.f32 %v5235_v41, %v1341_v35  ;;  %v3553_v34 = vld [vmem:[%s7057_s13 + $0x90] sm:$0xff]  ;;  %v1543_v35 = vld [vmem:[%s7057_s13 + $0x38] sm:$0xff] }
 0x2dd   :  { %1569 = vmatpush.msra.mxu1 %v3553_v34  ;;  %v159_v34 = vld [vmem:[%s7059_s15 + $0x50] sm:$0xff] }
 0x2de   :  { %3948 = vtanh.f32 %v1349_v42  ;;  %v1541_v42 = vld [vmem:[%s7057_s13 + $0x28] sm:$0xff] }
 0x2df   :  { %3950 = vtanh.f32 %v1347_v37  ;;  %v1542_v37 = vld [vmem:[%s7057_s13 + $0x30] sm:$0xff]  ;;  %1570 = vmatpush.msra.mxu1 %v3552_v36 }
 0x2e0   :  { %3952 = vtanh.f32 %v1350_v44  ;;  %v1540_v44 = vld [vmem:[%s7057_s13 + $0x20] sm:$0xff] }
 0x2e1   :  { %3954 = vtanh.f32 %v1348_v46  ;;  %1571 = vmatpush.msra.mxu1 %v3551_v40  ;;  %v1539_v46 = vld [vmem:[%s7057_s13 + $0x18] sm:$0xff]  ;;  %v3598_v40 = vld [vmem:[%s7066_s26 + $0xe0] sm:$0xff] }
 0x2e3   :  { %1572 = vmatpush.msra.mxu1 %v3550_v43 }
 0x2e4   :  { %v3949_v49 = vpop.eup %3948 }
 0x2e5   :  { %3535 = vmatpush.msk.msrb.mxu3 %vm1359_vm8, %v3949_v49  ;;  %3539 = vmatpush.msk.msrb.mxu2 %vm1359_vm8, %v3949_v49  ;;  %v3951_v52 = vpop.eup %3950  ;;  %v1538_v49 = vld [vmem:[%s7057_s13 + $0x10] sm:$0xff] }
 0x2e6   :  { %v3953_v56 = vpop.eup %3952  ;;  %1573 = vmatpush.msra.mxu1 %v3549_v45 }
 0x2e7   :  { %1381 = vmatpush.msrb.mxu3 %v3951_v52  ;;  %1424 = vmatpush.msrb.mxu2 %v3951_v52  ;;  %v3955_v57 = vpop.eup %3954  ;;  %v3547_v52 = vld [vmem:[%s7057_s13 + $0x60] sm:$0xff] }
 0x2e8   :  { %3536 = vmatmul.msk.f32.vlgmr.msrb.gmra.mxu3 %vm1355_vm9, %v105_v50  ;;  %3540 = vmatmul.msk.f32.vlgmr.msrb.gmra.mxu2 %vm1355_vm9, %v106_v51 }
 0x2e9   :  { %3537 = vmatpush.msk.msra.mxu3 %vm1359_vm8, %v3953_v56  ;;  %1495 = vmatpush.msra.mxu2 %v142_v54  ;;  %v1537_v54 = vld [vmem:[%s7057_s13 + $0x8] sm:$0xff] }
 0x2ea   :  { %1574 = vmatpush.msra.mxu1 %v3548_v48  ;;  %v157_v48 = vld [vmem:[%s7059_s15 + $0x40] sm:$0xff] }
 0x2eb   :  { %1401 = vmatpush.msra.mxu3 %v3955_v57  ;;  %1496 = vmatpush.msra.mxu2 %v141_v38  ;;  %v3563_v38 = vld [vmem:[%s7057_s13 + $0xd0] sm:$0xff] }
 0x2ec   :  { %1575 = vmatpush.msra.mxu1 %v3547_v52  ;;  %v1760_v52 = vld [vmem:[%s7066_s26 + $0xb0] sm:$0xff] }
 0x2ed   :  { %3541 = vmatpush.msk.msrb.mxu3 %vm1359_vm8, %v3953_v56  ;;  %1497 = vmatpush.msra.mxu2 %v140_v58  ;;  %v1536_v56 = vld [vmem:[%s7057_s13] sm:$0xff]  ;;  %v3562_v58 = vld [vmem:[%s7057_s13 + $0xc8] sm:$0xff] }
 0x2ee   :  { %1576 = vmatpush.msra.mxu1 %v3546_v55 }
 0x2ef   :  { %1444 = vmatpush.msrb.mxu3 %v3955_v57  ;;  %1498 = vmatpush.msra.mxu2 %v139_v60  ;;  %v3545_v57 = vld [vmem:[%s7057_s13 + $0x50] sm:$0xff]  ;;  %v3587_v60 = vld [vmem:[%s7057_s13 + $0x180] sm:$0xff] }
 0x2f0   :  { %3538 = vmatmul.msk.f32.vlgmr.msra.gmra.mxu3 %vm1355_vm9, %v105_v50  ;;  %v3565_v50 = vld [vmem:[%s7057_s13 + $0xe0] sm:$0xff]  ;;  %1577 = vmatpush.msra.mxu1 %v3545_v57  ;;  %v3656_v57 = vld [vmem:[%s7066_s26 + $0x230] sm:$0xff] }
 0x2f1   :  { %1499 = vmatpush.msra.mxu2 %v138_v62  ;;  %1527 = vmatpush.msra.mxu3 %v146_v15  ;;  %v3576_v62 = vld [vmem:[%s7057_s13 + $0x130] sm:$0xff]  ;;  %v3569_v15 = vld [vmem:[%s7057_s13 + $0xf8] sm:$0xff] }
 0x2f2   :  { %1625 = vmatpush.msra.mxu0 %v3565_v50 }
 0x2f3   :  { %1500 = vmatpush.msra.mxu2 %v137_v0  ;;  %1528 = vmatpush.msra.mxu3 %v145_v17  ;;  %v3560_v0 = vld [vmem:[%s7057_s13 + $0xb8] sm:$0xff]  ;;  %v3568_v17 = vld [vmem:[%s7057_s13 + $0xf0] sm:$0xff] }
 0x2f5   :  { %1501 = vmatpush.msra.mxu2 %v136_v1  ;;  %1529 = vmatpush.msra.mxu3 %v144_v19  ;;  %v3585_v1 = vld [vmem:[%s7057_s13 + $0x170] sm:$0xff]  ;;  %v3614_v19 = vld [vmem:[%s7066_s26 + $0x160] sm:$0xff] }
 0x2f7   :  { %1502 = vmatpush.msra.mxu2 %v135_v3  ;;  %1530 = vmatpush.msra.mxu3 %v143_v21  ;;  %v3574_v3 = vld [vmem:[%s7057_s13 + $0x120] sm:$0xff] }
 0x2f8   :  { %3542 = vmatmul.msk.f32.vlgmr.msrb.gmra.mxu3 %vm1355_vm9, %v106_v51  ;;  %v3564_v51 = vld [vmem:[%s7057_s13 + $0xd8] sm:$0xff]  ;;  %v3610_v21 = vld [vmem:[%s7066_s26 + $0x140] sm:$0xff] }
 0x2f9   :  { %1503 = vmatpush.msra.mxu2 %v134_v5  ;;  %1590 = vmatpush.msrb.mxu3 %v1545_v24  ;;  %v3584_v5 = vld [vmem:[%s7057_s13 + $0x168] sm:$0xff]  ;;  %v164_v24 = vld [vmem:[%s7059_s15 + $0x78] sm:$0xff] }
 0x2fa   :  { %1626 = vmatpush.msra.mxu0 %v3564_v51  ;;  %v3594_v51 = vld [vmem:[%s7066_s26 + $0xc0] sm:$0xff] }
 0x2fb   :  { %1504 = vmatpush.msra.mxu2 %v133_v6  ;;  %1591 = vmatpush.msrb.mxu3 %v1544_v27  ;;  %v3558_v6 = vld [vmem:[%s7057_s13 + $0xa8] sm:$0xff]  ;;  %v163_v27 = vld [vmem:[%s7059_s15 + $0x70] sm:$0xff] }
 0x2fc   :  { %1627 = vmatpush.msra.mxu0 %v3563_v38  ;;  %v5592_v38 = vld [vmem:[%s7067_s19 + $0x28] sm:$0xff] }
 0x2fd   :  { %1505 = vmatpush.msra.mxu2 %v132_v7  ;;  %1592 = vmatpush.msrb.mxu3 %v1543_v35  ;;  %v3573_v7 = vld [vmem:[%s7057_s13 + $0x118] sm:$0xff]  ;;  %v3600_v35 = vld [vmem:[%s7066_s26 + $0xf0] sm:$0xff] }
 0x2fe   :  { %1628 = vmatpush.msra.mxu0 %v3562_v58  ;;  %v3617_v58 = vld [vmem:[%s7066_s26 + $0x178] sm:$0xff] }
 0x2ff   :  { %1506 = vmatpush.msra.mxu2 %v131_v8  ;;  %1593 = vmatpush.msrb.mxu3 %v1542_v37  ;;  %v3583_v8 = vld [vmem:[%s7057_s13 + $0x160] sm:$0xff] }
 0x300   :  { %1629 = vmatpush.msra.mxu0 %v3561_v61  ;;  %v3654_v61 = vld [vmem:[%s7066_s26 + $0x220] sm:$0xff] }
 0x301   :  { %1507 = vmatpush.msra.mxu2 %v130_v9  ;;  %1594 = vmatpush.msrb.mxu3 %v1541_v42  ;;  %v3557_v9 = vld [vmem:[%s7057_s13 + $0xa0] sm:$0xff] }
 0x302   :  { %1630 = vmatpush.msra.mxu0 %v3560_v0  ;;  %v3615_v0 = vld [vmem:[%s7066_s26 + $0x168] sm:$0xff] }
 0x303   :  { %1508 = vmatpush.msra.mxu2 %v129_v10  ;;  %1595 = vmatpush.msrb.mxu3 %v1540_v44  ;;  %v3572_v10 = vld [vmem:[%s7057_s13 + $0x110] sm:$0xff]  ;;  %v158_v44 = vld [vmem:[%s7059_s15 + $0x48] sm:$0xff] }
 0x304   :  { %1631 = vmatpush.msra.mxu0 %v3559_v2  ;;  %v3652_v2 = vld [vmem:[%s7066_s26 + $0x210] sm:$0xff] }
 0x305   :  { %1509 = vmatpush.msra.mxu2 %v128_v12  ;;  %1596 = vmatpush.msrb.mxu3 %v1539_v46  ;;  %v3571_v12 = vld [vmem:[%s7057_s13 + $0x108] sm:$0xff] }
 0x306   :  { %1632 = vmatpush.msra.mxu0 %v3558_v6  ;;  %v1752_v6 = vld [vmem:[%s7066_s26 + $0x70] sm:$0xff] }
 0x307   :  { %1510 = vmatpush.msra.mxu2 %v127_v13  ;;  %1597 = vmatpush.msrb.mxu3 %v1538_v49  ;;  %v3570_v13 = vld [vmem:[%s7057_s13 + $0x100] sm:$0xff]  ;;  %v156_v49 = vld [vmem:[%s7059_s15 + $0x38] sm:$0xff] }
 0x308   :  { %1633 = vmatpush.msra.mxu0 %v3557_v9 }
 0x309   :  { %1598 = vmatpush.msrb.mxu3 %v1537_v54  ;;  %1711 = vmatpush.msrb.mxu2 %v164_v24  ;;  %v5586_v54 = vld [vmem:[%s7067_s19 + $0x20] sm:$0xff] }
 0x30b   :  { %1599 = vmatpush.msrb.mxu3 %v1536_v56  ;;  %1712 = vmatpush.msrb.mxu2 %v163_v27  ;;  %v5692_v27 = vld [vmem:[%s7067_s19 + $0x38] sm:$0xff] }
 0x36b   :  { %v1383_v28 = vpop.f32.mrf.mxu3  ;;  %v1426_v29 = vpop.f32.mrf.mxu2 }
 0x36c   :  { %v1449_v30 = vmax.f32 %v1383_v28, %v1426_v29  ;;  %v3606_v28 = vld [vmem:[%s7066_s26 + $0x120] sm:$0xff]  ;;  %v162_v29 = vld [vmem:[%s7059_s15 + $0x68] sm:$0xff] }
 0x36d   :  { %1713 = vmatpush.msrb.mxu2 %v162_v29  ;;  %v3640_v29 = vld [vmem:[%s7066_s26 + $0x1b0] sm:$0xff] }
 0x36e   :  { %1471 = vmatmul.f32.vlgmr.msrb.gmra.mxu0 %v1449_v30  ;;  %1511 = vmatmul.f32.vlgmr.msra.gmra.mxu2 %v1449_v30  ;;  %v161_v30 = vld [vmem:[%s7059_s15 + $0x60] sm:$0xff] }
 0x36f   :  { %1809 = vmatpush.msrb.mxu0 %v3616_v18  ;;  %1714 = vmatpush.msrb.mxu2 %v161_v30  ;;  %v3644_v18 = vld [vmem:[%s7066_s26 + $0x1d0] sm:$0xff]  ;;  %v3603_v30 = vld [vmem:[%s7066_s26 + $0x108] sm:$0xff] }
 0x371   :  { %1810 = vmatpush.msrb.mxu0 %v3614_v19  ;;  %v3607_v19 = vld [vmem:[%s7066_s26 + $0x128] sm:$0xff] }
 0x373   :  { %v1403_v31 = vpop.f32.mrf.mxu3  ;;  %1811 = vmatpush.msrb.mxu0 %v3612_v20  ;;  %v1744_v20 = vld [vmem:[%s7066_s26 + $0x30] sm:$0xff] }
 0x375   :  { %1812 = vmatpush.msrb.mxu0 %v3610_v21  ;;  %v3642_v21 = vld [vmem:[%s7066_s26 + $0x1c0] sm:$0xff] }
 0x377   :  { %1813 = vmatpush.msrb.mxu0 %v3608_v25  ;;  %v3605_v25 = vld [vmem:[%s7066_s26 + $0x118] sm:$0xff] }
 0x379   :  { %1814 = vmatpush.msrb.mxu0 %v3606_v28  ;;  %v1742_v28 = vld [vmem:[%s7066_s26 + $0x20] sm:$0xff] }
 0x37b   :  { %v1446_v32 = vpop.f32.mrf.mxu3 }
 0x37c   :  { %v1450_v33 = vmax.f32 %v1403_v31, %v1446_v32  ;;  %v3604_v31 = vld [vmem:[%s7066_s26 + $0x110] sm:$0xff]  ;;  %v160_v32 = vld [vmem:[%s7059_s15 + $0x58] sm:$0xff] }
 0x37d   :  { %1815 = vmatpush.msrb.mxu0 %v3604_v31  ;;  %1715 = vmatpush.msrb.mxu2 %v160_v32  ;;  %v1740_v31 = vld [vmem:[%s7066_s26 + $0x10] sm:$0xff]  ;;  %v3638_v32 = vld [vmem:[%s7066_s26 + $0x1a0] sm:$0xff] }
 0x37e   :  { %3543 = vmatmul.msk.f32.vlgmr.msrb.gmra.mxu1 %vm1451_vm10, %v1450_v33  ;;  %3544 = vmatmul.msk.f32.vlgmr.msra.gmra.mxu3 %vm1451_vm10, %v1450_v33  ;;  %v3602_v33 = vld [vmem:[%s7066_s26 + $0x100] sm:$0xff] }
 0x37f   :  { %1694 = vmatpush.msra.mxu3 %v3588_v39  ;;  %1659 = vmatpush.msrb.mxu1 %v3577_v59  ;;  %v1758_v39 = vld [vmem:[%s7066_s26 + $0xa0] sm:$0xff]  ;;  %v155_v59 = vld [vmem:[%s7059_s15 + $0x30] sm:$0xff] }
 0x380   :  { %1816 = vmatpush.msrb.mxu0 %v3602_v33  ;;  %1716 = vmatpush.msrb.mxu2 %v159_v34  ;;  %v5712_v33 = vrot.slane %v5692_v27, 1  ;;  %v1738_v34 = vld [vmem:[%s7066_s26] sm:$0xff] }
 0x381   :  { %1695 = vmatpush.msra.mxu3 %v3587_v60  ;;  %1660 = vmatpush.msrb.mxu1 %v3576_v62  ;;  %v1756_v60 = vld [vmem:[%s7066_s26 + $0x90] sm:$0xff]  ;;  %v1790_v62 = vrot.slane %v5586_v54, 1 }
 0x382   :  { %1817 = vmatpush.msrb.mxu0 %v3600_v35  ;;  %1717 = vmatpush.msrb.mxu2 %v158_v44  ;;  %v3688_v44 = vld [vmem:[%s7066_s26 + $0x2f0] sm:$0xff] }
 0x383   :  { %1696 = vmatpush.msra.mxu3 %v3586_v63  ;;  %1661 = vmatpush.msrb.mxu1 %v3575_v53  ;;  %v1791_v63 = vrot.slane %v5592_v38, 1  ;;  %v154_v53 = vld [vmem:[%s7059_s15 + $0x28] sm:$0xff] }
 0x384   :  { %1818 = vmatpush.msrb.mxu0 %v3598_v40  ;;  %1718 = vmatpush.msrb.mxu2 %v157_v48  ;;  %v1954_v40 = vrot.slane %v5592_v38, 2  ;;  %v3599_v48 = vld [vmem:[%s7066_s26 + $0xe8] sm:$0xff] }
 0x385   :  { %1697 = vmatpush.msra.mxu3 %v3585_v1  ;;  %1662 = vmatpush.msrb.mxu1 %v3574_v3  ;;  %v1754_v1 = vld [vmem:[%s7066_s26 + $0x80] sm:$0xff]  ;;  %v3613_v3 = vld [vmem:[%s7066_s26 + $0x158] sm:$0xff] }
 0x386   :  { %1819 = vmatpush.msrb.mxu0 %v3596_v47  ;;  %1719 = vmatpush.msrb.mxu2 %v156_v49  ;;  %v152_v47 = vld [vmem:[%s7059_s15 + $0x18] sm:$0xff]  ;;  %v3686_v49 = vld [vmem:[%s7066_s26 + $0x2e0] sm:$0xff] }
 0x387   :  { %1698 = vmatpush.msra.mxu3 %v3584_v5  ;;  %1663 = vmatpush.msrb.mxu1 %v3573_v7  ;;  %v3650_v7 = vld [vmem:[%s7066_s26 + $0x200] sm:$0xff] }
 0x388   :  { %1820 = vmatpush.msrb.mxu0 %v3594_v51  ;;  %1720 = vmatpush.msrb.mxu2 %v155_v59  ;;  %v151_v51 = vld [vmem:[%s7059_s15 + $0x10] sm:$0xff] }
 0x389   :  { %1699 = vmatpush.msra.mxu3 %v3583_v8  ;;  %1664 = vmatpush.msrb.mxu1 %v3572_v10  ;;  %v5638_v8 = vsel %vm222_vm0, %v1790_v62, %v1791_v63  ;;  %v5644_v10 = vld [vmem:[%s7067_s19 + $0x30] sm:$0xff]  ;;  %v1761_v62 = vld [vmem:[%s7066_s26 + $0xb8] sm:$0xff] }
 0x38a   :  { %1721 = vmatpush.msrb.mxu2 %v154_v53  ;;  %v3680_v59 = vld [vmem:[%s7066_s26 + $0x2b0] sm:$0xff]  ;;  %v5813_v53 = vld [vmem:[%s7066_s26 + $0x3a0] sm:$0xff] }
 0x38b   :  { %1700 = vmatpush.msra.mxu3 %v3582_v11  ;;  %1665 = vmatpush.msrb.mxu1 %v3571_v12  ;;  %v1750_v11 = vld [vmem:[%s7066_s26 + $0x60] sm:$0xff]  ;;  %v3648_v12 = vld [vmem:[%s7066_s26 + $0x1f0] sm:$0xff] }
 0x38d   :  { %1701 = vmatpush.msra.mxu3 %v3581_v4  ;;  %1666 = vmatpush.msrb.mxu1 %v3570_v13  ;;  %v3611_v4 = vld [vmem:[%s7066_s26 + $0x148] sm:$0xff]  ;;  %v1748_v13 = vld [vmem:[%s7066_s26 + $0x50] sm:$0xff] }
 0x38f   :  { %1702 = vmatpush.msra.mxu3 %v3580_v14  ;;  %1667 = vmatpush.msrb.mxu1 %v3569_v15  ;;  %v3646_v14 = vld [vmem:[%s7066_s26 + $0x1e0] sm:$0xff]  ;;  %v1793_v15 = vrot.slane %v5644_v10, 1 }
 0x391   :  { %1703 = vmatpush.msra.mxu3 %v3579_v16  ;;  %1668 = vmatpush.msrb.mxu1 %v3568_v17  ;;  %v3609_v16 = vld [vmem:[%s7066_s26 + $0x138] sm:$0xff]  ;;  %v1746_v17 = vld [vmem:[%s7066_s26 + $0x40] sm:$0xff]  ;;  %v5684_v24 = vsel %vm222_vm0, %v1791_v63, %v1793_v15  ;;  %v5719_v35 = vsel %vm222_vm0, %v1793_v15, %v5712_v33  ;;  %v1759_v63 = vld [vmem:[%s7066_s26 + $0xa8] sm:$0xff] }
 0x392   :  { %v5868_v15 = vld [vmem:[%s7066_s26 + $0x370] sm:$0xff] }
 0x3eb   :  { %v1472_v37 = vpop.f32.mrf.mxu0 }
 0x3f1   :  { %v1512_v42 = vpop.f32.mrf.mxu2 }
 0x3fb   :  { %v1492_v36 = vpop.f32.mrf.mxu1 }
 0x3fc   :  { %v1493_v45 = vadd.f32 %v1492_v36, %v1472_v37  ;;  %v3636_v36 = vld [vmem:[%s7066_s26 + $0x190] sm:$0xff]  ;;  %v1953_v37 = vrot.slane %v5586_v54, 2 }
 0x401   :  { %v1532_v43 = vpop.f32.mrf.mxu3 }
 0x402   :  { %v1533_v46 = vadd.f32 %v1532_v43, %v1512_v42  ;;  %v3634_v42 = vld [vmem:[%s7066_s26 + $0x180] sm:$0xff]  ;;  %v5742_v43 = vsel %vm388_vm2, %v1953_v37, %v1954_v40  ;;  %v3647_v37 = vld [vmem:[%s7066_s26 + $0x1e8] sm:$0xff] }
 0x404   :  { %v1535_v50 = vmax.f32 %v1493_v45, %v1533_v46  ;;  %v153_v45 = vld [vmem:[%s7059_s15 + $0x20] sm:$0xff]  ;;  %v3601_v46 = vld [vmem:[%s7066_s26 + $0xf8] sm:$0xff] }
 0x405   :  { %1722 = vmatpush.msrb.mxu2 %v153_v45  ;;  %v1739_v45 = vld [vmem:[%s7066_s26 + $0x8] sm:$0xff] }
 0x406   :  { %3556 = vmatmul.msk.f32.vlgmr.msrb.gmra.mxu3 %vm1559_vm11, %v1535_v50  ;;  %v1558_v55 = vrot.slane %v1535_v50, 1  ;;  %v1615_v56 = vrot.slane %v1535_v50, 2  ;;  %v1685_v5 = vrot.slane %v1535_v50, 4  ;;  %v1650_v9 = vrot.slane %v1535_v50, 3  ;;  %v3684_v50 = vld [vmem:[%s7066_s26 + $0x2d0] sm:$0xff] }
 0x407   :  { %1875 = vmatpush.msrb.mxu3 %v1760_v52  ;;  %1723 = vmatpush.msrb.mxu2 %v152_v47  ;;  %v1956_v52 = vrot.slane %v5644_v10, 2  ;;  %v5955_v47 = vld [vmem:[%s7066_s26 + $0x320] sm:$0xff] }
 0x408   :  { %3555 = vmatmul.msk.f32.vlgmr.msra.gmra.mxu1 %vm1559_vm11, %v1558_v55  ;;  %3567 = vmatmul.msk.f32.vlgmr.msra.gmra.mxu0 %vm1559_vm11, %v1615_v56  ;;  %v3597_v55 = vld [vmem:[%s7066_s26 + $0xd8] sm:$0xff]  ;;  %v150_v56 = vld [vmem:[%s7059_s15 + $0x8] sm:$0xff] }
 0x409   :  { %1876 = vmatpush.msrb.mxu3 %v1758_v39  ;;  %1972 = vmatpush.msra.mxu0 %v3656_v57  ;;  %v3595_v39 = vld [vmem:[%s7066_s26 + $0xc8] sm:$0xff]  ;;  %v3682_v57 = vld [vmem:[%s7066_s26 + $0x2c0] sm:$0xff] }
 0x40a   :  { %1838 = vmatpush.msra.mxu1 %v3617_v58  ;;  %1724 = vmatpush.msrb.mxu2 %v151_v51  ;;  %v5784_v58 = vsel %vm388_vm2, %v1954_v40, %v1956_v52 }
 0x40b   :  { %1877 = vmatpush.msrb.mxu3 %v1756_v60  ;;  %1973 = vmatpush.msra.mxu0 %v3654_v61  ;;  %v149_v60 = vld [vmem:[%s7059_s15] sm:$0xff]  ;;  %v5797_v61 = vld [vmem:[%s7066_s26 + $0x3b0] sm:$0xff] }
 0x40c   :  { %1839 = vmatpush.msra.mxu1 %v3615_v0  ;;  %1725 = vmatpush.msrb.mxu2 %v150_v56  ;;  %v3678_v0 = vld [vmem:[%s7066_s26 + $0x2a0] sm:$0xff]  ;;  %v3639_v56 = vld [vmem:[%s7066_s26 + $0x1a8] sm:$0xff] }
 0x40d   :  { %1878 = vmatpush.msrb.mxu3 %v1754_v1  ;;  %1974 = vmatpush.msra.mxu0 %v3652_v2  ;;  %v3676_v1 = vld [vmem:[%s7066_s26 + $0x290] sm:$0xff] }
 0x40e   :  { %3589 = vmatmul.msk.f32.vlgmr.msra.gmra.mxu3 %vm1559_vm11, %v1685_v5  ;;  %1840 = vmatpush.msra.mxu1 %v3613_v3  ;;  %v5822_v2 = vld [vmem:[%s7066_s26 + $0x390] sm:$0xff]  ;;  %v5825_v3 = vrot.slane %v5692_v27, 2  ;;  %v1757_v5 = vld [vmem:[%s7066_s26 + $0x98] sm:$0xff] }
 0x40f   :  { %1879 = vmatpush.msrb.mxu3 %v1752_v6  ;;  %1975 = vmatpush.msra.mxu0 %v3650_v7  ;;  %v3674_v6 = vld [vmem:[%s7066_s26 + $0x280] sm:$0xff] }
 0x410   :  { %3578 = vmatmul.msk.f32.vlgmr.msrb.gmra.mxu1 %vm1559_vm11, %v1650_v9  ;;  %3618 = vmatmul.msk.f32.vlgmr.msrb.gmra.mxu0 %vm230_vm1, %v5638_v8  ;;  %v5837_v7 = vld [vmem:[%s7066_s26 + $0x380] sm:$0xff]  ;;  %v5845_v9 = vsel %vm388_vm2, %v1956_v52, %v5825_v3  ;;  %v3641_v52 = vld [vmem:[%s7066_s26 + $0x1b8] sm:$0xff] }
 0x411   :  { %1880 = vmatpush.msrb.mxu3 %v1750_v11  ;;  %1976 = vmatpush.msra.mxu0 %v3648_v12  ;;  %v3672_v11 = vld [vmem:[%s7066_s26 + $0x270] sm:$0xff]  ;;  %v1753_v12 = vld [vmem:[%s7066_s26 + $0x78] sm:$0xff] }
 0x412   :  { %1841 = vmatpush.msra.mxu1 %v3611_v4  ;;  %1726 = vmatpush.msrb.mxu2 %v149_v60  ;;  %v3657_v4 = vld [vmem:[%s7066_s26 + $0x238] sm:$0xff] }
 0x413   :  { %1881 = vmatpush.msrb.mxu3 %v1748_v13  ;;  %1977 = vmatpush.msra.mxu0 %v3646_v14  ;;  %v1751_v13 = vld [vmem:[%s7066_s26 + $0x68] sm:$0xff] }
 0x414   :  { %1842 = vmatpush.msra.mxu1 %v3609_v16  ;;  %1904 = vmatpush.msra.mxu2 %v1761_v62  ;;  %v3655_v14 = vld [vmem:[%s7066_s26 + $0x228] sm:$0xff]  ;;  %v1749_v16 = vld [vmem:[%s7066_s26 + $0x58] sm:$0xff] }
 0x415   :  { %1882 = vmatpush.msrb.mxu3 %v1746_v17  ;;  %1978 = vmatpush.msra.mxu0 %v3644_v18  ;;  %v3653_v17 = vld [vmem:[%s7066_s26 + $0x218] sm:$0xff]  ;;  %v3670_v18 = vld [vmem:[%s7066_s26 + $0x260] sm:$0xff] }
 0x416   :  { %1843 = vmatpush.msra.mxu1 %v3607_v19  ;;  %1905 = vmatpush.msra.mxu2 %v1759_v63  ;;  %v5884_v19 = vld [vmem:[%s7066_s26 + $0x360] sm:$0xff]  ;;  %v3635_v63 = vld [vmem:[%s7066_s26 + $0x188] sm:$0xff] }
 0x417   :  { %1883 = vmatpush.msrb.mxu3 %v1744_v20  ;;  %1979 = vmatpush.msra.mxu0 %v3642_v21  ;;  %v3668_v20 = vld [vmem:[%s7066_s26 + $0x250] sm:$0xff]  ;;  %v1747_v21 = vld [vmem:[%s7066_s26 + $0x48] sm:$0xff] }
 0x418   :  { %3619 = vmatmul.msk.f32.gmra.mxu0 %vm230_vm1, %v5684_v24  ;;  %1844 = vmatpush.msra.mxu1 %v3605_v25  ;;  %v5899_v25 = vld [vmem:[%s7066_s26 + $0x350] sm:$0xff] }
 0x419   :  { %1884 = vmatpush.msrb.mxu3 %v1742_v28  ;;  %1980 = vmatpush.msra.mxu0 %v3640_v29  ;;  %v2058_v28 = vrot.slane %v5586_v54, 3  ;;  %v2059_v29 = vrot.slane %v5592_v38, 3 }
 0x41a   :  { %1845 = vmatpush.msra.mxu1 %v3603_v30  ;;  %1906 = vmatpush.msra.mxu2 %v1757_v5  ;;  %v3666_v30 = vld [vmem:[%s7066_s26 + $0x240] sm:$0xff] }
 0x41b   :  { %1885 = vmatpush.msrb.mxu3 %v1740_v31  ;;  %1981 = vmatpush.msra.mxu0 %v3638_v32  ;;  %v1745_v31 = vld [vmem:[%s7066_s26 + $0x38] sm:$0xff]  ;;  %v5928_v40 = vsel %vm495_vm3, %v2058_v28, %v2059_v29 }
 0x41c   :  { %1846 = vmatpush.msra.mxu1 %v3601_v46  ;;  %v3649_v32 = vld [vmem:[%s7066_s26 + $0x1f8] sm:$0xff]  ;;  %v3643_v46 = vld [vmem:[%s7066_s26 + $0x1c8] sm:$0xff] }
 0x41d   :  { %1886 = vmatpush.msrb.mxu3 %v1738_v34  ;;  %1982 = vmatpush.msra.mxu0 %v3636_v36  ;;  %v5916_v34 = vld [vmem:[%s7066_s26 + $0x340] sm:$0xff]  ;;  %v1743_v36 = vld [vmem:[%s7066_s26 + $0x28] sm:$0xff]  ;;  %v3689_v28 = vld [vmem:[%s7066_s26 + $0x2f8] sm:$0xff] }
 0x41e   :  { %3626 = vmatmul.msk.f32.vlgmr.msrb.gmra.mxu3 %vm230_vm1, %v5586_v54  ;;  %1847 = vmatpush.msra.mxu1 %v3599_v48  ;;  %v2061_v48 = vrot.slane %v5644_v10, 3 }
 0x41f   :  { %1983 = vmatpush.msra.mxu0 %v3634_v42  ;;  %2077 = vmatpush.msra.mxu3 %v3688_v44  ;;  %v3645_v42 = vld [vmem:[%s7066_s26 + $0x1d8] sm:$0xff]  ;;  %v5940_v44 = vld [vmem:[%s7066_s26 + $0x330] sm:$0xff] }
 0x420   :  { %3620 = vmatmul.msk.f32.gmra.mxu0 %vm230_vm1, %v5719_v35  ;;  %1848 = vmatpush.msra.mxu1 %v3597_v55  ;;  %v5967_v55 = vld [vmem:[%s7066_s26 + $0x310] sm:$0xff] }
 0x421   :  { %2078 = vmatpush.msra.mxu3 %v3686_v49  ;;  %2182 = vmatpush.msrb.mxu0 %v5797_v61  ;;  %v2163_v49 = vrot.slane %v5586_v54, 4 }
 0x422   :  { %1849 = vmatpush.msra.mxu1 %v3595_v39  ;;  %v5978_v39 = vld [vmem:[%s7066_s26 + $0x300] sm:$0xff] }
 0x423   :  { %2079 = vmatpush.msra.mxu3 %v3684_v50  ;;  %3622 = vmatmul.msk.f32.vlgmr.msra.gmra.mxu1 %vm230_vm1, %v5638_v8  ;;  %v1755_v8 = vld [vmem:[%s7066_s26 + $0x88] sm:$0xff]  ;;  %v2164_v50 = vrot.slane %v5592_v38, 4 }
 0x424   :  { %2183 = vmatpush.msrb.mxu0 %v5813_v53  ;;  %1907 = vmatpush.msra.mxu2 %v1755_v8 }
 0x425   :  { %2080 = vmatpush.msra.mxu3 %v3682_v57  ;;  %2001 = vmatpush.msrb.mxu1 %v3657_v4  ;;  %v5981_v57 = vsel %vm495_vm3, %v2059_v29, %v2061_v48 }
 0x426   :  { %3627 = vmatmul.msk.f32.gmra.mxu3 %vm230_vm1, %v5592_v38  ;;  %2184 = vmatpush.msrb.mxu0 %v5822_v2 }
 0x427   :  { %2081 = vmatpush.msra.mxu3 %v3680_v59  ;;  %1908 = vmatpush.msra.mxu2 %v1753_v12  ;;  %v5985_v59 = vsel %vm602_vm4, %v2163_v49, %v2164_v50  ;;  %v3701_v49 = vld [vmem:[%s7066_s26 + $0x318] sm:$0xff] }
 0x428   :  { %3621 = vmatmul.msk.f32.gmra.mxu0 %vm230_vm1, %v5712_v33  ;;  %2002 = vmatpush.msrb.mxu1 %v3655_v14 }
 0x429   :  { %2082 = vmatpush.msra.mxu3 %v3678_v0  ;;  %2185 = vmatpush.msrb.mxu0 %v5837_v7 }
 0x42a   :  { %1909 = vmatpush.msra.mxu2 %v1751_v13  ;;  %2003 = vmatpush.msrb.mxu1 %v3653_v17  ;;  %v147_v13 = vld [vmem:[%s7058_s14] sm:$0x1]  ;;  %v6019_v17 = vrot.slane %v5692_v27, 4 }
 0x42b   :  { %2083 = vmatpush.msra.mxu3 %v3676_v1  ;;  %3623 = vmatmul.msk.f32.gmra.mxu1 %vm230_vm1, %v5684_v24  ;;  %v3651_v24 = vld [vmem:[%s7066_s26 + $0x208] sm:$0xff]  ;;  %v5999_v1 = vrot.slane %v5692_v27, 3 }
 0x42c   :  { %2186 = vmatpush.msrb.mxu0 %v5868_v15  ;;  %1910 = vmatpush.msra.mxu2 %v1749_v16 }
 0x42d   :  { %2084 = vmatpush.msra.mxu3 %v3674_v6  ;;  %2004 = vmatpush.msrb.mxu1 %v3651_v24  ;;  %v2166_v6 = vrot.slane %v5644_v10, 4  ;;  %v3717_v24 = vld [vmem:[%s7066_s26 + $0x398] sm:$0xff] }
 0x42e   :  { %3628 = vmatmul.msk.f32.gmra.mxu3 %vm230_vm1, %v5644_v10  ;;  %2187 = vmatpush.msrb.mxu0 %v5884_v19 }
 0x42f   :  { %2085 = vmatpush.msra.mxu3 %v3672_v11  ;;  %1911 = vmatpush.msra.mxu2 %v1747_v21  ;;  %v6006_v11 = vsel %vm495_vm3, %v2061_v48, %v5999_v1  ;;  %v6009_v4 = vsel %vm602_vm4, %v2164_v50, %v2166_v6  ;;  %v6031_v21 = vsel %vm602_vm4, %v2166_v6, %v6019_v17  ;;  %v3703_v48 = vld [vmem:[%s7066_s26 + $0x328] sm:$0xff] }
 0x430   :  { %3658 = vmatmul.msk.f32.vlgmr.msra.gmra.mxu0 %vm230_vm1, %v5742_v43  ;;  %2005 = vmatpush.msrb.mxu1 %v3649_v32  ;;  %v3711_v32 = vld [vmem:[%s7066_s26 + $0x368] sm:$0xff] }
 0x431   :  { %2086 = vmatpush.msra.mxu3 %v3670_v18  ;;  %2188 = vmatpush.msrb.mxu0 %v5899_v25  ;;  %v3721_v18 = vld [vmem:[%s7066_s26 + $0x3b8] sm:$0xff]  ;;  %v3675_v50 = vld [vmem:[%s7066_s26 + $0x288] sm:$0xff] }
 0x432   :  { %1912 = vmatpush.msra.mxu2 %v1745_v31  ;;  %2006 = vmatpush.msrb.mxu1 %v3647_v37  ;;  %v3713_v31 = vld [vmem:[%s7066_s26 + $0x378] sm:$0xff] }
 0x433   :  { %2087 = vmatpush.msra.mxu3 %v3668_v20  ;;  %3624 = vmatmul.msk.f32.gmra.mxu1 %vm230_vm1, %v5719_v35  ;;  %v1741_v35 = vld [vmem:[%s7066_s26 + $0x18] sm:$0xff]  ;;  %v3719_v20 = vld [vmem:[%s7066_s26 + $0x3a8] sm:$0xff] }
 0x434   :  { %2189 = vmatpush.msrb.mxu0 %v5916_v34  ;;  %1913 = vmatpush.msra.mxu2 %v1743_v36  ;;  %v3685_v36 = vld [vmem:[%s7066_s26 + $0x2d8] sm:$0xff] }
 0x435   :  { %2088 = vmatpush.msra.mxu3 %v3666_v30  ;;  %2007 = vmatpush.msrb.mxu1 %v3645_v42  ;;  %v3687_v30 = vld [vmem:[%s7066_s26 + $0x2e8] sm:$0xff]  ;;  %v3709_v37 = vld [vmem:[%s7066_s26 + $0x358] sm:$0xff] }
 0x436   :  { %3629 = vmatmul.msk.f32.gmra.mxu3 %vm230_vm1, %v5692_v27  ;;  %1914 = vmatpush.msra.mxu2 %v1741_v35  ;;  %v3683_v35 = vld [vmem:[%s7066_s26 + $0x2c8] sm:$0xff]  ;;  %v3681_v42 = vld [vmem:[%s7066_s26 + $0x2b8] sm:$0xff] }
 0x437   :  { %2190 = vmatpush.msrb.mxu0 %v5940_v44  ;;  %2008 = vmatpush.msrb.mxu1 %v3643_v46  ;;  %v3705_v46 = vld [vmem:[%s7066_s26 + $0x338] sm:$0xff] }
 0x438   :  { %3659 = vmatmul.msk.f32.gmra.mxu0 %vm230_vm1, %v5784_v58  ;;  %1915 = vmatpush.msra.mxu2 %v1739_v45  ;;  %v3679_v45 = vld [vmem:[%s7066_s26 + $0x2a8] sm:$0xff] }
 0x439   :  { %2191 = vmatpush.msrb.mxu0 %v5955_v47  ;;  %2009 = vmatpush.msrb.mxu1 %v3641_v52  ;;  %v3671_v52 = vld [vmem:[%s7066_s26 + $0x268] sm:$0xff] }
 0x43b   :  { %3625 = vmatmul.msk.f32.gmra.mxu1 %vm230_vm1, %v5712_v33  ;;  %2192 = vmatpush.msrb.mxu0 %v5967_v55  ;;  %v3637_v33 = vld [vmem:[%s7066_s26 + $0x198] sm:$0xff] }
 0x43c   :  { %2010 = vmatpush.msrb.mxu1 %v3639_v56  ;;  %v3669_v56 = vld [vmem:[%s7066_s26 + $0x258] sm:$0xff] }
 0x43d   :  { %2193 = vmatpush.msrb.mxu0 %v5978_v39 }
 0x43e   :  { %3690 = vmatmul.msk.f32.vlgmr.msra.gmra.mxu3 %vm230_vm1, %v5928_v40  ;;  %2011 = vmatpush.msrb.mxu1 %v3637_v33  ;;  %v3984_v33 = vld [vmem:[%s7049_s5 + $0x78] sm:$0xff] }
 0x440   :  { %3660 = vmatmul.msk.f32.gmra.mxu0 %vm230_vm1, %v5845_v9  ;;  %2012 = vmatpush.msrb.mxu1 %v3635_v63  ;;  %v3988_v63 = vld [vmem:[%s7049_s5 + $0x58] sm:$0xff] }
 0x442   :  { %2211 = vmatpush.msra.mxu1 %v3721_v18 }
 0x443   :  { %3662 = vmatmul.msk.f32.vlgmr.msrb.gmra.mxu1 %vm230_vm1, %v5742_v43 }
 0x444   :  { %2212 = vmatpush.msra.mxu1 %v3719_v20 }
 0x446   :  { %3691 = vmatmul.msk.f32.gmra.mxu3 %vm230_vm1, %v5981_v57  ;;  %2213 = vmatpush.msra.mxu1 %v3717_v24 }
 0x448   :  { %3661 = vmatmul.msk.f32.gmra.mxu0 %vm230_vm1, %v5825_v3 }
 0x44b   :  { %3663 = vmatmul.msk.f32.gmra.mxu1 %vm230_vm1, %v5784_v58  ;;  %v3715_v58 = vld [vmem:[%s7066_s26 + $0x388] sm:$0xff] }
 0x44c   :  { %2214 = vmatpush.msra.mxu1 %v3715_v58 }
 0x44e   :  { %3692 = vmatmul.msk.f32.gmra.mxu3 %vm230_vm1, %v6006_v11  ;;  %2215 = vmatpush.msra.mxu1 %v3713_v31 }
 0x450   :  { %3722 = vmatmul.msk.f32.vlgmr.msrb.gmra.mxu0 %vm230_vm1, %v5985_v59  ;;  %2216 = vmatpush.msra.mxu1 %v3711_v32 }
 0x452   :  { %2217 = vmatpush.msra.mxu1 %v3709_v37 }
 0x453   :  { %3664 = vmatmul.msk.f32.gmra.mxu1 %vm230_vm1, %v5845_v9  ;;  %v3707_v9 = vld [vmem:[%s7066_s26 + $0x348] sm:$0xff] }
 0x454   :  { %2218 = vmatpush.msra.mxu1 %v3707_v9 }
 0x456   :  { %3693 = vmatmul.msk.f32.gmra.mxu3 %vm230_vm1, %v5999_v1  ;;  %2219 = vmatpush.msra.mxu1 %v3705_v46 }
 0x458   :  { %3723 = vmatmul.msk.f32.gmra.mxu0 %vm230_vm1, %v6009_v4  ;;  %2220 = vmatpush.msra.mxu1 %v3703_v48 }
 0x45a   :  { %2221 = vmatpush.msra.mxu1 %v3701_v49 }
 0x45b   :  { %3665 = vmatmul.msk.f32.gmra.mxu1 %vm230_vm1, %v5825_v3  ;;  %v3699_v3 = vld [vmem:[%s7066_s26 + $0x308] sm:$0xff] }
 0x45c   :  { %2222 = vmatpush.msra.mxu1 %v3699_v3 }
 0x45e   :  { %2368 = vmatpush.msrb.mxu1 %v3984_v33 }
 0x460   :  { %3724 = vmatmul.msk.f32.gmra.mxu0 %vm230_vm1, %v6031_v21 }
 0x463   :  { %3726 = vmatmul.msk.f32.vlgmr.msra.gmra.mxu1 %vm230_vm1, %v5985_v59  ;;  %v3986_v59 = vld [vmem:[%s7049_s5 + $0x68] sm:$0xff] }
 0x46b   :  { %3727 = vmatmul.msk.f32.gmra.mxu1 %vm230_vm1, %v6009_v4 }
 0x473   :  { %3728 = vmatmul.msk.f32.gmra.mxu1 %vm230_vm1, %v6031_v21 }
 0x47b   :  { %3729 = vmatmul.msk.f32.gmra.mxu1 %vm230_vm1, %v6019_v17 }
 0x485   :  { %v1579_v51 = vpop.f32.mrf.mxu1  ;;  %v1635_v0 = vpop.f32.mrf.mxu0 }
 0x489   :  { %v1601_v60 = vpop.f32.mrf.mxu3 }
 0x48a   :  { %v1602_v62 = vadd.f32 %v1601_v60, %v1579_v51  ;;  %v3673_v51 = vld [vmem:[%s7066_s26 + $0x278] sm:$0xff]  ;;  %v3985_v60 = vld [vmem:[%s7049_s5 + $0x70] sm:$0xff] }
 0x48b   :  { %2369 = vmatpush.msrb.mxu1 %v3985_v60 }
 0x48c   :  { %v1638_v5 = vadd.f32 %v1635_v0, %v1602_v62  ;;  %v3987_v62 = vld [vmem:[%s7049_s5 + $0x60] sm:$0xff] }
 0x48d   :  { %v1670_v8 = vpop.f32.mrf.mxu1  ;;  %2370 = vmatpush.msrb.mxu1 %v3986_v59 }
 0x48e   :  { %v1673_v12 = vadd.f32 %v1670_v8, %v1638_v5 }
 0x48f   :  { %2371 = vmatpush.msrb.mxu1 %v3987_v62 }
 0x491   :  { %v1705_v14 = vpop.f32.mrf.mxu3  ;;  %2372 = vmatpush.msrb.mxu1 %v3988_v63 }
 0x492   :  { %v1708_v16 = vadd.f32 %v1705_v14, %v1673_v12 }
 0x494   :  { %v1709_v43 = vadd.f32 %v1708_v16, %v147_v13 }
 0x496   :  { %3956 = vtanh.f32 %v1709_v43 }
 0x49c   :  { %v3957_v29 = vpop.eup %3956 }
 0x49d   :  { %1727 = vmatmul.f32.vlgmr.msrb.gmra.mxu2 %v3957_v29 }
 0x49e   :  { %2106 = vmatpush.msrb.mxu2 %v3689_v28 }
 0x4a0   :  { %2107 = vmatpush.msrb.mxu2 %v3687_v30 }
 0x4a1   :  { %v1888_v12 = vpop.f32.mrf.mxu3 }
 0x4a2   :  { %2108 = vmatpush.msrb.mxu2 %v3685_v36 }
 0x4a4   :  { %2109 = vmatpush.msrb.mxu2 %v3683_v35 }
 0x4a5   :  { %3630 = vmatmul.msk.f32.vlgmr.msra.gmra.mxu2 %vm230_vm1, %v5586_v54  ;;  %v3677_v54 = vld [vmem:[%s7066_s26 + $0x298] sm:$0xff] }
 0x4a6   :  { %2110 = vmatpush.msrb.mxu2 %v3681_v42 }
 0x4a8   :  { %2111 = vmatpush.msrb.mxu2 %v3679_v45 }
 0x4a9   :  { %v1891_v16 = vpop.f32.mrf.mxu3 }
 0x4aa   :  { %2112 = vmatpush.msrb.mxu2 %v3677_v54 }
 0x4ac   :  { %2113 = vmatpush.msrb.mxu2 %v3675_v50 }
 0x4ad   :  { %3631 = vmatmul.msk.f32.gmra.mxu2 %vm230_vm1, %v5592_v38  ;;  %v3667_v38 = vld [vmem:[%s7066_s26 + $0x248] sm:$0xff] }
 0x4ae   :  { %2114 = vmatpush.msrb.mxu2 %v3673_v51 }
 0x4b0   :  { %2115 = vmatpush.msrb.mxu2 %v3671_v52 }
 0x4b1   :  { %v1894_v21 = vpop.f32.mrf.mxu3 }
 0x4b2   :  { %2116 = vmatpush.msrb.mxu2 %v3669_v56 }
 0x4b4   :  { %2117 = vmatpush.msrb.mxu2 %v3667_v38 }
 0x4b5   :  { %3632 = vmatmul.msk.f32.gmra.mxu2 %vm230_vm1, %v5644_v10  ;;  %v3989_v10 = vld [vmem:[%s7049_s5 + $0x50] sm:$0xff] }
 0x4b6   :  { %3919 = vmatpush.msra.mxu2 %v5797_v61  ;;  %2373 = vmatpush.msrb.mxu1 %v3989_v10  ;;  %v3990_v61 = vld [vmem:[%s7049_s5 + $0x48] sm:$0xff] }
 0x4b8   :  { %3920 = vmatpush.msra.mxu2 %v5813_v53  ;;  %2374 = vmatpush.msrb.mxu1 %v3990_v61  ;;  %v3991_v53 = vld [vmem:[%s7049_s5 + $0x40] sm:$0xff] }
 0x4b9   :  { %v1897_v29 = vpop.f32.mrf.mxu3 }
 0x4ba   :  { %3921 = vmatpush.msra.mxu2 %v5822_v2  ;;  %2375 = vmatpush.msrb.mxu1 %v3991_v53  ;;  %v3992_v2 = vld [vmem:[%s7049_s5 + $0x38] sm:$0xff] }
 0x4bc   :  { %3922 = vmatpush.msra.mxu2 %v5837_v7  ;;  %2376 = vmatpush.msrb.mxu1 %v3992_v2  ;;  %v3994_v7 = vld [vmem:[%s7049_s5 + $0x28] sm:$0xff] }
 0x4bd   :  { %3633 = vmatmul.msk.f32.gmra.mxu2 %vm230_vm1, %v5692_v27  ;;  %v3993_v27 = vld [vmem:[%s7049_s5 + $0x30] sm:$0xff] }
 0x4be   :  { %3923 = vmatpush.msra.mxu2 %v5868_v15  ;;  %2377 = vmatpush.msrb.mxu1 %v3993_v27  ;;  %v3995_v15 = vld [vmem:[%s7049_s5 + $0x20] sm:$0xff] }
 0x4c0   :  { %3924 = vmatpush.msra.mxu2 %v5884_v19  ;;  %2378 = vmatpush.msrb.mxu1 %v3994_v7  ;;  %v3996_v19 = vld [vmem:[%s7049_s5 + $0x18] sm:$0xff] }
 0x4c1   :  { %v2090_v36 = vpop.f32.mrf.mxu3 }
 0x4c2   :  { %3925 = vmatpush.msra.mxu2 %v5899_v25  ;;  %2379 = vmatpush.msrb.mxu1 %v3995_v15  ;;  %v3997_v25 = vld [vmem:[%s7049_s5 + $0x10] sm:$0xff] }
 0x4c4   :  { %3926 = vmatpush.msra.mxu2 %v5916_v34  ;;  %2380 = vmatpush.msrb.mxu1 %v3996_v19  ;;  %v3998_v34 = vld [vmem:[%s7049_s5 + $0x8] sm:$0xff] }
 0x4c5   :  { %3694 = vmatmul.msk.f32.vlgmr.msrb.gmra.mxu2 %vm230_vm1, %v5928_v40  ;;  %v3999_v40 = vld [vmem:[%s7049_s5] sm:$0xff] }
 0x4c6   :  { %3927 = vmatpush.msra.mxu2 %v5940_v44  ;;  %2381 = vmatpush.msrb.mxu1 %v3997_v25  ;;  %v1851_v44 = vpop.f32.mrf.mxu1 }
 0x4c8   :  { %3928 = vmatpush.msra.mxu2 %v5955_v47  ;;  %2382 = vmatpush.msrb.mxu1 %v3998_v34 }
 0x4c9   :  { %v2093_v42 = vpop.f32.mrf.mxu3 }
 0x4ca   :  { %3929 = vmatpush.msra.mxu2 %v5967_v55  ;;  %2383 = vmatpush.msrb.mxu1 %v3999_v40  ;;  %v1822_v55 = vpop.f32.mrf.mxu0 }
 0x4cb   :  { %v1889_v62 = vadd.f32 %v1888_v12, %v1822_v55 }
 0x4cc   :  { %3930 = vmatpush.msra.mxu2 %v5978_v39 }
 0x4cd   :  { %3695 = vmatmul.msk.f32.gmra.mxu2 %vm230_vm1, %v5981_v57 }
 0x4ce   :  { %v1854_v47 = vpop.f32.mrf.mxu1 }
 0x4d1   :  { %v2096_v51 = vpop.f32.mrf.mxu3 }
 0x4d2   :  { %v1825_v0 = vpop.f32.mrf.mxu0 }
 0x4d3   :  { %v1892_v38 = vadd.f32 %v1891_v16, %v1825_v0 }
 0x4d5   :  { %3696 = vmatmul.msk.f32.gmra.mxu2 %vm230_vm1, %v6006_v11  ;;  %v148_v11 = vld [vmem:[%s7060_s16] sm:$0x1] }
 0x4d6   :  { %v1857_v39 = vpop.f32.mrf.mxu1 }
 0x4da   :  { %v1828_v5 = vpop.f32.mrf.mxu0 }
 0x4db   :  { %v1895_v52 = vadd.f32 %v1894_v21, %v1828_v5  ;;  %v2099_v5 = vpop.f32.mrf.mxu3 }
 0x4dd   :  { %3697 = vmatmul.msk.f32.gmra.mxu2 %vm230_vm1, %v5999_v1 }
 0x4de   :  { %v1860_v57 = vpop.f32.mrf.mxu1 }
 0x4e2   :  { %v1831_v8 = vpop.f32.mrf.mxu0 }
 0x4e3   :  { %v1898_v61 = vadd.f32 %v1897_v29, %v1831_v8 }
 0x4e5   :  { %3725 = vmatmul.msk.f32.vlgmr.msra.gmra.mxu2 %vm230_vm1, %v6019_v17 }
 0x4e6   :  { %v2014_v6 = vpop.f32.mrf.mxu1 }
 0x4ea   :  { %v1985_v14 = vpop.f32.mrf.mxu0 }
 0x4eb   :  { %v2026_v40 = vadd.f32 %v1985_v14, %v1889_v62  ;;  %v4018_v62 = vld [vmem:[%s7050_s6 + $0x58] sm:$0xff] }
 0x4ed   :  { %v2131_v12 = vadd.f32 %v2090_v36, %v2026_v40  ;;  %v4000_v36 = vld [vmem:[%s7047_s3] sm:$0xff] }
 0x4ee   :  { %v2017_v13 = vpop.f32.mrf.mxu1 }
 0x4f2   :  { %v1988_v20 = vpop.f32.mrf.mxu0 }
 0x4f3   :  { %v2028_v19 = vadd.f32 %v1988_v20, %v1892_v38  ;;  %v4015_v38 = vld [vmem:[%s7050_s6 + $0x70] sm:$0xff] }
 0x4f5   :  { %v2133_v55 = vadd.f32 %v2093_v42, %v2028_v19  ;;  %v4027_v19 = vld [vmem:[%s7050_s6 + $0x10] sm:$0xff] }
 0x4f6   :  { %v2020_v17 = vpop.f32.mrf.mxu1 }
 0x4fa   :  { %v1991_v28 = vpop.f32.mrf.mxu0 }
 0x4fb   :  { %v2030_v10 = vadd.f32 %v1991_v28, %v1895_v52  ;;  %v4012_v52 = vld [vmem:[%s7049_s5 + $0x80] sm:$0xff] }
 0x4fe   :  { %v2023_v58 = vpop.f32.mrf.mxu1 }
 0x502   :  { %v1994_v32 = vpop.f32.mrf.mxu0 }
 0x506   :  { %v2224_v31 = vpop.f32.mrf.mxu1 }
 0x50a   :  { %v2195_v9 = vpop.f32.mrf.mxu0 }
 0x50e   :  { %v2227_v35 = vpop.f32.mrf.mxu1 }
 0x512   :  { %v2198_v3 = vpop.f32.mrf.mxu0 }
 0x516   :  { %v2230_v46 = vpop.f32.mrf.mxu1 }
 0x51a   :  { %v2201_v0 = vpop.f32.mrf.mxu0 }
 0x51e   :  { %v2233_v15 = vpop.f32.mrf.mxu1 }
 0x520   :  { %v1728_v4 = vpop.f32.mrf.mxu2 }
 0x521   :  { %v1729_v1 = vadd.f32 %v1728_v4, %v148_v11 }
 0x523   :  { %1732 = vst.msk [vmem:[#allocation2] sm:$0x1] %vm1731_vm12, %v1729_v1 }
 0x528   :  { %v1917_v43 = vpop.f32.mrf.mxu2 }
 0x529   :  { %v1918_v50 = vadd.f32 %v1917_v43, %v1851_v44  ;;  %v2032_v44 = vadd.f32 %v1994_v32, %v1898_v61  ;;  %v2238_v43 = vadd.f32 %v2198_v3, %v2133_v55  ;;  %v4010_v3 = vld [vmem:[%s7049_s5 + $0x88] sm:$0xff]  ;;  %v4021_v61 = vld [vmem:[%s7050_s6 + $0x40] sm:$0xff] }
 0x52a   :  { %v2479_v55 = vld [vmem:[%s7051_s7 + $0x88] sm:$0xff] }
 0x52b   :  { %v2027_v63 = vadd.f32 %v2014_v6, %v1918_v50  ;;  %v2137_v1 = vadd.f32 %v2099_v5, %v2032_v44  ;;  %v4009_v50 = vld [vmem:[%s7048_s4 + $0x8] sm:$0x3f]  ;;  %v2481_v5 = vld [vmem:[%s7051_s7 + $0x98] sm:$0xff] }
 0x530   :  { %v1920_v18 = vpop.f32.mrf.mxu2 }
 0x531   :  { %v1921_v49 = vadd.f32 %v1920_v18, %v1854_v47  ;;  %v2135_v47 = vadd.f32 %v2096_v51, %v2030_v10  ;;  %v2236_v18 = vadd.f32 %v2195_v9, %v2131_v12  ;;  %v4003_v9 = vld [vmem:[%s7050_s6 + $0xa0] sm:$0xff]  ;;  %v4011_v51 = vld [vmem:[%s7050_s6 + $0x88] sm:$0xff] }
 0x532   :  { %v4020_v10 = vld [vmem:[%s7050_s6 + $0x48] sm:$0xff]  ;;  %v3764_v12 = vld [vmem:[%s7051_s7 + $0x140] sm:$0xff] }
 0x533   :  { %v2029_v60 = vadd.f32 %v2017_v13, %v1921_v49  ;;  %v2240_v4 = vadd.f32 %v2201_v0, %v2135_v47  ;;  %v2244_v28 = vadd.f32 %v2236_v18, %v4674_v22  ;;  %v4008_v49 = vld [vmem:[%s7047_s3 + $0x8] sm:$0x3f]  ;;  %v2480_v0 = vld [vmem:[%s7051_s7 + $0x90] sm:$0xff]  ;;  %v2474_v18 = vld [vmem:[%s7051_s7 + $0x60] sm:$0xff] }
 0x535   :  { %v2248_v20 = vadd.f32 %v2240_v4, %v4674_v22  ;;  %v3765_v4 = vld [vmem:[%s7051_s7 + $0x148] sm:$0xff] }
 0x538   :  { %v1923_v24 = vpop.f32.mrf.mxu2 }
 0x539   :  { %v1924_v48 = vadd.f32 %v1923_v24, %v1857_v39 }
 0x53b   :  { %v2031_v56 = vadd.f32 %v2020_v17, %v1924_v48  ;;  %v4006_v48 = vld [vmem:[%s7049_s5 + $0x90] sm:$0xff] }
 0x540   :  { %v1926_v30 = vpop.f32.mrf.mxu2 }
 0x541   :  { %v1927_v33 = vadd.f32 %v1926_v30, %v1860_v57 }
 0x543   :  { %v2033_v53 = vadd.f32 %v2023_v58, %v1927_v33  ;;  %v2246_v58 = vadd.f32 %v2238_v43, %v4674_v22  ;;  %v4014_v33 = vld [vmem:[%s7050_s6 + $0x78] sm:$0xff]  ;;  %v3762_v43 = vld [vmem:[%s7051_s7 + $0x130] sm:$0xff] }
 0x548   :  { %v2119_v37 = vpop.f32.mrf.mxu2 }
 0x549   :  { %v2132_v27 = vadd.f32 %v2119_v37, %v2027_v63  ;;  %v4019_v63 = vld [vmem:[%s7050_s6 + $0x50] sm:$0xff] }
 0x54b   :  { %v2237_v11 = vadd.f32 %v2224_v31, %v2132_v27  ;;  %v4024_v27 = vld [vmem:[%s7050_s6 + $0x28] sm:$0xff] }
 0x54d   :  { %v2245_v14 = vadd.f32 %v2237_v11, %v4676_v23  ;;  %v2478_v11 = vld [vmem:[%s7051_s7 + $0x80] sm:$0xff] }
 0x550   :  { %v2122_v45 = vpop.f32.mrf.mxu2 }
 0x551   :  { %v2134_v2 = vadd.f32 %v2122_v45, %v2029_v60  ;;  %v4004_v45 = vld [vmem:[%s7049_s5 + $0x98] sm:$0xff]  ;;  %v4016_v60 = vld [vmem:[%s7050_s6 + $0x68] sm:$0xff] }
 0x553   :  { %v2239_v39 = vadd.f32 %v2227_v35, %v2134_v2  ;;  %v4002_v35 = vld [vmem:[%s7049_s5 + $0xa0] sm:$0xff]  ;;  %v4023_v2 = vld [vmem:[%s7050_s6 + $0x30] sm:$0xff] }
 0x555   :  { %v2247_v13 = vadd.f32 %v2239_v39, %v4676_v23  ;;  %v2482_v39 = vld [vmem:[%s7051_s7 + $0xa0] sm:$0xf] }
 0x558   :  { %v2125_v54 = vpop.f32.mrf.mxu2 }
 0x559   :  { %v2136_v59 = vadd.f32 %v2125_v54, %v2031_v56  ;;  %v4007_v54 = vld [vmem:[%s7050_s6 + $0x90] sm:$0xff]  ;;  %v4013_v56 = vld [vmem:[%s7050_s6 + $0x80] sm:$0xff] }
 0x55b   :  { %v2241_v25 = vadd.f32 %v2230_v46, %v2136_v59  ;;  %v4005_v46 = vld [vmem:[%s7050_s6 + $0x98] sm:$0xff]  ;;  %v4017_v59 = vld [vmem:[%s7050_s6 + $0x60] sm:$0xff] }
 0x55d   :  { %v2249_v6 = vadd.f32 %v2241_v25, %v4676_v23  ;;  %v4028_v25 = vld [vmem:[%s7050_s6 + $0x8] sm:$0xff] }
 0x560   :  { %v2128_v7 = vpop.f32.mrf.mxu2 }
 0x561   :  { %v2138_v34 = vadd.f32 %v2128_v7, %v2033_v53  ;;  %v4022_v53 = vld [vmem:[%s7050_s6 + $0x38] sm:$0xff]  ;;  %v4025_v7 = vld [vmem:[%s7050_s6 + $0x20] sm:$0xff] }
 0x563   :  { %v2243_v57 = vadd.f32 %v2233_v15, %v2138_v34  ;;  %v4026_v15 = vld [vmem:[%s7050_s6 + $0x18] sm:$0xff]  ;;  %v4029_v34 = vld [vmem:[%s7050_s6] sm:$0xff] }
 0x565   :  { %v2251_v8 = vadd.f32 %v2243_v57, %v4676_v23  ;;  %v2483_v57 = vld [vmem:[%s7051_s7 + $0xa8] sm:$0xf] }
 0x567   :  { %3958 = vtanh.f32 %v2251_v8  ;;  %v3767_v8 = vld [vmem:[%s7051_s7 + $0x158] sm:$0xf] }
 0x568   :  { %v2204_v16 = vpop.f32.mrf.mxu2  ;;  %3960 = vtanh.f32 %v2249_v6  ;;  %v3766_v6 = vld [vmem:[%s7051_s7 + $0x150] sm:$0xf] }
 0x569   :  { %v2242_v17 = vadd.f32 %v2204_v16, %v2137_v1  ;;  %3962 = vtanh.f32 %v2247_v13  ;;  %3768 = vmatpush.msk.msra.mxu1 %vm602_vm4, %v3766_v6  ;;  %v2476_v1 = vld [vmem:[%s7051_s7 + $0x70] sm:$0xff]  ;;  %v2477_v13 = vld [vmem:[%s7051_s7 + $0x78] sm:$0xff]  ;;  %v3797_v6 = vld [vmem:[%s7051_s7 + $0x1e8] sm:$0xff] }
 0x56a   :  { %3964 = vtanh.f32 %v2245_v14 }
 0x56b   :  { %v2250_v21 = vadd.f32 %v2242_v17, %v4674_v22  ;;  %v4001_v22 = vld [vmem:[%s7048_s4] sm:$0xff]  ;;  %v3763_v17 = vld [vmem:[%s7051_s7 + $0x138] sm:$0xff]  ;;  %2527 = vmatpush.msra.mxu1 %v3764_v12  ;;  %v3819_v12 = vld [vmem:[%s7051_s7 + $0x268] sm:$0xff] }
 0x56d   :  { %v3959_v24 = vpop.eup %3958  ;;  %3966 = vtanh.f32 %v2250_v21  ;;  %2528 = vmatpush.msra.mxu1 %v3762_v43  ;;  %v3793_v43 = vld [vmem:[%s7051_s7 + $0x1c8] sm:$0xff] }
 0x56e   :  { %3733 = vmatpush.msk.msrb.mxu2 %vm602_vm4, %v3959_v24  ;;  %3739 = vmatpush.msk.msra.mxu0 %vm602_vm4, %v3959_v24  ;;  %v3961_v23 = vpop.eup %3960  ;;  %3968 = vtanh.f32 %v2248_v20  ;;  %v2475_v20 = vld [vmem:[%s7051_s7 + $0x68] sm:$0xff] }
 0x56f   :  { %v3963_v29 = vpop.eup %3962  ;;  %3970 = vtanh.f32 %v2246_v58  ;;  %v2472_v58 = vld [vmem:[%s7051_s7 + $0x50] sm:$0xff] }
 0x570   :  { %2302 = vmatpush.msrb.mxu2 %v3961_v23  ;;  %2348 = vmatpush.msra.mxu0 %v3961_v23  ;;  %v3965_v30 = vpop.eup %3964  ;;  %3972 = vtanh.f32 %v2244_v28  ;;  %v2473_v23 = vld [vmem:[%s7051_s7 + $0x58] sm:$0xff]  ;;  %v3760_v28 = vld [vmem:[%s7051_s7 + $0x120] sm:$0xff] }
 0x571   :  { %2529 = vmatpush.msra.mxu1 %v3760_v28  ;;  %v3789_v28 = vld [vmem:[%s7051_s7 + $0x1a8] sm:$0xff] }
 0x572   :  { %2303 = vmatpush.msrb.mxu2 %v3963_v29  ;;  %2349 = vmatpush.msra.mxu0 %v3963_v29  ;;  %v3761_v29 = vld [vmem:[%s7051_s7 + $0x128] sm:$0xff] }
 0x573   :  { %v3967_v31 = vpop.eup %3966 }
 0x574   :  { %3730 = vmatpush.msk.msrb.mxu3 %vm602_vm4, %v3967_v31  ;;  %2304 = vmatpush.msrb.mxu2 %v3965_v30  ;;  %v3969_v32 = vpop.eup %3968 }
 0x575   :  { %2350 = vmatpush.msra.mxu0 %v3965_v30  ;;  %3734 = vmatmul.msk.f32.vlgmr.msrb.gmra.mxu2 %vm705_vm5, %v4000_v36  ;;  %v3971_v37 = vpop.eup %3970  ;;  %v2470_v30 = vld [vmem:[%s7051_s7 + $0x40] sm:$0xff] }
 0x576   :  { %2279 = vmatpush.msrb.mxu3 %v3969_v32  ;;  %3740 = vmatmul.msk.f32.vlgmr.msra.gmra.mxu0 %vm705_vm5, %v4001_v22  ;;  %v3973_v42 = vpop.eup %3972 }
 0x577   :  { %2402 = vmatpush.msra.mxu2 %v4002_v35  ;;  %2448 = vmatpush.msrb.mxu0 %v4003_v9 }
 0x578   :  { %2280 = vmatpush.msrb.mxu3 %v3971_v37 }
 0x579   :  { %2403 = vmatpush.msra.mxu2 %v4004_v45  ;;  %2449 = vmatpush.msrb.mxu0 %v4005_v46 }
 0x57a   :  { %2281 = vmatpush.msrb.mxu3 %v3973_v42 }
 0x57b   :  { %3731 = vmatmul.msk.f32.vlgmr.msrb.gmra.mxu3 %vm705_vm5, %v4000_v36  ;;  %2404 = vmatpush.msra.mxu2 %v4006_v48  ;;  %v3759_v36 = vld [vmem:[%s7051_s7 + $0x118] sm:$0xff]  ;;  %v3756_v48 = vld [vmem:[%s7051_s7 + $0x100] sm:$0xff] }
 0x57c   :  { %3736 = vmatpush.msk.msra.mxu3 %vm602_vm4, %v3967_v31  ;;  %2450 = vmatpush.msrb.mxu0 %v4007_v54  ;;  %v2471_v31 = vld [vmem:[%s7051_s7 + $0x48] sm:$0xff] }
 0x57d   :  { %3735 = vmatmul.msk.f32.gmra.mxu2 %vm705_vm5, %v4008_v49  ;;  %v3757_v54 = vld [vmem:[%s7051_s7 + $0x108] sm:$0xff] }
 0x57e   :  { %2325 = vmatpush.msra.mxu3 %v3969_v32  ;;  %3741 = vmatmul.msk.f32.gmra.mxu0 %vm705_vm5, %v4009_v50  ;;  %v3758_v32 = vld [vmem:[%s7051_s7 + $0x110] sm:$0xff] }
 0x57f   :  { %2405 = vmatpush.msra.mxu2 %v4010_v3  ;;  %2451 = vmatpush.msrb.mxu0 %v4011_v51  ;;  %v3754_v3 = vld [vmem:[%s7051_s7 + $0xf0] sm:$0xff]  ;;  %v3755_v51 = vld [vmem:[%s7051_s7 + $0xf8] sm:$0xff] }
 0x580   :  { %2326 = vmatpush.msra.mxu3 %v3971_v37  ;;  %v2469_v37 = vld [vmem:[%s7051_s7 + $0x38] sm:$0xff]  ;;  %2530 = vmatpush.msra.mxu1 %v3758_v32 }
 0x581   :  { %2406 = vmatpush.msra.mxu2 %v4012_v52  ;;  %2452 = vmatpush.msrb.mxu0 %v4013_v56  ;;  %v2464_v52 = vld [vmem:[%s7051_s7 + $0x10] sm:$0xff]  ;;  %v2465_v56 = vld [vmem:[%s7051_s7 + $0x18] sm:$0xff] }
 0x582   :  { %2327 = vmatpush.msra.mxu3 %v3973_v42  ;;  %2531 = vmatpush.msra.mxu1 %v3756_v48  ;;  %v3787_v32 = vld [vmem:[%s7051_s7 + $0x198] sm:$0xff] }
 0x583   :  { %3732 = vmatmul.msk.f32.gmra.mxu3 %vm705_vm5, %v4008_v49  ;;  %3774 = vmatpush.msk.msra.mxu0 %vm602_vm4, %v2482_v39  ;;  %v2466_v49 = vld [vmem:[%s7051_s7 + $0x20] sm:$0xff]  ;;  %v3823_v39 = vld [vmem:[%s7051_s7 + $0x288] sm:$0xff] }
 0x584   :  { %2414 = vmatpush.msrb.mxu3 %v4014_v33  ;;  %3771 = vmatpush.msk.msrb.mxu2 %vm602_vm4, %v3767_v8  ;;  %v3752_v33 = vld [vmem:[%s7051_s7 + $0xe0] sm:$0xff] }
 0x585   :  { %2583 = vmatpush.msra.mxu0 %v2480_v0  ;;  %2532 = vmatpush.msra.mxu1 %v3754_v3  ;;  %v3799_v0 = vld [vmem:[%s7051_s7 + $0x1f8] sm:$0xff]  ;;  %v3818_v8 = vld [vmem:[%s7051_s7 + $0x260] sm:$0xff] }
 0x586   :  { %2415 = vmatpush.msrb.mxu3 %v4015_v38  ;;  %2550 = vmatpush.msrb.mxu2 %v3765_v4  ;;  %v3753_v38 = vld [vmem:[%s7051_s7 + $0xe8] sm:$0xff]  ;;  %v3794_v4 = vld [vmem:[%s7051_s7 + $0x1d0] sm:$0xff] }
 0x587   :  { %2584 = vmatpush.msra.mxu0 %v2478_v11  ;;  %2533 = vmatpush.msra.mxu1 %v3752_v33  ;;  %v3821_v11 = vld [vmem:[%s7051_s7 + $0x278] sm:$0xff] }
 0x588   :  { %2416 = vmatpush.msrb.mxu3 %v4016_v60  ;;  %2551 = vmatpush.msrb.mxu2 %v3763_v17  ;;  %v2462_v60 = vld [vmem:[%s7051_s7] sm:$0xff] }
 0x589   :  { %2585 = vmatpush.msra.mxu0 %v2476_v1  ;;  %v3795_v1 = vld [vmem:[%s7051_s7 + $0x1d8] sm:$0xff]  ;;  %v3814_v17 = vld [vmem:[%s7051_s7 + $0x240] sm:$0xff] }
 0x58a   :  { %2417 = vmatpush.msrb.mxu3 %v4017_v59  ;;  %2552 = vmatpush.msrb.mxu2 %v3761_v29  ;;  %v2463_v59 = vld [vmem:[%s7051_s7 + $0x8] sm:$0xff]  ;;  %v3810_v29 = vld [vmem:[%s7051_s7 + $0x220] sm:$0xff] }
 0x58b   :  { %3737 = vmatmul.msk.f32.vlgmr.msra.gmra.mxu3 %vm705_vm5, %v4001_v22  ;;  %2586 = vmatpush.msra.mxu0 %v2474_v18  ;;  %v2468_v22 = vld [vmem:[%s7051_s7 + $0x30] sm:$0xff]  ;;  %v3815_v18 = vld [vmem:[%s7051_s7 + $0x248] sm:$0xff] }
 0x58c   :  { %2418 = vmatpush.msrb.mxu3 %v4018_v62  ;;  %2553 = vmatpush.msrb.mxu2 %v3759_v36  ;;  %v3828_v62 = vld [vmem:[%s7051_s7 + $0x2b0] sm:$0xf] }
 0x58d   :  { %2587 = vmatpush.msra.mxu0 %v2472_v58  ;;  %v3813_v58 = vld [vmem:[%s7051_s7 + $0x238] sm:$0xff]  ;;  %v3808_v36 = vld [vmem:[%s7051_s7 + $0x210] sm:$0xff] }
 0x58e   :  { %2419 = vmatpush.msrb.mxu3 %v4019_v63  ;;  %2554 = vmatpush.msrb.mxu2 %v3757_v54  ;;  %v3829_v63 = vld [vmem:[%s7051_s7 + $0x2b8] sm:$0xf] }
 0x58f   :  { %2588 = vmatpush.msra.mxu0 %v2470_v30  ;;  %v3811_v30 = vld [vmem:[%s7051_s7 + $0x228] sm:$0xff] }
 0x590   :  { %2420 = vmatpush.msrb.mxu3 %v4020_v10  ;;  %2555 = vmatpush.msrb.mxu2 %v3755_v51  ;;  %v3750_v10 = vld [vmem:[%s7051_s7 + $0xd0] sm:$0xff] }
 0x591   :  { %2589 = vmatpush.msra.mxu0 %v2468_v22  ;;  %2534 = vmatpush.msra.mxu1 %v3750_v10  ;;  %v3809_v22 = vld [vmem:[%s7051_s7 + $0x218] sm:$0xff] }
 0x592   :  { %2421 = vmatpush.msrb.mxu3 %v4021_v61  ;;  %2556 = vmatpush.msrb.mxu2 %v3753_v38  ;;  %v3751_v61 = vld [vmem:[%s7051_s7 + $0xd8] sm:$0xff] }
 0x593   :  { %3738 = vmatmul.msk.f32.gmra.mxu3 %vm705_vm5, %v4009_v50  ;;  %v2467_v50 = vld [vmem:[%s7051_s7 + $0x28] sm:$0xff]  ;;  %2590 = vmatpush.msra.mxu0 %v2466_v49 }
 0x594   :  { %2422 = vmatpush.msrb.mxu3 %v4022_v53  ;;  %v3826_v53 = vld [vmem:[%s7051_s7 + $0x2a0] sm:$0xff]  ;;  %2557 = vmatpush.msrb.mxu2 %v3751_v61 }
 0x595   :  { %2591 = vmatpush.msra.mxu0 %v2464_v52 }
 0x596   :  { %2423 = vmatpush.msrb.mxu3 %v4023_v2  ;;  %v3827_v2 = vld [vmem:[%s7051_s7 + $0x2a8] sm:$0xff] }
 0x597   :  { %2592 = vmatpush.msra.mxu0 %v2462_v60 }
 0x598   :  { %2424 = vmatpush.msrb.mxu3 %v4024_v27  ;;  %v3748_v27 = vld [vmem:[%s7051_s7 + $0xc0] sm:$0xff] }
 0x599   :  { %2535 = vmatpush.msra.mxu1 %v3748_v27 }
 0x59a   :  { %2425 = vmatpush.msrb.mxu3 %v4025_v7  ;;  %v3749_v7 = vld [vmem:[%s7051_s7 + $0xc8] sm:$0xff] }
 0x59b   :  { %2558 = vmatpush.msrb.mxu2 %v3749_v7 }
 0x59c   :  { %2426 = vmatpush.msrb.mxu3 %v4026_v15  ;;  %v3824_v15 = vld [vmem:[%s7051_s7 + $0x290] sm:$0xff] }
 0x59e   :  { %2427 = vmatpush.msrb.mxu3 %v4027_v19  ;;  %v3825_v19 = vld [vmem:[%s7051_s7 + $0x298] sm:$0xff] }
 0x5a0   :  { %2428 = vmatpush.msrb.mxu3 %v4028_v25  ;;  %v3746_v25 = vld [vmem:[%s7051_s7 + $0xb0] sm:$0xff] }
 0x5a1   :  { %2536 = vmatpush.msra.mxu1 %v3746_v25 }
 0x5a2   :  { %2429 = vmatpush.msrb.mxu3 %v4029_v34  ;;  %v3747_v34 = vld [vmem:[%s7051_s7 + $0xb8] sm:$0xff] }
 0x5a3   :  { %2559 = vmatpush.msrb.mxu2 %v3747_v34  ;;  %v3852_v34 = vld [vmem:[%s7051_s7 + $0x340] sm:$0xff] }
 0x5a4   :  { %3777 = vmatpush.msk.msra.mxu3 %vm602_vm4, %v2483_v57  ;;  %v3798_v57 = vld [vmem:[%s7051_s7 + $0x1f0] sm:$0xff] }
 0x5a6   :  { %2606 = vmatpush.msra.mxu3 %v2481_v5  ;;  %v3820_v5 = vld [vmem:[%s7051_s7 + $0x270] sm:$0xff] }
 0x5a8   :  { %2607 = vmatpush.msra.mxu3 %v2479_v55  ;;  %v3796_v55 = vld [vmem:[%s7051_s7 + $0x1e0] sm:$0xff] }
 0x5aa   :  { %2608 = vmatpush.msra.mxu3 %v2477_v13  ;;  %v3816_v13 = vld [vmem:[%s7051_s7 + $0x250] sm:$0xff] }
 0x5ac   :  { %2609 = vmatpush.msra.mxu3 %v2475_v20  ;;  %v3790_v20 = vld [vmem:[%s7051_s7 + $0x1b0] sm:$0xff] }
 0x5ae   :  { %2610 = vmatpush.msra.mxu3 %v2473_v23  ;;  %v3788_v23 = vld [vmem:[%s7051_s7 + $0x1a0] sm:$0xff] }
 0x5b0   :  { %2611 = vmatpush.msra.mxu3 %v2471_v31  ;;  %v3786_v31 = vld [vmem:[%s7051_s7 + $0x190] sm:$0xff] }
 0x5b2   :  { %2612 = vmatpush.msra.mxu3 %v2469_v37  ;;  %v3784_v37 = vld [vmem:[%s7051_s7 + $0x180] sm:$0xff] }
 0x5b4   :  { %2613 = vmatpush.msra.mxu3 %v2467_v50 }
 0x5b6   :  { %2614 = vmatpush.msra.mxu3 %v2465_v56 }
 0x5b8   :  { %2615 = vmatpush.msra.mxu3 %v2463_v59 }
 0x5f3   :  { %v2352_v40 = vpop.f32.mrf.mxu0 }
 0x5f8   :  { %v2306_v44 = vpop.f32.mrf.mxu2 }
 0x5f9   :  { %v2359_v47 = vmax.f32 %v2306_v44, %v2352_v40  ;;  %v3800_v40 = vld [vmem:[%s7051_s7 + $0x200] sm:$0xf]  ;;  %v3801_v44 = vld [vmem:[%s7051_s7 + $0x208] sm:$0xf] }
 0x5fb   :  { %3742 = vmatmul.msk.f32.vlgmr.msra.gmra.mxu2 %vm820_vm6, %v2359_v47  ;;  %3744 = vmatmul.msk.f32.vlgmr.msrb.gmra.mxu0 %vm820_vm6, %v2359_v47  ;;  %v2355_v16 = vpop.f32.mrf.mxu0  ;;  %v3822_v47 = vld [vmem:[%s7051_s7 + $0x280] sm:$0xff] }
 0x5fc   :  { %3830 = vmatpush.msk.msrb.mxu0 %vm602_vm4, %v3828_v62  ;;  %3805 = vmatpush.msk.msra.mxu2 %vm602_vm4, %v3801_v44 }
 0x5fe   :  { %v2283_v14 = vpop.f32.mrf.mxu3  ;;  %2749 = vmatpush.msrb.mxu0 %v3826_v53  ;;  %2687 = vmatpush.msra.mxu2 %v3799_v0  ;;  %v3856_v53 = vld [vmem:[%s7051_s7 + $0x360] sm:$0xf]  ;;  %v3849_v0 = vld [vmem:[%s7051_s7 + $0x328] sm:$0xff] }
 0x600   :  { %v2309_v21 = vpop.f32.mrf.mxu2  ;;  %2750 = vmatpush.msrb.mxu0 %v3824_v15  ;;  %2688 = vmatpush.msra.mxu2 %v3797_v6  ;;  %v3854_v15 = vld [vmem:[%s7051_s7 + $0x350] sm:$0xff] }
 0x601   :  { %v2361_v24 = vmax.f32 %v2309_v21, %v2355_v16  ;;  %v3792_v16 = vld [vmem:[%s7051_s7 + $0x1c0] sm:$0xff]  ;;  %v3791_v21 = vld [vmem:[%s7051_s7 + $0x1b8] sm:$0xff] }
 0x602   :  { %2751 = vmatpush.msrb.mxu0 %v3822_v47  ;;  %2689 = vmatpush.msra.mxu2 %v3795_v1  ;;  %v3850_v47 = vld [vmem:[%s7051_s7 + $0x330] sm:$0xff] }
 0x603   :  { %3743 = vmatmul.msk.f32.gmra.mxu2 %vm820_vm6, %v2361_v24  ;;  %3745 = vmatmul.msk.f32.gmra.mxu0 %vm820_vm6, %v2361_v24  ;;  %v3812_v24 = vld [vmem:[%s7051_s7 + $0x230] sm:$0xff] }
 0x604   :  { %2752 = vmatpush.msrb.mxu0 %v3820_v5  ;;  %2690 = vmatpush.msra.mxu2 %v3793_v43  ;;  %v3842_v1 = vld [vmem:[%s7051_s7 + $0x2f0] sm:$0xff] }
 0x605   :  { %v3838_v43 = vld [vmem:[%s7051_s7 + $0x2d0] sm:$0xff] }
 0x606   :  { %v2286_v35 = vpop.f32.mrf.mxu3  ;;  %2753 = vmatpush.msrb.mxu0 %v3818_v8  ;;  %2691 = vmatpush.msra.mxu2 %v3791_v21  ;;  %v3844_v8 = vld [vmem:[%s7051_s7 + $0x300] sm:$0xff]  ;;  %v4030_v21 = vld [vmem:[%s7055_s11 + $0x78] sm:$0xff] }
 0x608   :  { %2754 = vmatpush.msrb.mxu0 %v3816_v13  ;;  %2692 = vmatpush.msra.mxu2 %v3789_v28  ;;  %v3843_v13 = vld [vmem:[%s7051_s7 + $0x2f8] sm:$0xff]  ;;  %v4032_v28 = vld [vmem:[%s7055_s11 + $0x68] sm:$0xff] }
 0x60a   :  { %2755 = vmatpush.msrb.mxu0 %v3814_v17  ;;  %2693 = vmatpush.msra.mxu2 %v3787_v32  ;;  %v3839_v17 = vld [vmem:[%s7051_s7 + $0x2d8] sm:$0xff]  ;;  %v4035_v32 = vld [vmem:[%s7055_s11 + $0x50] sm:$0xff] }
 0x60c   :  { %2756 = vmatpush.msrb.mxu0 %v3812_v24 }
 0x60e   :  { %v2329_v9 = vpop.f32.mrf.mxu3  ;;  %2757 = vmatpush.msrb.mxu0 %v3810_v29 }
 0x60f   :  { %v2358_v42 = vmax.f32 %v2283_v14, %v2329_v9  ;;  %v3817_v14 = vld [vmem:[%s7051_s7 + $0x258] sm:$0xff]  ;;  %v3782_v9 = vld [vmem:[%s7051_s7 + $0x170] sm:$0xff] }
 0x610   :  { %2758 = vmatpush.msrb.mxu0 %v3808_v36  ;;  %v4036_v36 = vld [vmem:[%s7055_s11 + $0x48] sm:$0xff] }
 0x611   :  { %2384 = vmatmul.f32.vlgmr.msrb.gmra.mxu1 %v2358_v42  ;;  %2430 = vmatmul.f32.vlgmr.msrb.gmra.mxu3 %v2358_v42  ;;  %v3783_v42 = vld [vmem:[%s7051_s7 + $0x178] sm:$0xff] }
 0x612   :  { %3833 = vmatpush.msk.msrb.mxu3 %vm602_vm4, %v3829_v63  ;;  %3802 = vmatpush.msk.msrb.mxu1 %vm602_vm4, %v3800_v40  ;;  %v3853_v40 = vld [vmem:[%s7051_s7 + $0x348] sm:$0xff] }
 0x614   :  { %2772 = vmatpush.msrb.mxu3 %v3827_v2  ;;  %2664 = vmatpush.msrb.mxu1 %v3798_v57  ;;  %v3857_v2 = vld [vmem:[%s7051_s7 + $0x368] sm:$0xf]  ;;  %v3848_v57 = vld [vmem:[%s7051_s7 + $0x320] sm:$0xff] }
 0x616   :  { %v2332_v45 = vpop.f32.mrf.mxu3  ;;  %2773 = vmatpush.msrb.mxu3 %v3825_v19  ;;  %2665 = vmatpush.msrb.mxu1 %v3796_v55  ;;  %v3855_v19 = vld [vmem:[%s7051_s7 + $0x358] sm:$0xff] }
 0x617   :  { %v2360_v46 = vmax.f32 %v2286_v35, %v2332_v45  ;;  %v3785_v35 = vld [vmem:[%s7051_s7 + $0x188] sm:$0xff]  ;;  %v3780_v45 = vld [vmem:[%s7051_s7 + $0x160] sm:$0xff]  ;;  %v3847_v55 = vld [vmem:[%s7051_s7 + $0x318] sm:$0xff] }
 0x618   :  { %2774 = vmatpush.msrb.mxu3 %v3823_v39  ;;  %2666 = vmatpush.msrb.mxu1 %v3794_v4  ;;  %v3851_v39 = vld [vmem:[%s7051_s7 + $0x338] sm:$0xff] }
 0x619   :  { %2387 = vmatmul.f32.gmra.mxu1 %v2360_v46  ;;  %2433 = vmatmul.f32.gmra.mxu3 %v2360_v46  ;;  %v3781_v46 = vld [vmem:[%s7051_s7 + $0x168] sm:$0xff] }
 0x61a   :  { %2775 = vmatpush.msrb.mxu3 %v3821_v11  ;;  %2667 = vmatpush.msrb.mxu1 %v3792_v16  ;;  %v3846_v11 = vld [vmem:[%s7051_s7 + $0x310] sm:$0xff]  ;;  %v3841_v16 = vld [vmem:[%s7051_s7 + $0x2e8] sm:$0xff] }
 0x61b   :  { %2694 = vmatpush.msra.mxu2 %v3785_v35  ;;  %v4039_v35 = vld [vmem:[%s7055_s11 + $0x30] sm:$0xff] }
 0x61c   :  { %2776 = vmatpush.msrb.mxu3 %v3819_v12  ;;  %2668 = vmatpush.msrb.mxu1 %v3790_v20  ;;  %v3845_v12 = vld [vmem:[%s7051_s7 + $0x308] sm:$0xff] }
 0x61d   :  { %2695 = vmatpush.msra.mxu2 %v3783_v42  ;;  %v3837_v20 = vld [vmem:[%s7051_s7 + $0x2c8] sm:$0xff]  ;;  %v4041_v42 = vld [vmem:[%s7055_s11 + $0x20] sm:$0xff] }
 0x61e   :  { %2777 = vmatpush.msrb.mxu3 %v3817_v14  ;;  %2669 = vmatpush.msrb.mxu1 %v3788_v23  ;;  %v3840_v14 = vld [vmem:[%s7051_s7 + $0x2e0] sm:$0xff] }
 0x61f   :  { %2696 = vmatpush.msra.mxu2 %v3781_v46  ;;  %v4043_v46 = vld [vmem:[%s7055_s11 + $0x10] sm:$0xff] }
 0x620   :  { %2778 = vmatpush.msrb.mxu3 %v3815_v18  ;;  %2670 = vmatpush.msrb.mxu1 %v3786_v31  ;;  %v3836_v18 = vld [vmem:[%s7051_s7 + $0x2c0] sm:$0xff]  ;;  %v4034_v31 = vld [vmem:[%s7055_s11 + $0x58] sm:$0xff] }
 0x622   :  { %2779 = vmatpush.msrb.mxu3 %v3813_v58  ;;  %2671 = vmatpush.msrb.mxu1 %v3784_v37  ;;  %v4031_v58 = vld [vmem:[%s7055_s11 + $0x70] sm:$0xff]  ;;  %v4038_v37 = vld [vmem:[%s7055_s11 + $0x38] sm:$0xff] }
 0x624   :  { %2780 = vmatpush.msrb.mxu3 %v3811_v30  ;;  %2672 = vmatpush.msrb.mxu1 %v3782_v9  ;;  %v4033_v30 = vld [vmem:[%s7055_s11 + $0x60] sm:$0xff]  ;;  %v4040_v9 = vld [vmem:[%s7055_s11 + $0x28] sm:$0xff] }
 0x626   :  { %2781 = vmatpush.msrb.mxu3 %v3809_v22  ;;  %2673 = vmatpush.msrb.mxu1 %v3780_v45  ;;  %v4037_v22 = vld [vmem:[%s7055_s11 + $0x40] sm:$0xff]  ;;  %v4042_v45 = vld [vmem:[%s7055_s11 + $0x18] sm:$0xff] }
 0x678   :  { %v2454_v49 = vpop.f32.mrf.mxu0 }
 0x67e   :  { %v2408_v54 = vpop.f32.mrf.mxu2 }
 0x680   :  { %v2457_v60 = vpop.f32.mrf.mxu0 }
 0x686   :  { %v2411_v33 = vpop.f32.mrf.mxu2 }
 0x68e   :  { %v2385_v48 = vpop.f32.mrf.mxu1 }
 0x68f   :  { %v2409_v3 = vadd.f32 %v2408_v54, %v2385_v48  ;;  %v4044_v48 = vld [vmem:[%s7055_s11 + $0x8] sm:$0xff]  ;;  %v4045_v54 = vld [vmem:[%s7055_s11] sm:$0xff] }
 0x694   :  { %v2431_v50 = vpop.f32.mrf.mxu3 }
 0x695   :  { %v2455_v51 = vadd.f32 %v2454_v49, %v2431_v50 }
 0x696   :  { %v2388_v56 = vpop.f32.mrf.mxu1 }
 0x697   :  { %v6583_v52 = vmax.f32 %v2409_v3, %v2455_v51  ;;  %v2412_v59 = vadd.f32 %v2411_v33, %v2388_v56 }
 0x699   :  { %3775 = vmatmul.msk.f32.vlgmr.msra.gmra.mxu0 %vm971_vm7, %v6583_v52  ;;  %3778 = vmatmul.msk.f32.vlgmr.msra.gmra.mxu3 %vm971_vm7, %v6583_v52  ;;  %v2508_v10 = vrot.slane %v6583_v52, 1  ;;  %v2730_v25 = vrot.slane %v6583_v52, 3  ;;  %v2645_v6 = vrot.slane %v6583_v52, 2  ;;  %v2815_v23 = vrot.slane %v6583_v52, 4 }
 0x69c   :  { %v2434_v38 = vpop.f32.mrf.mxu3 }
 0x69d   :  { %v2458_v62 = vadd.f32 %v2457_v60, %v2434_v38 }
 0x69f   :  { %v6589_v63 = vmax.f32 %v2412_v59, %v2458_v62 }
 0x6a1   :  { %3776 = vmatmul.msk.f32.gmra.mxu0 %vm971_vm7, %v6589_v63  ;;  %3779 = vmatmul.msk.f32.gmra.mxu3 %vm971_vm7, %v6589_v63  ;;  %v2509_v61 = vrot.slane %v6589_v63, 1  ;;  %v2731_v7 = vrot.slane %v6589_v63, 3  ;;  %v2646_v5 = vrot.slane %v6589_v63, 2  ;;  %v2816_v24 = vrot.slane %v6589_v63, 4 }
 0x6a3   :  { %v2510_v27 = vsel %vm222_vm0, %v2508_v10, %v2509_v61  ;;  %v2732_v44 = vsel %vm495_vm3, %v2730_v25, %v2731_v7  ;;  %v2647_v4 = vsel %vm388_vm2, %v2645_v6, %v2646_v5  ;;  %v2817_v29 = vsel %vm602_vm4, %v2815_v23, %v2816_v24  ;;  %v4050_v23 = vld [vmem:[%s7056_s12 + $0x68] sm:$0xff] }
 0x6a4   :  { %3769 = vmatmul.msk.f32.vlgmr.msra.gmra.mxu1 %vm971_vm7, %v2510_v27  ;;  %3772 = vmatmul.msk.f32.vlgmr.msrb.gmra.mxu2 %vm971_vm7, %v2510_v27 }
 0x6a5   :  { %3858 = vmatpush.msk.msra.mxu1 %vm602_vm4, %v3856_v53  ;;  %3861 = vmatpush.msk.msrb.mxu2 %vm602_vm4, %v3857_v2 }
 0x6a7   :  { %2834 = vmatpush.msra.mxu1 %v3854_v15  ;;  %2857 = vmatpush.msrb.mxu2 %v3855_v19 }
 0x6a9   :  { %3831 = vmatmul.msk.f32.vlgmr.msrb.gmra.mxu0 %vm971_vm7, %v2732_v44  ;;  %3834 = vmatmul.msk.f32.vlgmr.msrb.gmra.mxu3 %vm971_vm7, %v2732_v44 }
 0x6aa   :  { %2835 = vmatpush.msra.mxu1 %v3852_v34  ;;  %2858 = vmatpush.msrb.mxu2 %v3853_v40 }
 0x6ac   :  { %3770 = vmatmul.msk.f32.gmra.mxu1 %vm971_vm7, %v2509_v61  ;;  %3773 = vmatmul.msk.f32.gmra.mxu2 %vm971_vm7, %v2509_v61 }
 0x6ad   :  { %2836 = vmatpush.msra.mxu1 %v3850_v47  ;;  %2859 = vmatpush.msrb.mxu2 %v3851_v39 }
 0x6af   :  { %2837 = vmatpush.msra.mxu1 %v3848_v57  ;;  %2860 = vmatpush.msrb.mxu2 %v3849_v0 }
 0x6b1   :  { %3832 = vmatmul.msk.f32.gmra.mxu0 %vm971_vm7, %v2731_v7  ;;  %3835 = vmatmul.msk.f32.gmra.mxu3 %vm971_vm7, %v2731_v7 }
 0x6b2   :  { %2838 = vmatpush.msra.mxu1 %v3846_v11  ;;  %2861 = vmatpush.msrb.mxu2 %v3847_v55 }
 0x6b4   :  { %3803 = vmatmul.msk.f32.vlgmr.msrb.gmra.mxu1 %vm971_vm7, %v2647_v4  ;;  %3806 = vmatmul.msk.f32.vlgmr.msra.gmra.mxu2 %vm971_vm7, %v2647_v4 }
 0x6b5   :  { %2839 = vmatpush.msra.mxu1 %v3844_v8  ;;  %2862 = vmatpush.msrb.mxu2 %v3845_v12 }
 0x6b7   :  { %2840 = vmatpush.msra.mxu1 %v3842_v1  ;;  %2863 = vmatpush.msrb.mxu2 %v3843_v13 }
 0x6b9   :  { %2841 = vmatpush.msra.mxu1 %v3840_v14  ;;  %2864 = vmatpush.msrb.mxu2 %v3841_v16 }
 0x6bb   :  { %2842 = vmatpush.msra.mxu1 %v3838_v43  ;;  %2865 = vmatpush.msrb.mxu2 %v3839_v17 }
 0x6bc   :  { %3804 = vmatmul.msk.f32.gmra.mxu1 %vm971_vm7, %v2646_v5  ;;  %3807 = vmatmul.msk.f32.gmra.mxu2 %vm971_vm7, %v2646_v5 }
 0x6bd   :  { %2843 = vmatpush.msra.mxu1 %v3836_v18  ;;  %2866 = vmatpush.msrb.mxu2 %v3837_v20  ;;  %v4048_v20 = vld [vmem:[%s7056_s12 + $0x78] sm:$0xff] }
 0x6bf   :  { %2977 = vmatpush.msra.mxu2 %v4030_v21 }
 0x6c1   :  { %2978 = vmatpush.msra.mxu2 %v4031_v58  ;;  %v4049_v58 = vld [vmem:[%s7056_s12 + $0x70] sm:$0xff] }
 0x6c3   :  { %2979 = vmatpush.msra.mxu2 %v4032_v28  ;;  %v4051_v28 = vld [vmem:[%s7055_s11 + $0x98] sm:$0xff] }
 0x6c4   :  { %3859 = vmatmul.msk.f32.vlgmr.msra.gmra.mxu1 %vm971_vm7, %v2817_v29  ;;  %3862 = vmatmul.msk.f32.vlgmr.msrb.gmra.mxu2 %vm971_vm7, %v2817_v29  ;;  %v4052_v29 = vld [vmem:[%s7056_s12 + $0x98] sm:$0xff] }
 0x6c5   :  { %2980 = vmatpush.msra.mxu2 %v4033_v30  ;;  %v4053_v30 = vld [vmem:[%s7056_s12 + $0x60] sm:$0xff] }
 0x6c7   :  { %2981 = vmatpush.msra.mxu2 %v4034_v31  ;;  %v4054_v31 = vld [vmem:[%s7055_s11 + $0x90] sm:$0xff] }
 0x6c9   :  { %2982 = vmatpush.msra.mxu2 %v4035_v32  ;;  %v4055_v32 = vld [vmem:[%s7056_s12 + $0x90] sm:$0xff] }
 0x6cb   :  { %2983 = vmatpush.msra.mxu2 %v4036_v36  ;;  %v4056_v36 = vld [vmem:[%s7056_s12 + $0x58] sm:$0xff] }
 0x6cc   :  { %3860 = vmatmul.msk.f32.gmra.mxu1 %vm971_vm7, %v2816_v24  ;;  %3863 = vmatmul.msk.f32.gmra.mxu2 %vm971_vm7, %v2816_v24 }
 0x6cd   :  { %2984 = vmatpush.msra.mxu2 %v4037_v22  ;;  %v4057_v22 = vld [vmem:[%s7055_s11 + $0x88] sm:$0xff] }
 0x6cf   :  { %2985 = vmatpush.msra.mxu2 %v4038_v37  ;;  %v4058_v37 = vld [vmem:[%s7056_s12 + $0x88] sm:$0xff] }
 0x6d1   :  { %2986 = vmatpush.msra.mxu2 %v4039_v35  ;;  %v4059_v35 = vld [vmem:[%s7056_s12 + $0x50] sm:$0xff] }
 0x6d3   :  { %2987 = vmatpush.msra.mxu2 %v4040_v9  ;;  %v4060_v9 = vld [vmem:[%s7055_s11 + $0x80] sm:$0xff] }
 0x6d5   :  { %2988 = vmatpush.msra.mxu2 %v4041_v42  ;;  %v4061_v42 = vld [vmem:[%s7056_s12 + $0x80] sm:$0xff] }
 0x6d7   :  { %2989 = vmatpush.msra.mxu2 %v4042_v45  ;;  %v4062_v45 = vld [vmem:[%s7056_s12 + $0x48] sm:$0xff] }
 0x6d9   :  { %2990 = vmatpush.msra.mxu2 %v4043_v46  ;;  %v4063_v46 = vld [vmem:[%s7056_s12 + $0x40] sm:$0xff] }
 0x6db   :  { %2991 = vmatpush.msra.mxu2 %v4044_v48  ;;  %v4064_v48 = vld [vmem:[%s7056_s12 + $0x38] sm:$0xff] }
 0x6dd   :  { %2992 = vmatpush.msra.mxu2 %v4045_v54  ;;  %v4065_v54 = vld [vmem:[%s7056_s12 + $0x30] sm:$0xff] }
 0x716   :  { %v2594_v3 = vpop.f32.mrf.mxu0 }
 0x71c   :  { %v2617_v52 = vpop.f32.mrf.mxu3 }
 0x71e   :  { %v2597_v38 = vpop.f32.mrf.mxu0 }
 0x721   :  { %v2538_v49 = vpop.f32.mrf.mxu1 }
 0x722   :  { %v2595_v61 = vadd.f32 %v2594_v3, %v2538_v49  ;;  %v4066_v49 = vld [vmem:[%s7056_s12 + $0x28] sm:$0xff]  ;;  %v4068_v3 = vld [vmem:[%s7056_s12 + $0x18] sm:$0xff] }
 0x724   :  { %v2620_v59 = vpop.f32.mrf.mxu3 }
 0x726   :  { %v2760_v63 = vpop.f32.mrf.mxu0 }
 0x727   :  { %v2561_v50 = vpop.f32.mrf.mxu2 }
 0x728   :  { %v2618_v19 = vadd.f32 %v2617_v52, %v2561_v50  ;;  %v4067_v50 = vld [vmem:[%s7056_s12 + $0x20] sm:$0xff]  ;;  %v4070_v52 = vld [vmem:[%s7056_s12 + $0x8] sm:$0xff] }
 0x729   :  { %v2541_v51 = vpop.f32.mrf.mxu1 }
 0x72a   :  { %v2598_v2 = vadd.f32 %v2597_v38, %v2541_v51  ;;  %v4069_v51 = vld [vmem:[%s7056_s12 + $0x10] sm:$0xff] }
 0x72b   :  { %v4073_v38 = vld [vmem:[%s7059_s15 + $0x70] sm:$0xff] }
 0x72c   :  { %v2783_v7 = vpop.f32.mrf.mxu3 }
 0x72e   :  { %v2763_v34 = vpop.f32.mrf.mxu0 }
 0x72f   :  { %v2564_v56 = vpop.f32.mrf.mxu2 }
 0x730   :  { %v2621_v44 = vadd.f32 %v2620_v59, %v2564_v56  ;;  %v4071_v56 = vld [vmem:[%s7056_s12] sm:$0xff] }
 0x731   :  { %v2675_v33 = vpop.f32.mrf.mxu1  ;;  %v4075_v59 = vld [vmem:[%s7059_s15 + $0x60] sm:$0xff] }
 0x732   :  { %v2704_v27 = vadd.f32 %v2675_v33, %v2595_v61  ;;  %v4072_v33 = vld [vmem:[%s7059_s15 + $0x78] sm:$0xff]  ;;  %v4079_v61 = vld [vmem:[%s7059_s15 + $0x40] sm:$0xff] }
 0x734   :  { %v2789_v25 = vadd.f32 %v2760_v63, %v2704_v27  ;;  %v2786_v12 = vpop.f32.mrf.mxu3  ;;  %v4077_v63 = vld [vmem:[%s7059_s15 + $0x50] sm:$0xff]  ;;  %v4082_v27 = vld [vmem:[%s7059_s15 + $0x28] sm:$0xff] }
 0x737   :  { %v2698_v60 = vpop.f32.mrf.mxu2 }
 0x738   :  { %v2705_v47 = vadd.f32 %v2698_v60, %v2618_v19  ;;  %v4074_v60 = vld [vmem:[%s7059_s15 + $0x68] sm:$0xff]  ;;  %v4085_v19 = vld [vmem:[%s7059_s15 + $0x10] sm:$0xff] }
 0x739   :  { %v2678_v62 = vpop.f32.mrf.mxu1 }
 0x73a   :  { %v2706_v15 = vadd.f32 %v2678_v62, %v2598_v2  ;;  %v2790_v6 = vadd.f32 %v2783_v7, %v2705_v47  ;;  %v4076_v62 = vld [vmem:[%s7059_s15 + $0x58] sm:$0xff]  ;;  %v4081_v2 = vld [vmem:[%s7059_s15 + $0x30] sm:$0xff]  ;;  %v4083_v7 = vld [vmem:[%s7059_s15 + $0x20] sm:$0xff] }
 0x73b   :  { %v3067_v47 = vld [vmem:[%s7057_s13 + $0x48] sm:$0xff] }
 0x73c   :  { %v2791_v57 = vadd.f32 %v2763_v34, %v2706_v15  ;;  %v4084_v15 = vld [vmem:[%s7059_s15 + $0x18] sm:$0xff]  ;;  %v4087_v34 = vld [vmem:[%s7059_s15] sm:$0xff] }
 0x73f   :  { %v2701_v10 = vpop.f32.mrf.mxu2 }
 0x740   :  { %v2707_v5 = vadd.f32 %v2701_v10, %v2621_v44  ;;  %v4078_v10 = vld [vmem:[%s7059_s15 + $0x48] sm:$0xff]  ;;  %v3882_v44 = vld [vmem:[%s7057_s13 + $0x90] sm:$0xff] }
 0x741   :  { %v2845_v53 = vpop.f32.mrf.mxu1 }
 0x742   :  { %v2874_v39 = vadd.f32 %v2845_v53, %v2789_v25  ;;  %v2792_v1 = vadd.f32 %v2786_v12, %v2707_v5  ;;  %v4080_v53 = vld [vmem:[%s7059_s15 + $0x38] sm:$0xff]  ;;  %v4086_v25 = vld [vmem:[%s7059_s15 + $0x8] sm:$0xff]  ;;  %v3880_v5 = vld [vmem:[%s7057_s13 + $0x80] sm:$0xff] }
 0x743   :  { %v3894_v12 = vld [vmem:[%s7057_s13 + $0xe0] sm:$0xff] }
 0x744   :  { %v2878_v55 = vadd.f32 %v2874_v39, %v5223_v26  ;;  %v3066_v39 = vld [vmem:[%s7057_s13 + $0x40] sm:$0xff] }
 0x747   :  { %v2868_v40 = vpop.f32.mrf.mxu2 }
 0x748   :  { %v2875_v4 = vadd.f32 %v2868_v40, %v2790_v6  ;;  %v3883_v40 = vld [vmem:[%s7057_s13 + $0x98] sm:$0xff] }
 0x749   :  { %v2848_v0 = vpop.f32.mrf.mxu1  ;;  %v3879_v6 = vld [vmem:[%s7057_s13 + $0x78] sm:$0xff] }
 0x74a   :  { %v2876_v11 = vadd.f32 %v2848_v0, %v2791_v57  ;;  %v2879_v16 = vadd.f32 %v2875_v4, %v5235_v41  ;;  %v3881_v57 = vld [vmem:[%s7057_s13 + $0x88] sm:$0xff]  ;;  %v3065_v0 = vld [vmem:[%s7057_s13 + $0x38] sm:$0xff] }
 0x74b   :  { %v3893_v4 = vld [vmem:[%s7057_s13 + $0xd8] sm:$0xff] }
 0x74c   :  { %v2880_v8 = vadd.f32 %v2876_v11, %v5223_v26  ;;  %v4046_v26 = vld [vmem:[%s7053_s9] sm:$0x1f]  ;;  %v3064_v11 = vld [vmem:[%s7057_s13 + $0x30] sm:$0xff]  ;;  %s3256_s9 = sshll.u32 %s7061_s17, 4  ;;  %s3257_s9 = int_to_ptr.hbm [resolvable:$true] %s3256_s9 }
 0x74e   :  { %3974 = vtanh.f32 %v2880_v8  ;;  %v3063_v8 = vld [vmem:[%s7057_s13 + $0x28] sm:$0xff] }
 0x74f   :  { %v2871_v13 = vpop.f32.mrf.mxu2  ;;  %3976 = vtanh.f32 %v2878_v55  ;;  %v3895_v55 = vld [vmem:[%s7057_s13 + $0xe8] sm:$0xff] }
 0x750   :  { %v2877_v14 = vadd.f32 %v2871_v13, %v2792_v1  ;;  %3143 = vmatpush.msrb.mxu2 %v3895_v55  ;;  %v3878_v1 = vld [vmem:[%s7057_s13 + $0x70] sm:$0xff]  ;;  %v3062_v13 = vld [vmem:[%s7057_s13 + $0x20] sm:$0xff] }
 0x752   :  { %v2881_v43 = vadd.f32 %v2877_v14, %v5235_v41  ;;  %v4047_v41 = vld [vmem:[%s7054_s10] sm:$0x1f]  ;;  %3144 = vmatpush.msrb.mxu2 %v3894_v12  ;;  %v3892_v14 = vld [vmem:[%s7057_s13 + $0xd0] sm:$0xff] }
 0x754   :  { %v3975_v17 = vpop.eup %3974  ;;  %3978 = vtanh.f32 %v2881_v43  ;;  %v3061_v43 = vld [vmem:[%s7057_s13 + $0x18] sm:$0xff]  ;;  %3145 = vmatpush.msrb.mxu2 %v3893_v4  ;;  %v4088_v4 = vld [vmem:[%s7058_s14] sm:$0x1] }
 0x755   :  { %3864 = vmatpush.msk.msra.mxu3 %vm1359_vm8, %v3975_v17  ;;  %3868 = vmatpush.msk.msra.mxu0 %vm1359_vm8, %v3975_v17  ;;  %v3977_v18 = vpop.eup %3976  ;;  %3980 = vtanh.f32 %v2879_v16  ;;  %v3877_v16 = vld [vmem:[%s7057_s13 + $0x68] sm:$0xff]  ;;  %v3876_v17 = vld [vmem:[%s7057_s13 + $0x60] sm:$0xff] }
 0x756   :  { %3146 = vmatpush.msrb.mxu2 %v3892_v14 }
 0x757   :  { %2907 = vmatpush.msra.mxu3 %v3977_v18  ;;  %2947 = vmatpush.msra.mxu0 %v3977_v18  ;;  %v3060_v18 = vld [vmem:[%s7057_s13 + $0x10] sm:$0xff] }
 0x758   :  { %3865 = vmatmul.msk.f32.vlgmr.msra.gmra.mxu3 %vm1355_vm9, %v4046_v26  ;;  %3869 = vmatmul.msk.f32.vlgmr.msra.gmra.mxu0 %vm1355_vm9, %v4047_v41 }
 0x759   :  { %3017 = vmatpush.msrb.mxu0 %v4048_v20  ;;  %v3874_v20 = vld [vmem:[%s7057_s13 + $0x50] sm:$0xff] }
 0x75a   :  { %v3979_v21 = vpop.eup %3978 }
 0x75b   :  { %3866 = vmatpush.msk.msrb.mxu3 %vm1359_vm8, %v3979_v21  ;;  %3870 = vmatpush.msk.msrb.mxu1 %vm1359_vm8, %v3979_v21  ;;  %v3981_v24 = vpop.eup %3980  ;;  %v3058_v21 = vld [vmem:[%s7057_s13] sm:$0xff] }
 0x75c   :  { %3018 = vmatpush.msrb.mxu0 %v4049_v58 }
 0x75d   :  { %2927 = vmatpush.msrb.mxu3 %v3981_v24  ;;  %2967 = vmatpush.msrb.mxu1 %v3981_v24 }
 0x75e   :  { %3871 = vmatmul.msk.f32.vlgmr.msrb.gmra.mxu1 %vm1355_vm9, %v4047_v41  ;;  %3019 = vmatpush.msrb.mxu0 %v4050_v23  ;;  %v3059_v41 = vld [vmem:[%s7057_s13 + $0x8] sm:$0xff] }
 0x75f   :  { %3009 = vmatpush.msra.mxu3 %v4051_v28  ;;  %3049 = vmatpush.msra.mxu1 %v4052_v29 }
 0x760   :  { %3867 = vmatmul.msk.f32.vlgmr.msrb.gmra.mxu3 %vm1355_vm9, %v4046_v26  ;;  %3020 = vmatpush.msrb.mxu0 %v4053_v30  ;;  %v3875_v26 = vld [vmem:[%s7057_s13 + $0x58] sm:$0xff] }
 0x761   :  { %3010 = vmatpush.msra.mxu3 %v4054_v31  ;;  %3050 = vmatpush.msra.mxu1 %v4055_v32  ;;  %v3906_v31 = vld [vmem:[%s7057_s13 + $0x138] sm:$0xff]  ;;  %v3917_v32 = vld [vmem:[%s7057_s13 + $0x188] sm:$0xff] }
 0x762   :  { %3021 = vmatpush.msrb.mxu0 %v4056_v36  ;;  %v3905_v36 = vld [vmem:[%s7057_s13 + $0x130] sm:$0xff] }
 0x763   :  { %3011 = vmatpush.msra.mxu3 %v4057_v22  ;;  %3051 = vmatpush.msra.mxu1 %v4058_v37  ;;  %v3891_v22 = vld [vmem:[%s7057_s13 + $0xc8] sm:$0xff]  ;;  %v3916_v37 = vld [vmem:[%s7057_s13 + $0x180] sm:$0xff] }
 0x764   :  { %3022 = vmatpush.msrb.mxu0 %v4059_v35  ;;  %3147 = vmatpush.msrb.mxu2 %v3891_v22  ;;  %v3890_v35 = vld [vmem:[%s7057_s13 + $0xc0] sm:$0xff] }
 0x765   :  { %3012 = vmatpush.msra.mxu3 %v4060_v9  ;;  %3052 = vmatpush.msra.mxu1 %v4061_v42  ;;  %v3915_v9 = vld [vmem:[%s7057_s13 + $0x178] sm:$0xff]  ;;  %v3904_v42 = vld [vmem:[%s7057_s13 + $0x128] sm:$0xff] }
 0x766   :  { %3023 = vmatpush.msrb.mxu0 %v4062_v45  ;;  %3148 = vmatpush.msrb.mxu2 %v3890_v35  ;;  %v3889_v45 = vld [vmem:[%s7057_s13 + $0xb8] sm:$0xff] }
 0x767   :  { %3088 = vmatpush.msrb.mxu3 %v3883_v40  ;;  %3110 = vmatpush.msrb.mxu1 %v3067_v47 }
 0x768   :  { %3024 = vmatpush.msrb.mxu0 %v4063_v46  ;;  %v3914_v46 = vld [vmem:[%s7057_s13 + $0x170] sm:$0xff]  ;;  %3149 = vmatpush.msrb.mxu2 %v3889_v45 }
 0x769   :  { %3089 = vmatpush.msrb.mxu3 %v3882_v44  ;;  %3111 = vmatpush.msrb.mxu1 %v3066_v39 }
 0x76a   :  { %3025 = vmatpush.msrb.mxu0 %v4064_v48  ;;  %v3903_v48 = vld [vmem:[%s7057_s13 + $0x120] sm:$0xff] }
 0x76b   :  { %3090 = vmatpush.msrb.mxu3 %v3881_v57  ;;  %3112 = vmatpush.msrb.mxu1 %v3065_v0 }
 0x76c   :  { %3026 = vmatpush.msrb.mxu0 %v4065_v54  ;;  %v3888_v54 = vld [vmem:[%s7057_s13 + $0xb0] sm:$0xff] }
 0x76d   :  { %3091 = vmatpush.msrb.mxu3 %v3880_v5  ;;  %3113 = vmatpush.msrb.mxu1 %v3064_v11 }
 0x76e   :  { %3027 = vmatpush.msrb.mxu0 %v4066_v49  ;;  %v3913_v49 = vld [vmem:[%s7057_s13 + $0x168] sm:$0xff]  ;;  %3150 = vmatpush.msrb.mxu2 %v3888_v54 }
 0x76f   :  { %3092 = vmatpush.msrb.mxu3 %v3879_v6  ;;  %3114 = vmatpush.msrb.mxu1 %v3063_v8 }
 0x770   :  { %3028 = vmatpush.msrb.mxu0 %v4067_v50  ;;  %v3902_v50 = vld [vmem:[%s7057_s13 + $0x118] sm:$0xff] }
 0x771   :  { %3093 = vmatpush.msrb.mxu3 %v3878_v1  ;;  %3115 = vmatpush.msrb.mxu1 %v3062_v13 }
 0x772   :  { %3029 = vmatpush.msrb.mxu0 %v4068_v3  ;;  %v3887_v3 = vld [vmem:[%s7057_s13 + $0xa8] sm:$0xff] }
 0x773   :  { %3094 = vmatpush.msrb.mxu3 %v3877_v16  ;;  %3116 = vmatpush.msrb.mxu1 %v3061_v43  ;;  %v4089_v16 = vld [vmem:[%s7060_s16] sm:$0x1] }
 0x774   :  { %3030 = vmatpush.msrb.mxu0 %v4069_v51  ;;  %v3912_v51 = vld [vmem:[%s7057_s13 + $0x160] sm:$0xff]  ;;  %3151 = vmatpush.msrb.mxu2 %v3887_v3 }
 0x775   :  { %3095 = vmatpush.msrb.mxu3 %v3876_v17  ;;  %3117 = vmatpush.msrb.mxu1 %v3060_v18 }
 0x776   :  { %3031 = vmatpush.msrb.mxu0 %v4070_v52  ;;  %v3901_v52 = vld [vmem:[%s7057_s13 + $0x110] sm:$0xff] }
 0x777   :  { %3096 = vmatpush.msrb.mxu3 %v3875_v26  ;;  %3118 = vmatpush.msrb.mxu1 %v3059_v41 }
 0x778   :  { %3032 = vmatpush.msrb.mxu0 %v4071_v56  ;;  %v3886_v56 = vld [vmem:[%s7057_s13 + $0xa0] sm:$0xff] }
 0x779   :  { %3097 = vmatpush.msrb.mxu3 %v3874_v20  ;;  %3119 = vmatpush.msrb.mxu1 %v3058_v21 }
 0x77a   :  { %3228 = vmatpush.msra.mxu0 %v4072_v33  ;;  %v3911_v33 = vld [vmem:[%s7057_s13 + $0x158] sm:$0xff]  ;;  %3152 = vmatpush.msrb.mxu2 %v3886_v56 }
 0x77c   :  { %3229 = vmatpush.msra.mxu0 %v4073_v38  ;;  %v3900_v38 = vld [vmem:[%s7057_s13 + $0x108] sm:$0xff] }
 0x77e   :  { %3230 = vmatpush.msra.mxu0 %v4074_v60  ;;  %v3899_v60 = vld [vmem:[%s7057_s13 + $0x100] sm:$0xff] }
 0x780   :  { %3231 = vmatpush.msra.mxu0 %v4075_v59  ;;  %v3910_v59 = vld [vmem:[%s7057_s13 + $0x150] sm:$0xff] }
 0x782   :  { %3232 = vmatpush.msra.mxu0 %v4076_v62  ;;  %v3898_v62 = vld [vmem:[%s7057_s13 + $0xf8] sm:$0xff] }
 0x784   :  { %3233 = vmatpush.msra.mxu0 %v4077_v63  ;;  %v3909_v63 = vld [vmem:[%s7057_s13 + $0x148] sm:$0xff] }
 0x786   :  { %3234 = vmatpush.msra.mxu0 %v4078_v10  ;;  %v3897_v10 = vld [vmem:[%s7057_s13 + $0xf0] sm:$0xff] }
 0x788   :  { %3235 = vmatpush.msra.mxu0 %v4079_v61  ;;  %v3908_v61 = vld [vmem:[%s7057_s13 + $0x140] sm:$0xff] }
 0x78a   :  { %3236 = vmatpush.msra.mxu0 %v4080_v53 }
 0x78c   :  { %3237 = vmatpush.msra.mxu0 %v4081_v2 }
 0x78e   :  { %3238 = vmatpush.msra.mxu0 %v4082_v27 }
 0x790   :  { %3239 = vmatpush.msra.mxu0 %v4083_v7 }
 0x792   :  { %3240 = vmatpush.msra.mxu0 %v4084_v15 }
 0x794   :  { %3241 = vmatpush.msra.mxu0 %v4085_v19 }
 0x796   :  { %3242 = vmatpush.msra.mxu0 %v4086_v25 }
 0x798   :  { %3243 = vmatpush.msra.mxu0 %v4087_v34 }
 0x7d5   :  { %v2949_v24 = vpop.f32.mrf.mxu0 }
 0x7db   :  { %v2909_v58 = vpop.f32.mrf.mxu3  ;;  %v2969_v28 = vpop.f32.mrf.mxu1 }
 0x7dc   :  { %v2972_v23 = vmax.f32 %v2909_v58, %v2949_v24 }
 0x7de   :  { %2993 = vmatmul.f32.vlgmr.msra.gmra.mxu2 %v2972_v23  ;;  %3033 = vmatmul.f32.vlgmr.msrb.gmra.mxu0 %v2972_v23 }
 0x7e3   :  { %v2929_v29 = vpop.f32.mrf.mxu3 }
 0x7e4   :  { %v2973_v30 = vmax.f32 %v2929_v29, %v2969_v28 }
 0x7e6   :  { %3872 = vmatmul.msk.f32.vlgmr.msra.gmra.mxu3 %vm1451_vm10, %v2973_v30  ;;  %3873 = vmatmul.msk.f32.vlgmr.msra.gmra.mxu1 %vm1451_vm10, %v2973_v30 }
 0x7e7   :  { %3177 = vmatpush.msra.mxu3 %v3906_v31  ;;  %3211 = vmatpush.msra.mxu1 %v3917_v32 }
 0x7e9   :  { %3178 = vmatpush.msra.mxu3 %v3905_v36  ;;  %3212 = vmatpush.msra.mxu1 %v3916_v37 }
 0x7eb   :  { %3213 = vmatpush.msra.mxu1 %v3915_v9  ;;  %3179 = vmatpush.msra.mxu3 %v3904_v42 }
 0x7ed   :  { %3214 = vmatpush.msra.mxu1 %v3914_v46  ;;  %3180 = vmatpush.msra.mxu3 %v3903_v48 }
 0x7ef   :  { %3215 = vmatpush.msra.mxu1 %v3913_v49  ;;  %3181 = vmatpush.msra.mxu3 %v3902_v50 }
 0x7f1   :  { %3216 = vmatpush.msra.mxu1 %v3912_v51  ;;  %3182 = vmatpush.msra.mxu3 %v3901_v52 }
 0x7f3   :  { %3217 = vmatpush.msra.mxu1 %v3911_v33  ;;  %3183 = vmatpush.msra.mxu3 %v3900_v38 }
 0x7f5   :  { %3218 = vmatpush.msra.mxu1 %v3910_v59  ;;  %3184 = vmatpush.msra.mxu3 %v3899_v60 }
 0x7f7   :  { %3219 = vmatpush.msra.mxu1 %v3909_v63  ;;  %3185 = vmatpush.msra.mxu3 %v3898_v62 }
 0x7f9   :  { %3220 = vmatpush.msra.mxu1 %v3908_v61  ;;  %3186 = vmatpush.msra.mxu3 %v3897_v10 }
 0x85b   :  { %v3034_v2 = vpop.f32.mrf.mxu0 }
 0x861   :  { %v2994_v27 = vpop.f32.mrf.mxu2 }
 0x863   :  { %v3054_v53 = vpop.f32.mrf.mxu1 }
 0x864   :  { %v3055_v19 = vadd.f32 %v3054_v53, %v3034_v2 }
 0x869   :  { %v3014_v7 = vpop.f32.mrf.mxu3 }
 0x86a   :  { %v3015_v15 = vadd.f32 %v3014_v7, %v2994_v27 }
 0x86c   :  { %v3057_v25 = vmax.f32 %v3015_v15, %v3055_v19 }
 0x86e   :  { %v3079_v34 = vrot.slane %v3057_v25, 1  ;;  %v3134_v40 = vrot.slane %v3057_v25, 2  ;;  %3885 = vmatmul.msk.f32.vlgmr.msrb.gmra.mxu1 %vm1559_vm11, %v3057_v25  ;;  %v3202_v44 = vrot.slane %v3057_v25, 4  ;;  %v3168_v47 = vrot.slane %v3057_v25, 3 }
 0x870   :  { %3884 = vmatmul.msk.f32.vlgmr.msrb.gmra.mxu3 %vm1559_vm11, %v3079_v34  ;;  %3896 = vmatmul.msk.f32.vlgmr.msrb.gmra.mxu2 %vm1559_vm11, %v3134_v40 }
 0x876   :  { %3918 = vmatmul.msk.f32.vlgmr.msra.gmra.mxu1 %vm1559_vm11, %v3202_v44 }
 0x878   :  { %3907 = vmatmul.msk.f32.vlgmr.msra.gmra.mxu3 %vm1559_vm11, %v3168_v47 }
 0x8eb   :  { %v3121_v39 = vpop.f32.mrf.mxu1 }
 0x8f3   :  { %v3099_v57 = vpop.f32.mrf.mxu3  ;;  %v3154_v5 = vpop.f32.mrf.mxu2 }
 0x8f4   :  { %v3122_v0 = vadd.f32 %v3121_v39, %v3099_v57  ;;  %v3222_v8 = vpop.f32.mrf.mxu1 }
 0x8f6   :  { %v3157_v11 = vadd.f32 %v3154_v5, %v3122_v0 }
 0x8fb   :  { %v3188_v55 = vpop.f32.mrf.mxu3 }
 0x8fc   :  { %v3191_v6 = vadd.f32 %v3188_v55, %v3157_v11 }
 0x8fe   :  { %v3225_v12 = vadd.f32 %v3222_v8, %v3191_v6 }
 0x900   :  { %v3226_v1 = vadd.f32 %v4088_v4, %v3225_v12 }
 0x902   :  { %3982 = vtanh.f32 %v3226_v1 }
 0x908   :  { %v3983_v13 = vpop.eup %3982 }
 0x909   :  { %3244 = vmatmul.f32.vlgmr.msra.gmra.mxu0 %v3983_v13 }
 0x986   :  { %v3245_v14 = vpop.f32.mrf.mxu0 }
 0x987   :  { %v3246_v43 = vadd.f32 %v4089_v16, %v3245_v14 }
 0x989   :  { %3248 = vst.msk [vmem:[#allocation2 + $0x1] sm:$0x1] %vm1731_vm12, %v3246_v43 }
 0x98a   :  { %3259 = dma.vmem_to_hbm [thread:$0]  %s3255_s21, 32, %s3257_s9, [#allocation3]  }
 0x98b   :  { %4114 = dma.done.wait [#allocation3], 32  }
 0x98c   :  { %4115 = vsyncadd [#allocation3], 4294967264 }
 0x98d   :  { %3264 = vsyncpa [#allocation3], 1 }

</bundles_post_ra>
